<compile_context>
chip_gen: v6e
topology: v6e:2x2x1
jax: 0.10.0
libtpu: 0.0.40
codegen_flags: <defaults>
</compile_context>

<pallas_src>
import functools

import jax
import jax.numpy as jnp
from jax.experimental import pallas as pl
from jax.experimental.pallas import tpu as pltpu


# ---------------------------------------------------------------------------
# Fused Pallas kernel: whole Block35_up for a batch-tile of images
# ---------------------------------------------------------------------------

def _block35_kernel(x_ref, w96_ref, b96_ref,
                    wbd_ref, bbd_ref,
                    w2c_ref, b2c_ref,
                    wo0_ref, wo1_ref, wo2_ref, bout_ref,
                    o_ref, pad_ref, *, BT, H, W):
    # x_ref:  (BT*HW, 256) f32        input rows (batch folded into M)
    # w96:    (256, 96) bf16, b96 (1, 96) f32   fused 1x1 branches (BN folded)
    # wbd:    (576, 64) bf16, bbd (1, 64) f32   block-diag fused 3x3 (branch1_2 + branch2_2)
    # w2c:    (576, 32) bf16, b2c (1, 32) f32   branch2_3, zero-extended over stale channels
    # wo0/1/2:(32, 256) bf16, bout (1, 256) f32 final 1x1 conv split per branch (scale folded)
    # pad_ref:(BT, H+2, W+2, 64) f32 scratch with zero halo for the 3x3 convs
    HW = H * W
    M = BT * HW
    Cb = 32
    CC = 64

    # Scratch persists across grid steps; the interior is fully overwritten before each use
    # and the halo is never written, so zero it exactly once.
    @pl.when(pl.program_id(0) == 0)
    def _():
        pad_ref[...] = jnp.zeros_like(pad_ref)

    # --- all three 1x1 branch convs as one MXU pass (bf16 operands, f32 acc) ----------
    y96 = jnp.dot(x_ref[...].astype(jnp.bfloat16), w96_ref[...],
                  preferred_element_type=jnp.float32)
    y96 = jnp.maximum(y96 + b96_ref[...], 0.0)                    # (M, 96) f32

    def im2col():
        xp = pad_ref[...].astype(jnp.bfloat16)                    # (BT, H+2, W+2, 64)
        return jnp.concatenate(
            [xp[:, ky:ky + H, kx:kx + W, :].reshape(M, CC)
             for ky in range(3) for kx in range(3)], axis=-1)     # (M, 576) bf16

    # --- fused first-level 3x3 convs (branch1_2 & branch2_2 share one im2col) ---------
    pad_ref[:, 1:H + 1, 1:W + 1, :] = y96[:, Cb:3 * Cb].reshape(BT, H, W, CC)
    y64 = jnp.dot(im2col(), wbd_ref[...], preferred_element_type=jnp.float32)
    y64 = jnp.maximum(y64 + bbd_ref[...], 0.0)                    # (M, 64): [:, :32]=x1

    # --- second-level 3x3 conv (branch2_3): only scratch channels 0:32 are live; the
    #     stale 32:64 channels are killed by the zero rows baked into w2c_ref -----------
    pad_ref[:, 1:H + 1, 1:W + 1, 0:Cb] = y64[:, Cb:2 * Cb].reshape(BT, H, W, Cb)
    x2 = jnp.dot(im2col(), w2c_ref[...], preferred_element_type=jnp.float32)
    x2 = jnp.maximum(x2 + b2c_ref[...], 0.0)                      # (M, 32)

    # --- final 1x1 conv as split-weight accumulation (no lane concat) + residual + ReLU
    out = jnp.dot(y96[:, 0:Cb].astype(jnp.bfloat16), wo0_ref[...],
                  preferred_element_type=jnp.float32)
    out = out + jnp.dot(y64[:, 0:Cb].astype(jnp.bfloat16), wo1_ref[...],
                        preferred_element_type=jnp.float32)
    out = out + jnp.dot(x2.astype(jnp.bfloat16), wo2_ref[...],
                        preferred_element_type=jnp.float32)
    o_ref[...] = jnp.maximum(out + bout_ref[...] + x_ref[...], 0.0)


# ---------------------------------------------------------------------------
# Trace-level weight packing (BN fold, branch fusion, block-diag 3x3, bf16 cast)
# ---------------------------------------------------------------------------

def _pack_params(p, scale):
    bf16 = jnp.bfloat16

    def fold1x1(name):
        w = p[f"{name}_w"][0, 0]                      # (Cin, Cout)
        return w * p[f"{name}_s"], p[f"{name}_b"]     # fold BN scale into weight

    w0, b0 = fold1x1("b0")
    w1a, b1a = fold1x1("b1a")
    w2a, b2a = fold1x1("b2a")
    w96 = jnp.concatenate([w0, w1a, w2a], axis=1).astype(bf16)    # (256, 96)
    b96 = jnp.concatenate([b0, b1a, b2a], axis=1)                 # (1, 96) f32

    def fold3x3(name):
        w = p[f"{name}_w"] * p[f"{name}_s"]           # (3,3,32,32), BN scale over Cout
        return w.reshape(9, 32, 32), p[f"{name}_b"]

    w1b, b1b = fold3x3("b1b")
    w2b, b2b = fold3x3("b2b")
    w2c, b2c = fold3x3("b2c")
    z = jnp.zeros((9, 32, 32), jnp.float32)

    # Block-diagonal weight fusing branch1_2 and branch2_2: per 3x3 tap the K rows are
    # [branch1 input chans 0:32, branch2 input chans 32:64]; outputs [x1 | x2_mid].
    wbd = jnp.concatenate(
        [jnp.concatenate([w1b, z], axis=-1),
         jnp.concatenate([z, w2b], axis=-1)], axis=1).reshape(9 * 64, 64).astype(bf16)
    bbd = jnp.concatenate([b1b, b2b], axis=1)                     # (1, 64) f32

    # branch2_3 weight, zero-extended so stale channels 32:64 of the shared scratch
    # contribute nothing.
    w2c_ext = jnp.concatenate([w2c, z], axis=1).reshape(9 * 64, 32).astype(bf16)

    # final 1x1 conv split per branch; residual `scale` folded into weight and bias.
    wout = p["out_w"] * scale                                     # (96, 256)
    wo0 = wout[0:32].astype(bf16)
    wo1 = wout[32:64].astype(bf16)
    wo2 = wout[64:96].astype(bf16)
    bout = p["out_b"] * scale                                     # (1, 256) f32
    return (w96, b96, wbd, bbd, w2c_ext, b2c, wo0, wo1, wo2, bout)


# ---------------------------------------------------------------------------
# Full Block35_up forward (single pallas_call)
# ---------------------------------------------------------------------------

def block35_up(x, p, scale=1.0, batch_tile=None):
    B, H, W, C = x.shape
    bt = B if batch_tile is None else batch_tile   # set bt=B//2 on v7x for 2-way megacore
    assert B % bt == 0
    nsteps = B // bt
    HW = H * W
    Mt = bt * HW
    x_flat = x.reshape(nsteps, Mt, C)

    packed = _pack_params(p, scale)
    kernel = functools.partial(_block35_kernel, BT=bt, H=H, W=W)

    flops = 2 * B * HW * (C * 96 + 576 * 64 + 576 * 32 + 3 * 32 * C)
    bytes_accessed = int(4 * (2 * B * HW * C)
                         + 2 * (256 * 96 + 576 * 64 + 576 * 32 + 3 * 32 * 256)
                         + 4 * (96 + 64 + 32 + 256))

    def wspec(a):
        return pl.BlockSpec(a.shape, lambda i, _nd=a.ndim: (0,) * _nd)

    out = pl.pallas_call(
        kernel,
        out_shape=jax.ShapeDtypeStruct((nsteps, Mt, C), jnp.float32),
        grid=(nsteps,),
        in_specs=[pl.BlockSpec((None, Mt, C), lambda i: (i, 0, 0))]
                 + [wspec(a) for a in packed],
        out_specs=pl.BlockSpec((None, Mt, C), lambda i: (i, 0, 0)),
        scratch_shapes=[pltpu.VMEM((bt, H + 2, W + 2, 64), jnp.float32)],
        compiler_params=pltpu.CompilerParams(
            dimension_semantics=("parallel",),
            vmem_limit_bytes=32 * 1024 * 1024),
        cost_estimate=pl.CostEstimate(flops=flops, transcendentals=0,
                                      bytes_accessed=bytes_accessed),
    )(x_flat, *packed)
    return out.reshape(B, H, W, C)


# ---------------------------------------------------------------------------
# Parameter construction (deterministic, synthetic)
# ---------------------------------------------------------------------------

def _convtranspose_to_hwio(w_t):
    # torch ConvTranspose2d weight (Cin, Cout, kH, kW) -> equivalent regular
    # cross-correlation kernel in HWIO: w[ky,kx,i,o] = w_t[i,o,K-1-ky,K-1-kx]
    return jnp.transpose(jnp.flip(w_t, axis=(2, 3)), (2, 3, 0, 1))


def _make_conv_bn(key, cin, cout, k):
    kw, kg, kb, km, kv = jax.random.split(key, 5)
    w_t = jax.random.normal(kw, (cin, cout, k, k), jnp.float32) * 0.05
    gamma = 1.0 + 0.1 * jax.random.normal(kg, (cout,), jnp.float32)
    beta = 0.1 * jax.random.normal(kb, (cout,), jnp.float32)
    mean = 0.05 * jax.random.normal(km, (cout,), jnp.float32)
    var = 1.0 + 0.1 * jax.random.uniform(kv, (cout,), jnp.float32)
    eps = 1e-3
    s = gamma / jnp.sqrt(var + eps)
    b = beta - mean * s
    return _convtranspose_to_hwio(w_t), s.reshape(1, cout), b.reshape(1, cout)


def init_params(key):
    keys = jax.random.split(key, 8)
    p = {}
    for name, kk, cin, cout, ksz in [
        ("b0", keys[0], 256, 32, 1),
        ("b1a", keys[1], 256, 32, 1),
        ("b1b", keys[2], 32, 32, 3),
        ("b2a", keys[3], 256, 32, 1),
        ("b2b", keys[4], 32, 32, 3),
        ("b2c", keys[5], 32, 32, 3),
    ]:
        w, s, b = _make_conv_bn(kk, cin, cout, ksz)
        p[f"{name}_w"], p[f"{name}_s"], p[f"{name}_b"] = w, s, b
    # final ConvTranspose2d(96, 256, k=1) with bias (no BN)
    w_t = jax.random.normal(keys[6], (96, 256, 1, 1), jnp.float32) * 0.05
    p["out_w"] = _convtranspose_to_hwio(w_t)[0, 0]          # (96, 256) matmul matrix
    p["out_b"] = (0.1 * jax.random.normal(keys[7], (256,), jnp.float32)).reshape(1, 256)
    return p


# ---------------------------------------------------------------------------
# Pure-JAX reference (same math, XLA conv) for a sanity check
# ---------------------------------------------------------------------------

def ref_block35_up(x, p, scale=1.0):
    hi = jax.lax.Precision.HIGHEST

    def c1(xx, w, s, b):
        y = jnp.einsum("bhwi,io->bhwo", xx, w[0, 0], precision=hi)
        return jnp.maximum(y * s.reshape(1, 1, 1, -1) + b.reshape(1, 1, 1, -1), 0.0)

    def c3(xx, w, s, b):
        y = jax.lax.conv_general_dilated(
            xx, w, (1, 1), ((1, 1), (1, 1)),
            dimension_numbers=("NHWC", "HWIO", "NHWC"), precision=hi)
        return jnp.maximum(y * s.reshape(1, 1, 1, -1) + b.reshape(1, 1, 1, -1), 0.0)

    x0 = c1(x, p["b0_w"], p["b0_s"], p["b0_b"])
    x1 = c3(c1(x, p["b1a_w"], p["b1a_s"], p["b1a_b"]),
            p["b1b_w"], p["b1b_s"], p["b1b_b"])
    x2 = c1(x, p["b2a_w"], p["b2a_s"], p["b2a_b"])
    x2 = c3(x2, p["b2b_w"], p["b2b_s"], p["b2b_b"])
    x2 = c3(x2, p["b2c_w"], p["b2c_s"], p["b2c_b"])
    xc = jnp.concatenate([x0, x1, x2], axis=-1)
    y = jnp.einsum("bhwi,io->bhwo", xc, p["out_w"], precision=hi) + p["out_b"].reshape(1, 1, 1, -1)
    return jnp.maximum(y * scale + x, 0.0)


if __name__ == "__main__":
    key = jax.random.PRNGKey(0)
    kx, kp = jax.random.split(key)

    B, H, W, C = 2, 8, 8, 256          # NHWC (torch equivalent: x of shape (2, 256, 8, 8))
    x = jax.random.normal(kx, (B, H, W, C), jnp.float32)
    params = init_params(kp)
    scale = 0.17

    fwd = jax.jit(functools.partial(block35_up, scale=scale))
    out = jax.block_until_ready(fwd(x, params))

    ref = ref_block35_up(x, params, scale=scale)
    assert out.shape == (B, H, W, C)
    # Tolerance covers bf16 matmul operands (f32 accumulation) vs. the HIGHEST-precision
    # reference; observed error is well below this.
    err = float(jnp.max(jnp.abs(out - ref)))
    assert err < 5e-2, f"max abs err {err}"

    print("KERNEL_OK")
</pallas_src>

<mosaic_0001>
module attributes {stable_mosaic.version = 11 : i64} {
  func.func @_block35_kernel(%arg0: i32, %arg1: memref<1x128x256xf32, #tpu.memory_space<vmem>>, %arg2: memref<256x96xbf16, #tpu.memory_space<vmem>>, %arg3: memref<1x96xf32, #tpu.memory_space<vmem>>, %arg4: memref<576x64xbf16, #tpu.memory_space<vmem>>, %arg5: memref<1x64xf32, #tpu.memory_space<vmem>>, %arg6: memref<576x32xbf16, #tpu.memory_space<vmem>>, %arg7: memref<1x32xf32, #tpu.memory_space<vmem>>, %arg8: memref<32x256xbf16, #tpu.memory_space<vmem>>, %arg9: memref<32x256xbf16, #tpu.memory_space<vmem>>, %arg10: memref<32x256xbf16, #tpu.memory_space<vmem>>, %arg11: memref<1x256xf32, #tpu.memory_space<vmem>>, %arg12: memref<1x128x256xf32, #tpu.memory_space<vmem>>, %arg13: memref<2x10x10x64xf32, #tpu.memory_space<vmem>>) attributes {dimension_semantics = [#tpu.dimension_semantics<parallel>], iteration_bounds = array<i64: 1>, scalar_prefetch = 0 : i64, scratch_operands = 1 : i64, tpu.core_type = #tpu.core_type<tc>, window_params = [{transform_indices = @transform_0, window_bounds = array<i64: 1, 128, 256>}, {pipeline_mode = #tpu.pipeline_mode<synchronous>, transform_indices = @transform_1, window_bounds = array<i64: 256, 96>}, {pipeline_mode = #tpu.pipeline_mode<synchronous>, transform_indices = @transform_2, window_bounds = array<i64: 1, 96>}, {pipeline_mode = #tpu.pipeline_mode<synchronous>, transform_indices = @transform_3, window_bounds = array<i64: 576, 64>}, {pipeline_mode = #tpu.pipeline_mode<synchronous>, transform_indices = @transform_4, window_bounds = array<i64: 1, 64>}, {pipeline_mode = #tpu.pipeline_mode<synchronous>, transform_indices = @transform_5, window_bounds = array<i64: 576, 32>}, {pipeline_mode = #tpu.pipeline_mode<synchronous>, transform_indices = @transform_6, window_bounds = array<i64: 1, 32>}, {pipeline_mode = #tpu.pipeline_mode<synchronous>, transform_indices = @transform_7, window_bounds = array<i64: 32, 256>}, {pipeline_mode = #tpu.pipeline_mode<synchronous>, transform_indices = @transform_8, window_bounds = array<i64: 32, 256>}, {pipeline_mode = #tpu.pipeline_mode<synchronous>, transform_indices = @transform_9, window_bounds = array<i64: 32, 256>}, {pipeline_mode = #tpu.pipeline_mode<synchronous>, transform_indices = @transform_10, window_bounds = array<i64: 1, 256>}, {transform_indices = @transform_11, window_bounds = array<i64: 1, 128, 256>}]} {
    %c0_i32 = arith.constant 0 : i32
    %0 = arith.cmpi eq, %arg0, %c0_i32 : i32
    %1 = arith.extui %0 : i1 to i32
    %c0_i32_0 = arith.constant 0 : i32
    %2 = arith.cmpi ne, %1, %c0_i32_0 : i32
    scf.if %2 {
      %cst_53 = arith.constant 0.000000e+00 : f32
      %99 = vector.broadcast %cst_53 : f32 to vector<2x10x10x64xf32>
      %c0_54 = arith.constant 0 : index
      %c0_55 = arith.constant 0 : index
      %c0_56 = arith.constant 0 : index
      %c0_57 = arith.constant 0 : index
      %100 = vector.load %arg13[%c0_54, %c0_55, %c0_56, %c0_57] : memref<2x10x10x64xf32, #tpu.memory_space<vmem>>, vector<2x10x10x64xf32>
      tpu.vector_store %arg13[%c0_54, %c0_55, %c0_56, %c0_57], %99 {strides = array<i32>} : memref<2x10x10x64xf32, #tpu.memory_space<vmem>>, vector<2x10x10x64xf32>,
    } else {
    }
    %c0 = arith.constant 0 : index
    %c0_1 = arith.constant 0 : index
    %c0_2 = arith.constant 0 : index
    %3 = vector.load %arg1[%c0, %c0_1, %c0_2] : memref<1x128x256xf32, #tpu.memory_space<vmem>>, vector<1x128x256xf32>
    %4 = vector.shape_cast %3 : vector<1x128x256xf32> to vector<128x256xf32>
    %5 = arith.truncf %4 : vector<128x256xf32> to vector<128x256xbf16>
    %c0_3 = arith.constant 0 : index
    %c0_4 = arith.constant 0 : index
    %6 = vector.load %arg2[%c0_3, %c0_4] : memref<256x96xbf16, #tpu.memory_space<vmem>>, vector<256x96xbf16>
    %cst = arith.constant dense<0.000000e+00> : vector<128x96xf32>
    %7 = tpu.matmul %5, %6, %cst {dimension_numbers = #tpu.dot_dimension_numbers<[1], [0], [0], [1], [0, 0, 1, 1], [], []>} : vector<128x256xbf16>, vector<256x96xbf16>, vector<128x96xf32> -> vector<128x96xf32>
    %c0_5 = arith.constant 0 : index
    %c0_6 = arith.constant 0 : index
    %8 = vector.load %arg3[%c0_5, %c0_6] : memref<1x96xf32, #tpu.memory_space<vmem>>, vector<1x96xf32>
    %9 = vector.broadcast %8 : vector<1x96xf32> to vector<128x96xf32>
    %10 = arith.addf %7, %9 : vector<128x96xf32>
    %cst_7 = arith.constant 0.000000e+00 : f32
    %11 = vector.broadcast %cst_7 : f32 to vector<128x96xf32>
    %12 = arith.maximumf %10, %11 : vector<128x96xf32>
    %13 = vector.extract_strided_slice %12 {offsets = [0, 32], sizes = [128, 64], strides = [1, 1]} : vector<128x96xf32> to vector<128x64xf32>
    %14 = vector.shape_cast %13 : vector<128x64xf32> to vector<2x8x8x64xf32>
    %c0_8 = arith.constant 0 : index
    %c1 = arith.constant 1 : index
    %c1_9 = arith.constant 1 : index
    %c0_10 = arith.constant 0 : index
    %15 = vector.load %arg13[%c0_8, %c1, %c1_9, %c0_10] : memref<2x10x10x64xf32, #tpu.memory_space<vmem>>, vector<2x8x8x64xf32>
    tpu.vector_store %arg13[%c0_8, %c1, %c1_9, %c0_10], %14 {strides = array<i32>} : memref<2x10x10x64xf32, #tpu.memory_space<vmem>>, vector<2x8x8x64xf32>,
    %c0_11 = arith.constant 0 : index
    %c0_12 = arith.constant 0 : index
    %c0_13 = arith.constant 0 : index
    %c0_14 = arith.constant 0 : index
    %16 = vector.load %arg13[%c0_11, %c0_12, %c0_13, %c0_14] : memref<2x10x10x64xf32, #tpu.memory_space<vmem>>, vector<2x10x10x64xf32>
    %17 = arith.truncf %16 : vector<2x10x10x64xf32> to vector<2x10x10x64xbf16>
    %18 = vector.extract_strided_slice %17 {offsets = [0, 0, 0, 0], sizes = [2, 8, 8, 64], strides = [1, 1, 1, 1]} : vector<2x10x10x64xbf16> to vector<2x8x8x64xbf16>
    %19 = vector.shape_cast %18 : vector<2x8x8x64xbf16> to vector<128x64xbf16>
    %20 = vector.extract_strided_slice %17 {offsets = [0, 0, 1, 0], sizes = [2, 8, 8, 64], strides = [1, 1, 1, 1]} : vector<2x10x10x64xbf16> to vector<2x8x8x64xbf16>
    %21 = vector.shape_cast %20 : vector<2x8x8x64xbf16> to vector<128x64xbf16>
    %22 = vector.extract_strided_slice %17 {offsets = [0, 0, 2, 0], sizes = [2, 8, 8, 64], strides = [1, 1, 1, 1]} : vector<2x10x10x64xbf16> to vector<2x8x8x64xbf16>
    %23 = vector.shape_cast %22 : vector<2x8x8x64xbf16> to vector<128x64xbf16>
    %24 = vector.extract_strided_slice %17 {offsets = [0, 1, 0, 0], sizes = [2, 8, 8, 64], strides = [1, 1, 1, 1]} : vector<2x10x10x64xbf16> to vector<2x8x8x64xbf16>
    %25 = vector.shape_cast %24 : vector<2x8x8x64xbf16> to vector<128x64xbf16>
    %26 = vector.extract_strided_slice %17 {offsets = [0, 1, 1, 0], sizes = [2, 8, 8, 64], strides = [1, 1, 1, 1]} : vector<2x10x10x64xbf16> to vector<2x8x8x64xbf16>
    %27 = vector.shape_cast %26 : vector<2x8x8x64xbf16> to vector<128x64xbf16>
    %28 = vector.extract_strided_slice %17 {offsets = [0, 1, 2, 0], sizes = [2, 8, 8, 64], strides = [1, 1, 1, 1]} : vector<2x10x10x64xbf16> to vector<2x8x8x64xbf16>
    %29 = vector.shape_cast %28 : vector<2x8x8x64xbf16> to vector<128x64xbf16>
    %30 = vector.extract_strided_slice %17 {offsets = [0, 2, 0, 0], sizes = [2, 8, 8, 64], strides = [1, 1, 1, 1]} : vector<2x10x10x64xbf16> to vector<2x8x8x64xbf16>
    %31 = vector.shape_cast %30 : vector<2x8x8x64xbf16> to vector<128x64xbf16>
    %32 = vector.extract_strided_slice %17 {offsets = [0, 2, 1, 0], sizes = [2, 8, 8, 64], strides = [1, 1, 1, 1]} : vector<2x10x10x64xbf16> to vector<2x8x8x64xbf16>
    %33 = vector.shape_cast %32 : vector<2x8x8x64xbf16> to vector<128x64xbf16>
    %34 = vector.extract_strided_slice %17 {offsets = [0, 2, 2, 0], sizes = [2, 8, 8, 64], strides = [1, 1, 1, 1]} : vector<2x10x10x64xbf16> to vector<2x8x8x64xbf16>
    %35 = vector.shape_cast %34 : vector<2x8x8x64xbf16> to vector<128x64xbf16>
    %36 = tpu.concatenate %19, %21, %23, %25, %27, %29, %31, %33, %35 in 1 : vector<128x64xbf16>, vector<128x64xbf16>, vector<128x64xbf16>, vector<128x64xbf16>, vector<128x64xbf16>, vector<128x64xbf16>, vector<128x64xbf16>, vector<128x64xbf16>, vector<128x64xbf16> -> vector<128x576xbf16>
    %c0_15 = arith.constant 0 : index
    %c0_16 = arith.constant 0 : index
    %37 = vector.load %arg4[%c0_15, %c0_16] : memref<576x64xbf16, #tpu.memory_space<vmem>>, vector<576x64xbf16>
    %cst_17 = arith.constant dense<0.000000e+00> : vector<128x64xf32>
    %38 = tpu.matmul %36, %37, %cst_17 {dimension_numbers = #tpu.dot_dimension_numbers<[1], [0], [0], [1], [0, 0, 1, 1], [], []>} : vector<128x576xbf16>, vector<576x64xbf16>, vector<128x64xf32> -> vector<128x64xf32>
    %c0_18 = arith.constant 0 : index
    %c0_19 = arith.constant 0 : index
    %39 = vector.load %arg5[%c0_18, %c0_19] : memref<1x64xf32, #tpu.memory_space<vmem>>, vector<1x64xf32>
    %40 = vector.broadcast %39 : vector<1x64xf32> to vector<128x64xf32>
    %41 = arith.addf %38, %40 : vector<128x64xf32>
    %cst_20 = arith.constant 0.000000e+00 : f32
    %42 = vector.broadcast %cst_20 : f32 to vector<128x64xf32>
    %43 = arith.maximumf %41, %42 : vector<128x64xf32>
    %44 = vector.extract_strided_slice %43 {offsets = [0, 32], sizes = [128, 32], strides = [1, 1]} : vector<128x64xf32> to vector<128x32xf32>
    %45 = vector.shape_cast %44 : vector<128x32xf32> to vector<2x8x8x32xf32>
    %c0_21 = arith.constant 0 : index
    %c1_22 = arith.constant 1 : index
    %c1_23 = arith.constant 1 : index
    %c0_24 = arith.constant 0 : index
    %46 = vector.load %arg13[%c0_21, %c1_22, %c1_23, %c0_24] : memref<2x10x10x64xf32, #tpu.memory_space<vmem>>, vector<2x8x8x32xf32>
    tpu.vector_store %arg13[%c0_21, %c1_22, %c1_23, %c0_24], %45 {strides = array<i32>} : memref<2x10x10x64xf32, #tpu.memory_space<vmem>>, vector<2x8x8x32xf32>,
    %c0_25 = arith.constant 0 : index
    %c0_26 = arith.constant 0 : index
    %c0_27 = arith.constant 0 : index
    %c0_28 = arith.constant 0 : index
    %47 = vector.load %arg13[%c0_25, %c0_26, %c0_27, %c0_28] : memref<2x10x10x64xf32, #tpu.memory_space<vmem>>, vector<2x10x10x64xf32>
    %48 = arith.truncf %47 : vector<2x10x10x64xf32> to vector<2x10x10x64xbf16>
    %49 = vector.extract_strided_slice %48 {offsets = [0, 0, 0, 0], sizes = [2, 8, 8, 64], strides = [1, 1, 1, 1]} : vector<2x10x10x64xbf16> to vector<2x8x8x64xbf16>
    %50 = vector.shape_cast %49 : vector<2x8x8x64xbf16> to vector<128x64xbf16>
    %51 = vector.extract_strided_slice %48 {offsets = [0, 0, 1, 0], sizes = [2, 8, 8, 64], strides = [1, 1, 1, 1]} : vector<2x10x10x64xbf16> to vector<2x8x8x64xbf16>
    %52 = vector.shape_cast %51 : vector<2x8x8x64xbf16> to vector<128x64xbf16>
    %53 = vector.extract_strided_slice %48 {offsets = [0, 0, 2, 0], sizes = [2, 8, 8, 64], strides = [1, 1, 1, 1]} : vector<2x10x10x64xbf16> to vector<2x8x8x64xbf16>
    %54 = vector.shape_cast %53 : vector<2x8x8x64xbf16> to vector<128x64xbf16>
    %55 = vector.extract_strided_slice %48 {offsets = [0, 1, 0, 0], sizes = [2, 8, 8, 64], strides = [1, 1, 1, 1]} : vector<2x10x10x64xbf16> to vector<2x8x8x64xbf16>
    %56 = vector.shape_cast %55 : vector<2x8x8x64xbf16> to vector<128x64xbf16>
    %57 = vector.extract_strided_slice %48 {offsets = [0, 1, 1, 0], sizes = [2, 8, 8, 64], strides = [1, 1, 1, 1]} : vector<2x10x10x64xbf16> to vector<2x8x8x64xbf16>
    %58 = vector.shape_cast %57 : vector<2x8x8x64xbf16> to vector<128x64xbf16>
    %59 = vector.extract_strided_slice %48 {offsets = [0, 1, 2, 0], sizes = [2, 8, 8, 64], strides = [1, 1, 1, 1]} : vector<2x10x10x64xbf16> to vector<2x8x8x64xbf16>
    %60 = vector.shape_cast %59 : vector<2x8x8x64xbf16> to vector<128x64xbf16>
    %61 = vector.extract_strided_slice %48 {offsets = [0, 2, 0, 0], sizes = [2, 8, 8, 64], strides = [1, 1, 1, 1]} : vector<2x10x10x64xbf16> to vector<2x8x8x64xbf16>
    %62 = vector.shape_cast %61 : vector<2x8x8x64xbf16> to vector<128x64xbf16>
    %63 = vector.extract_strided_slice %48 {offsets = [0, 2, 1, 0], sizes = [2, 8, 8, 64], strides = [1, 1, 1, 1]} : vector<2x10x10x64xbf16> to vector<2x8x8x64xbf16>
    %64 = vector.shape_cast %63 : vector<2x8x8x64xbf16> to vector<128x64xbf16>
    %65 = vector.extract_strided_slice %48 {offsets = [0, 2, 2, 0], sizes = [2, 8, 8, 64], strides = [1, 1, 1, 1]} : vector<2x10x10x64xbf16> to vector<2x8x8x64xbf16>
    %66 = vector.shape_cast %65 : vector<2x8x8x64xbf16> to vector<128x64xbf16>
    %67 = tpu.concatenate %50, %52, %54, %56, %58, %60, %62, %64, %66 in 1 : vector<128x64xbf16>, vector<128x64xbf16>, vector<128x64xbf16>, vector<128x64xbf16>, vector<128x64xbf16>, vector<128x64xbf16>, vector<128x64xbf16>, vector<128x64xbf16>, vector<128x64xbf16> -> vector<128x576xbf16>
    %c0_29 = arith.constant 0 : index
    %c0_30 = arith.constant 0 : index
    %68 = vector.load %arg6[%c0_29, %c0_30] : memref<576x32xbf16, #tpu.memory_space<vmem>>, vector<576x32xbf16>
    %cst_31 = arith.constant dense<0.000000e+00> : vector<128x32xf32>
    %69 = tpu.matmul %67, %68, %cst_31 {dimension_numbers = #tpu.dot_dimension_numbers<[1], [0], [0], [1], [0, 0, 1, 1], [], []>} : vector<128x576xbf16>, vector<576x32xbf16>, vector<128x32xf32> -> vector<128x32xf32>
    %c0_32 = arith.constant 0 : index
    %c0_33 = arith.constant 0 : index
    %70 = vector.load %arg7[%c0_32, %c0_33] : memref<1x32xf32, #tpu.memory_space<vmem>>, vector<1x32xf32>
    %71 = vector.broadcast %70 : vector<1x32xf32> to vector<128x32xf32>
    %72 = arith.addf %69, %71 : vector<128x32xf32>
    %cst_34 = arith.constant 0.000000e+00 : f32
    %73 = vector.broadcast %cst_34 : f32 to vector<128x32xf32>
    %74 = arith.maximumf %72, %73 : vector<128x32xf32>
    %75 = vector.extract_strided_slice %12 {offsets = [0, 0], sizes = [128, 32], strides = [1, 1]} : vector<128x96xf32> to vector<128x32xf32>
    %76 = arith.truncf %75 : vector<128x32xf32> to vector<128x32xbf16>
    %c0_35 = arith.constant 0 : index
    %c0_36 = arith.constant 0 : index
    %77 = vector.load %arg8[%c0_35, %c0_36] : memref<32x256xbf16, #tpu.memory_space<vmem>>, vector<32x256xbf16>
    %cst_37 = arith.constant dense<0.000000e+00> : vector<128x256xf32>
    %78 = tpu.matmul %76, %77, %cst_37 {dimension_numbers = #tpu.dot_dimension_numbers<[1], [0], [0], [1], [0, 0, 1, 1], [], []>} : vector<128x32xbf16>, vector<32x256xbf16>, vector<128x256xf32> -> vector<128x256xf32>
    %79 = vector.extract_strided_slice %43 {offsets = [0, 0], sizes = [128, 32], strides = [1, 1]} : vector<128x64xf32> to vector<128x32xf32>
    %80 = arith.truncf %79 : vector<128x32xf32> to vector<128x32xbf16>
    %c0_38 = arith.constant 0 : index
    %c0_39 = arith.constant 0 : index
    %81 = vector.load %arg9[%c0_38, %c0_39] : memref<32x256xbf16, #tpu.memory_space<vmem>>, vector<32x256xbf16>
    %cst_40 = arith.constant dense<0.000000e+00> : vector<128x256xf32>
    %82 = tpu.matmul %80, %81, %cst_40 {dimension_numbers = #tpu.dot_dimension_numbers<[1], [0], [0], [1], [0, 0, 1, 1], [], []>} : vector<128x32xbf16>, vector<32x256xbf16>, vector<128x256xf32> -> vector<128x256xf32>
    %83 = arith.addf %78, %82 : vector<128x256xf32>
    %84 = arith.truncf %74 : vector<128x32xf32> to vector<128x32xbf16>
    %c0_41 = arith.constant 0 : index
    %c0_42 = arith.constant 0 : index
    %85 = vector.load %arg10[%c0_41, %c0_42] : memref<32x256xbf16, #tpu.memory_space<vmem>>, vector<32x256xbf16>
    %cst_43 = arith.constant dense<0.000000e+00> : vector<128x256xf32>
    %86 = tpu.matmul %84, %85, %cst_43 {dimension_numbers = #tpu.dot_dimension_numbers<[1], [0], [0], [1], [0, 0, 1, 1], [], []>} : vector<128x32xbf16>, vector<32x256xbf16>, vector<128x256xf32> -> vector<128x256xf32>
    %87 = arith.addf %83, %86 : vector<128x256xf32>
    %c0_44 = arith.constant 0 : index
    %c0_45 = arith.constant 0 : index
    %88 = vector.load %arg11[%c0_44, %c0_45] : memref<1x256xf32, #tpu.memory_space<vmem>>, vector<1x256xf32>
    %89 = vector.broadcast %88 : vector<1x256xf32> to vector<128x256xf32>
    %90 = arith.addf %87, %89 : vector<128x256xf32>
    %c0_46 = arith.constant 0 : index
    %c0_47 = arith.constant 0 : index
    %c0_48 = arith.constant 0 : index
    %91 = vector.load %arg1[%c0_46, %c0_47, %c0_48] : memref<1x128x256xf32, #tpu.memory_space<vmem>>, vector<1x128x256xf32>
    %92 = vector.shape_cast %91 : vector<1x128x256xf32> to vector<128x256xf32>
    %93 = arith.addf %90, %92 : vector<128x256xf32>
    %cst_49 = arith.constant 0.000000e+00 : f32
    %94 = vector.broadcast %cst_49 : f32 to vector<128x256xf32>
    %95 = arith.maximumf %93, %94 : vector<128x256xf32>
    %c0_50 = arith.constant 0 : index
    %c0_51 = arith.constant 0 : index
    %c0_52 = arith.constant 0 : index
    %96 = vector.load %arg12[%c0_50, %c0_51, %c0_52] : memref<1x128x256xf32, #tpu.memory_space<vmem>>, vector<1x128x256xf32>
    %97 = vector.shape_cast %96 : vector<1x128x256xf32> to vector<128x256xf32>
    %98 = vector.shape_cast %95 : vector<128x256xf32> to vector<1x128x256xf32>
    tpu.vector_store %arg12[%c0_50, %c0_51, %c0_52], %98 {strides = array<i32>} : memref<1x128x256xf32, #tpu.memory_space<vmem>>, vector<1x128x256xf32>,
    return
  }
  func.func @transform_0(%arg0: i32) -> (i32, i32, i32) {
    %c0_i32 = arith.constant 0 : i32
    %c0_i32_0 = arith.constant 0 : i32
    %c0_i32_1 = arith.constant 0 : i32
    return %arg0, %c0_i32, %c0_i32_0 : i32, i32, i32
  }
  func.func @transform_1(%arg0: i32) -> (i32, i32) {
    %c0_i32 = arith.constant 0 : i32
    %c0_i32_0 = arith.constant 0 : i32
    %c0_i32_1 = arith.constant 0 : i32
    return %c0_i32, %c0_i32_0 : i32, i32
  }
  func.func @transform_2(%arg0: i32) -> (i32, i32) {
    %c0_i32 = arith.constant 0 : i32
    %c0_i32_0 = arith.constant 0 : i32
    %c0_i32_1 = arith.constant 0 : i32
    return %c0_i32, %c0_i32_0 : i32, i32
  }
  func.func @transform_3(%arg0: i32) -> (i32, i32) {
    %c0_i32 = arith.constant 0 : i32
    %c0_i32_0 = arith.constant 0 : i32
    %c0_i32_1 = arith.constant 0 : i32
    return %c0_i32, %c0_i32_0 : i32, i32
  }
  func.func @transform_4(%arg0: i32) -> (i32, i32) {
    %c0_i32 = arith.constant 0 : i32
    %c0_i32_0 = arith.constant 0 : i32
    %c0_i32_1 = arith.constant 0 : i32
    return %c0_i32, %c0_i32_0 : i32, i32
  }
  func.func @transform_5(%arg0: i32) -> (i32, i32) {
    %c0_i32 = arith.constant 0 : i32
    %c0_i32_0 = arith.constant 0 : i32
    %c0_i32_1 = arith.constant 0 : i32
    return %c0_i32, %c0_i32_0 : i32, i32
  }
  func.func @transform_6(%arg0: i32) -> (i32, i32) {
    %c0_i32 = arith.constant 0 : i32
    %c0_i32_0 = arith.constant 0 : i32
    %c0_i32_1 = arith.constant 0 : i32
    return %c0_i32, %c0_i32_0 : i32, i32
  }
  func.func @transform_7(%arg0: i32) -> (i32, i32) {
    %c0_i32 = arith.constant 0 : i32
    %c0_i32_0 = arith.constant 0 : i32
    %c0_i32_1 = arith.constant 0 : i32
    return %c0_i32, %c0_i32_0 : i32, i32
  }
  func.func @transform_8(%arg0: i32) -> (i32, i32) {
    %c0_i32 = arith.constant 0 : i32
    %c0_i32_0 = arith.constant 0 : i32
    %c0_i32_1 = arith.constant 0 : i32
    return %c0_i32, %c0_i32_0 : i32, i32
  }
  func.func @transform_9(%arg0: i32) -> (i32, i32) {
    %c0_i32 = arith.constant 0 : i32
    %c0_i32_0 = arith.constant 0 : i32
    %c0_i32_1 = arith.constant 0 : i32
    return %c0_i32, %c0_i32_0 : i32, i32
  }
  func.func @transform_10(%arg0: i32) -> (i32, i32) {
    %c0_i32 = arith.constant 0 : i32
    %c0_i32_0 = arith.constant 0 : i32
    %c0_i32_1 = arith.constant 0 : i32
    return %c0_i32, %c0_i32_0 : i32, i32
  }
  func.func @transform_11(%arg0: i32) -> (i32, i32, i32) {
    %c0_i32 = arith.constant 0 : i32
    %c0_i32_0 = arith.constant 0 : i32
    %c0_i32_1 = arith.constant 0 : i32
    return %arg0, %c0_i32, %c0_i32_0 : i32, i32, i32
  }
}

</mosaic_0001>

<bundles_post_ra>
// kernel: block35_up.1
= control target key start
LH: loop header
LB: loop body
LE: loop exit
PB: predicated region body
PF: predicated region fallthrough
CT: control target
= control target key end

     0   :  { %s7419_s0 = inlined_call_operand.vmem [shape: f32[1,128,256], index: 0, kind: input, shape index: {}]   ;;  %s7420_s1 = inlined_call_operand.vmem [shape: bf16[256,96], index: 1, kind: input, shape index: {}]   ;;  %s7421_s2 = inlined_call_operand.vmem [shape: f32[1,96], index: 2, kind: input, shape index: {}]   ;;  %s7422_s3 = inlined_call_operand.vmem [shape: bf16[576,64], index: 3, kind: input, shape index: {}]   ;;  %s7423_s4 = inlined_call_operand.vmem [shape: f32[1,64], index: 4, kind: input, shape index: {}]   ;;  %s7424_s5 = inlined_call_operand.vmem [shape: bf16[576,32], index: 5, kind: input, shape index: {}]   ;;  %s7425_s6 = inlined_call_operand.vmem [shape: f32[1,32], index: 6, kind: input, shape index: {}]   ;;  %s7426_s7 = inlined_call_operand.vmem [shape: bf16[32,256], index: 7, kind: input, shape index: {}]   ;;  %s7427_s8 = inlined_call_operand.vmem [shape: bf16[32,256], index: 8, kind: input, shape index: {}]   ;;  %s7428_s9 = inlined_call_operand.vmem [shape: bf16[32,256], index: 9, kind: input, shape index: {}]   ;;  %s7429_s10 = inlined_call_operand.vmem [shape: f32[1,256], index: 10, kind: input, shape index: {}]   ;;  %s7430_s11 = inlined_call_operand.hbm [shape: f32[1,128,256], index: 11, kind: output, shape index: {}]  }
   0x1   :  { %v4960_v0 = vld [vmem:[%s7420_s1 + $0x78] sm:$0xff]   ;;  %v4962_v2 = vld [vmem:[%s7420_s1 + $0x70] sm:$0xff]   ;;  %v4964_v4 = vld [vmem:[%s7420_s1 + $0x68] sm:$0xff]  }
   0x2   :  { %v4961_v1 = vld [vmem:[%s7420_s1 + $0x38] sm:$0xff]   ;;  %4545 = vmatprep.subr.bf16.mxu0 %v4960_v0  ;;  %4937 = vmatprep.subr.bf16.mxu1 %v4960_v0  ;;  %v4963_v3 = vld [vmem:[%s7420_s1 + $0x30] sm:$0xff]   ;;  %v4965_v5 = vld [vmem:[%s7420_s1 + $0x28] sm:$0xff]  }
   0x3   :  { %4546 = vmatpush3.bf16.msra.mxu0 %v4961_v1  ;;  %4945 = vmatpush3.bf16.msra.mxu1 %v4961_v1  ;;  %v4966_v6 = vld [vmem:[%s7420_s1 + $0x60] sm:$0xff]   ;;  %v4968_v8 = vld [vmem:[%s7420_s1 + $0x58] sm:$0xff]   ;;  %v4970_v10 = vld [vmem:[%s7420_s1 + $0x50] sm:$0xff]  }
   0x4   :  { %4547 = vmatprep.subr.bf16.mxu0 %v4962_v2  ;;  %4938 = vmatprep.subr.bf16.mxu1 %v4962_v2  ;;  %v4967_v7 = vld [vmem:[%s7420_s1 + $0x20] sm:$0xff]   ;;  %v4969_v9 = vld [vmem:[%s7420_s1 + $0x18] sm:$0xff]   ;;  %v87_v11 = vld [vmem:[%s7419_s0 + $0x8] sm:$0xff] }
   0x5   :  { %v89_v12 = vld [vmem:[%s7419_s0 + $0x18] sm:$0xff]  ;;  %v4971_v14 = vld [vmem:[%s7420_s1 + $0x10] sm:$0xff]   ;;  %v103_v15 = vld [vmem:[%s7419_s0 + $0x88] sm:$0xff] }
   0x6   :  { %v119_v13 = vpack.c.bf16 %v89_v12, %v87_v11  ;;  %v105_v16 = vld [vmem:[%s7419_s0 + $0x98] sm:$0xff]  ;;  %v4972_v17 = vld [vmem:[%s7420_s1 + $0x48] sm:$0xff]   ;;  %v4974_v20 = vld [vmem:[%s7420_s1 + $0x40] sm:$0xff]  }
   0x7   :  { %4548 = vmatpush3.bf16.msra.mxu0 %v4963_v3  ;;  %4946 = vmatpush3.bf16.msra.mxu1 %v4963_v3  ;;  %v127_v18 = vpack.c.bf16 %v105_v16, %v103_v15  ;;  %v4973_v19 = vld [vmem:[%s7420_s1 + $0x8] sm:$0xff]   ;;  %v4975_v21 = vld [vmem:[%s7420_s1] sm:$0xff]   ;;  %v88_v23 = vld [vmem:[%s7419_s0 + $0x10] sm:$0xff] }
   0x8   :  { %4549 = vmatprep.subr.bf16.mxu0 %v4964_v4  ;;  %4939 = vmatprep.subr.bf16.mxu1 %v4964_v4  ;;  %v86_v22 = vld [vmem:[%s7419_s0] sm:$0xff]  ;;  %v91_v24 = vld [vmem:[%s7419_s0 + $0x28] sm:$0xff]  ;;  %v93_v25 = vld [vmem:[%s7419_s0 + $0x38] sm:$0xff] }
   0x9   :  { %301 = vmatprep.mubr.bf16.mxu0 %v119_v13  ;;  %333 = vmatprep.mubr.bf16.mxu1 %v127_v18  ;;  %v102_v26 = vld [vmem:[%s7419_s0 + $0x80] sm:$0xff]  ;;  %v104_v27 = vld [vmem:[%s7419_s0 + $0x90] sm:$0xff]  ;;  %v107_v28 = vld [vmem:[%s7419_s0 + $0xa8] sm:$0xff]  ;;  %v118_v30 = vpack.c.bf16 %v88_v23, %v86_v22  ;;  %v121_v31 = vpack.c.bf16 %v93_v25, %v91_v24 }
   0xa   :  { %v109_v29 = vld [vmem:[%s7419_s0 + $0xb8] sm:$0xff]  ;;  %v126_v32 = vpack.c.bf16 %v104_v27, %v102_v26  ;;  %v90_v34 = vld [vmem:[%s7419_s0 + $0x20] sm:$0xff]  ;;  %v92_v35 = vld [vmem:[%s7419_s0 + $0x30] sm:$0xff] }
   0xb   :  { %4550 = vmatpush3.bf16.msra.mxu0 %v4965_v5  ;;  %4947 = vmatpush3.bf16.msra.mxu1 %v4965_v5  ;;  %v129_v33 = vpack.c.bf16 %v109_v29, %v107_v28  ;;  %v95_v36 = vld [vmem:[%s7419_s0 + $0x48] sm:$0xff]  ;;  %v97_v37 = vld [vmem:[%s7419_s0 + $0x58] sm:$0xff]  ;;  %v106_v38 = vld [vmem:[%s7419_s0 + $0xa0] sm:$0xff]  ;;  %v120_v42 = vpack.c.bf16 %v92_v35, %v90_v34 }
   0xc   :  { %4551 = vmatprep.subr.bf16.mxu0 %v4966_v6  ;;  %4940 = vmatprep.subr.bf16.mxu1 %v4966_v6  ;;  %v108_v39 = vld [vmem:[%s7419_s0 + $0xb0] sm:$0xff]  ;;  %v111_v40 = vld [vmem:[%s7419_s0 + $0xc8] sm:$0xff]  ;;  %v113_v41 = vld [vmem:[%s7419_s0 + $0xd8] sm:$0xff]  ;;  %v123_v43 = vpack.c.bf16 %v97_v37, %v95_v36 }
   0xd   :  { %v128_v44 = vpack.c.bf16 %v108_v39, %v106_v38  ;;  %v131_v45 = vpack.c.bf16 %v113_v41, %v111_v40  ;;  %v94_v46 = vld [vmem:[%s7419_s0 + $0x40] sm:$0xff]  ;;  %v96_v47 = vld [vmem:[%s7419_s0 + $0x50] sm:$0xff]  ;;  %v99_v48 = vld [vmem:[%s7419_s0 + $0x68] sm:$0xff] }
   0xe   :  { %v101_v49 = vld [vmem:[%s7419_s0 + $0x78] sm:$0xff]  ;;  %v110_v50 = vld [vmem:[%s7419_s0 + $0xc0] sm:$0xff]  ;;  %v112_v51 = vld [vmem:[%s7419_s0 + $0xd0] sm:$0xff]  ;;  %v122_v54 = vpack.c.bf16 %v96_v47, %v94_v46 }
   0xf   :  { %4552 = vmatpush3.bf16.msra.mxu0 %v4967_v7  ;;  %4948 = vmatpush3.bf16.msra.mxu1 %v4967_v7  ;;  %v115_v52 = vld [vmem:[%s7419_s0 + $0xe8] sm:$0xff]  ;;  %v117_v53 = vld [vmem:[%s7419_s0 + $0xf8] sm:$0xff]  ;;  %v125_v55 = vpack.c.bf16 %v101_v49, %v99_v48  ;;  %v130_v56 = vpack.c.bf16 %v112_v51, %v110_v50  ;;  %v98_v58 = vld [vmem:[%s7419_s0 + $0x60] sm:$0xff] }
  0x10   :  { %4553 = vmatprep.subr.bf16.mxu0 %v4968_v8  ;;  %4941 = vmatprep.subr.bf16.mxu1 %v4968_v8  ;;  %v133_v57 = vpack.c.bf16 %v117_v53, %v115_v52  ;;  %v100_v59 = vld [vmem:[%s7419_s0 + $0x70] sm:$0xff]  ;;  %v114_v60 = vld [vmem:[%s7419_s0 + $0xe0] sm:$0xff] }
  0x11   :  { %v116_v61 = vld [vmem:[%s7419_s0 + $0xf0] sm:$0xff]  ;;  %v124_v62 = vpack.c.bf16 %v100_v59, %v98_v58 }
  0x12   :  { %v132_v63 = vpack.c.bf16 %v116_v61, %v114_v60 }
  0x13   :  { %4554 = vmatpush3.bf16.msra.mxu0 %v4969_v9  ;;  %4949 = vmatpush3.bf16.msra.mxu1 %v4969_v9 }
  0x14   :  { %4555 = vmatprep.subr.bf16.mxu0 %v4970_v10  ;;  %4942 = vmatprep.subr.bf16.mxu1 %v4970_v10 }
  0x17   :  { %4556 = vmatpush3.bf16.msra.mxu0 %v4971_v14  ;;  %4950 = vmatpush3.bf16.msra.mxu1 %v4971_v14 }
  0x18   :  { %4557 = vmatprep.subr.bf16.mxu0 %v4972_v17  ;;  %4943 = vmatprep.subr.bf16.mxu1 %v4972_v17 }
  0x1b   :  { %4558 = vmatpush3.bf16.msra.mxu0 %v4973_v19  ;;  %4951 = vmatpush3.bf16.msra.mxu1 %v4973_v19 }
  0x1c   :  { %4559 = vmatprep.subr.bf16.mxu0 %v4974_v20  ;;  %4944 = vmatprep.subr.bf16.mxu1 %v4974_v20 }
  0x1f   :  { %4560 = vmatpush3.bf16.msra.mxu0 %v4975_v21  ;;  %4952 = vmatpush3.bf16.msra.mxu1 %v4975_v21 }
  0x22   :  { %302 = vmatmul.mubr.bf16.vlgmr.msra.gmra.mxu0 %v118_v30  ;;  %334 = vmatmul.mubr.bf16.vlgmr.msra.gmra.mxu1 %v126_v32 }
  0x23   :  { %309 = vmatprep.mubr.bf16.mxu0 %v121_v31  ;;  %341 = vmatprep.mubr.bf16.mxu1 %v129_v33 }
  0x2a   :  { %310 = vmatmul.mubr.bf16.gmra.mxu0 %v120_v42  ;;  %342 = vmatmul.mubr.bf16.gmra.mxu1 %v128_v44 }
  0x2b   :  { %317 = vmatprep.mubr.bf16.mxu0 %v123_v43  ;;  %349 = vmatprep.mubr.bf16.mxu1 %v131_v45 }
  0x32   :  { %318 = vmatmul.mubr.bf16.gmra.mxu0 %v122_v54  ;;  %350 = vmatmul.mubr.bf16.gmra.mxu1 %v130_v56 }
  0x33   :  { %325 = vmatprep.mubr.bf16.mxu0 %v125_v55  ;;  %357 = vmatprep.mubr.bf16.mxu1 %v133_v57 }
  0x3a   :  { %326 = vmatmul.mubr.bf16.gmra.mxu0 %v124_v62  ;;  %358 = vmatmul.mubr.bf16.gmra.mxu1 %v132_v63 }
  0x3b   :  { %16 = vsyncpa [#allocation4], 0  ;;  %vm44_vm0 = vcmask 523264   ;;  %vm46_vm1 = vcmask 517120   ;;  %v5095_v0 = vmov 0.0   ;;  %vm831_vm2 = vcmask 1042432  }
  0x3c   :  { %48 = vst.msk [vmem:[#allocation2 + $0x10] sm:$0xff] %vm44_vm0, %v5095_v0  ;;  %45 = vst.msk [vmem:[#allocation2] sm:$0xff] %vm44_vm0, %v5095_v0  ;;  %v5349_v4 = vld [vmem:[%s7421_s2] ss:$0 sm:$0xff]  ;;  %s5096_s2 = smov 96   ;;  %vm832_vm3 = vcmask 1046532  }
  0x3d   :  { %49 = vst.msk [vmem:[#allocation2 + $0x18] sm:$0x3] %vm46_vm1, %v5095_v0  ;;  %47 = vst.msk [vmem:[#allocation2 + $0x8] sm:$0x3] %vm46_vm1, %v5095_v0  ;;  %vm604_vm5 = vsmask.f32 3328 }
  0x3e   :  { %50 = vst.msk [vmem:[#allocation2 + $0x20] sm:$0xff] %vm44_vm0, %v5095_v0  ;;  %52 = vst.msk [vmem:[#allocation2 + $0x30] sm:$0xff] %vm44_vm0, %v5095_v0  ;;  %vm605_vm6 = vsmask.f32 7440  ;;  %s5097_s15 = smov 64   ;;  %vm1924_vm8 = vcmask 261120  }
  0x3f   :  { %51 = vst.msk [vmem:[#allocation2 + $0x28] sm:$0x3] %vm46_vm1, %v5095_v0  ;;  %53 = vst.msk [vmem:[#allocation2 + $0x38] sm:$0x3] %vm46_vm1, %v5095_v0  ;;  %s5099_s20 = smov [#allocation3]  }
  0x40   :  { %54 = vst.msk [vmem:[#allocation2 + $0x40] sm:$0xff] %vm44_vm0, %v5095_v0  ;;  %56 = vst.msk [vmem:[#allocation2 + $0x50] sm:$0xff] %vm44_vm0, %v5095_v0  ;;  %s4047_s21 = sshll.u32 %s5099_s20, 4  ;;  %s4048_s21 = int_to_ptr.vmem [resolvable:$true] %s4047_s21 }
  0x41   :  { %55 = vst.msk [vmem:[#allocation2 + $0x48] sm:$0x3] %vm46_vm1, %v5095_v0  ;;  %57 = vst.msk [vmem:[#allocation2 + $0x58] sm:$0x3] %vm46_vm1, %v5095_v0  ;;  %s5073_s22 = scalar_lea.vmem %s4048_s21, 4096  ;;  %p5078_p1 = scmp.lt.s32.totalorder %s4048_s21, %s4048_s21 }
  0x42   :  { %58 = vst.msk [vmem:[#allocation2 + $0x60] sm:$0xff] %vm44_vm0, %v5095_v0  ;;  %60 = vst.msk [vmem:[#allocation2 + $0x70] sm:$0xff] %vm44_vm0, %v5095_v0  ;;  %p5074_p0 = scmp.ne.s32.totalorder %s4048_s21, %s5073_s22  ;;  %p5079_p2 = scmp.lt.s32.totalorder %s5073_s22, %s5073_s22 }
  0x43   :  { %59 = vst.msk [vmem:[#allocation2 + $0x68] sm:$0x3] %vm46_vm1, %v5095_v0  ;;  %61 = vst.msk [vmem:[#allocation2 + $0x78] sm:$0x3] %vm46_vm1, %v5095_v0  ;;  %v464_v15 = vld [vmem:[#allocation2] sm:$0xff] }
  0x44   :  { %62 = vst.msk [vmem:[#allocation2 + $0x80] sm:$0xff] %vm44_vm0, %v5095_v0  ;;  %64 = vst.msk [vmem:[#allocation2 + $0x90] sm:$0xff] %vm44_vm0, %v5095_v0  ;;  %v465_v16 = vld [vmem:[#allocation2 + $0x8] sm:$0x3]  ;;  %v5360_v24 = vpack.c.bf16 %v464_v15, %v464_v15  ;;  %p5080_p3 = por %p5079_p2, %p5078_p1 }
  0x45   :  { %63 = vst.msk [vmem:[#allocation2 + $0x88] sm:$0x3] %vm46_vm1, %v5095_v0  ;;  %65 = vst.msk [vmem:[#allocation2 + $0x98] sm:$0x3] %vm46_vm1, %v5095_v0  ;;  %v5362_v25 = vpack.c.bf16 %v465_v16, %v465_v16 }
  0x46   :  { %66 = vst.msk [vmem:[#allocation2 + $0xa0] sm:$0xff] %vm44_vm0, %v5095_v0  ;;  %68 = vst.msk [vmem:[#allocation2 + $0xb0] sm:$0xff] %vm44_vm0, %v5095_v0  ;;  %v4107_v40 = vrot.slane %v5360_v24, 9  ;;  %p5081_p4 = pnand %p5080_p3, %p5074_p0 }
  0x47   :  { %67 = vst.msk [vmem:[#allocation2 + $0xa8] sm:$0x3] %vm46_vm1, %v5095_v0  ;;  %69 = vst.msk [vmem:[#allocation2 + $0xb8] sm:$0x3] %vm46_vm1, %v5095_v0  ;;  %v836_v39 = vrot.slane %v5362_v25, 5 }
  0x48   :  { %70 = vst.msk [vmem:[#allocation2 + $0xc0] sm:$0xff] %vm44_vm0, %v5095_v0  ;;  %72 = vst.msk [vmem:[#allocation2 + $0xd0] sm:$0xff] %vm44_vm0, %v5095_v0 }
  0x49   :  { %71 = vst.msk [vmem:[#allocation2 + $0xc8] sm:$0x3] %vm46_vm1, %v5095_v0  ;;  %73 = vst.msk [vmem:[#allocation2 + $0xd8] sm:$0x3] %vm46_vm1, %v5095_v0 }
  0x4a   :  { %74 = vst.msk [vmem:[#allocation2 + $0xe0] sm:$0xff] %vm44_vm0, %v5095_v0  ;;  %76 = vst.msk [vmem:[#allocation2 + $0xf0] sm:$0xff] %vm44_vm0, %v5095_v0 }
  0x4b   :  { %75 = vst.msk [vmem:[#allocation2 + $0xe8] sm:$0x3] %vm46_vm1, %v5095_v0  ;;  %77 = vst.msk [vmem:[#allocation2 + $0xf8] sm:$0x3] %vm46_vm1, %v5095_v0 }
  0x4c   :  { %78 = vst.msk [vmem:[#allocation2 + $0x100] sm:$0xff] %vm44_vm0, %v5095_v0  ;;  %80 = vst.msk [vmem:[#allocation2 + $0x110] sm:$0xff] %vm44_vm0, %v5095_v0 }
  0x4d   :  { %79 = vst.msk [vmem:[#allocation2 + $0x108] sm:$0x3] %vm46_vm1, %v5095_v0  ;;  %81 = vst.msk [vmem:[#allocation2 + $0x118] sm:$0x3] %vm46_vm1, %v5095_v0 }
  0x4e   :  { %82 = vst.msk [vmem:[#allocation2 + $0x120] sm:$0xff] %vm44_vm0, %v5095_v0  ;;  %84 = vst.msk [vmem:[#allocation2 + $0x130] sm:$0xff] %vm44_vm0, %v5095_v0 }
  0x4f   :  { %83 = vst.msk [vmem:[#allocation2 + $0x128] sm:$0x3] %vm46_vm1, %v5095_v0  ;;  %85 = vst.msk [vmem:[#allocation2 + $0x138] sm:$0x3] %vm46_vm1, %v5095_v0 }
  0x50   :  { %vm5370_vm4 = vmor %vm831_vm2, %vm832_vm3 }
  0x51   :  { %v5385_v47 = vsel %vm5370_vm4, %v4107_v40, %v836_v39  ;;  %vm5516_vm7 = vmor %vm604_vm5, %vm605_vm6 }
  0xe2   :  { %v4561_v1 = vpop.f32.mrf.mxu0  ;;  %v4585_v2 = vpop.f32.mrf.mxu1 }
  0xe4   :  { %v4562_v3 = vpop.f32.mrf.mxu0  ;;  %v4586_v6 = vpop.f32.mrf.mxu1 }
  0xe5   :  { %v4563_v5 = vadd.f32 %v4562_v3, %v4561_v1  ;;  %v4587_v8 = vadd.f32 %v4586_v6, %v4585_v2 }
  0xe6   :  { %v4564_v7 = vpop.f32.mrf.mxu0  ;;  %v4588_v10 = vpop.f32.mrf.mxu1 }
  0xe7   :  { %v304_v9 = vadd.f32 %v4563_v5, %v5349_v4  ;;  %v5353_v18 = vadd.f32 %v4587_v8, %v5349_v4 }
  0xe8   :  { %v4565_v11 = vpop.f32.mrf.mxu0  ;;  %v4589_v14 = vpop.f32.mrf.mxu1 }
  0xe9   :  { %v4566_v12 = vadd.f32 %v4565_v11, %v4564_v7  ;;  %v366_v13 = vmax.f32 %v304_v9, 0.0  ;;  %v4590_v19 = vadd.f32 %v4589_v14, %v4588_v10  ;;  %v374_v30 = vmax.f32 %v5353_v18, 0.0  ;;  %v484_v18 = vld [vmem:[#allocation2 + $0xa0] sm:$0xff] }
  0xea   :  { %v4567_v17 = vpop.f32.mrf.mxu0  ;;  %v4591_v21 = vpop.f32.mrf.mxu1 }
  0xeb   :  { %v307_v20 = vadd.f32 %v4566_v12, %v5349_v4  ;;  %398 = vrot.lane.b32.xlu0 %v366_v13, %s5096_s2  ;;  %v5358_v23 = vadd.f32 %v4590_v19, %v5349_v4 }
  0xec   :  { %v4568_v22 = vpop.f32.mrf.mxu0  ;;  %v4592_v28 = vpop.f32.mrf.mxu1 }
  0xed   :  { %v367_v26 = vmax.f32 %v307_v20, 0.0  ;;  %v4569_v27 = vadd.f32 %v4568_v22, %v4567_v17  ;;  %v4593_v31 = vadd.f32 %v4592_v28, %v4591_v21  ;;  %v375_v32 = vmax.f32 %v5358_v23, 0.0  ;;  %v482_v23 = vld [vmem:[#allocation2 + $0x90] sm:$0xff] }
  0xee   :  { %v4570_v29 = vpop.f32.mrf.mxu0  ;;  %v4594_v35 = vpop.f32.mrf.mxu1 }
  0xef   :  { %v5366_v33 = vpack.c.bf16 %v367_v26, %v366_v13  ;;  %400 = vrot.lane.b32.xlu0 %v367_v26, %s5096_s2  ;;  %v312_v34 = vadd.f32 %v4569_v27, %v5349_v4  ;;  %v5378_v38 = vpack.c.bf16 %v375_v32, %v374_v30  ;;  %v344_v45 = vadd.f32 %v4593_v31, %v5349_v4 }
  0xf0   :  { %v4571_v37 = vpop.f32.mrf.mxu0  ;;  %v4595_v43 = vpop.f32.mrf.mxu1 }
  0xf1   :  { %7478 = vst [vmem:[#allocation6_spill] sm:$0xff] %v5366_v33  ;;  %7481 = vst [vmem:[#allocation7_spill] sm:$0xff] %v5378_v38  ;;  %v4572_v41 = vadd.f32 %v4571_v37, %v4570_v29  ;;  %v368_v42 = vmax.f32 %v312_v34, 0.0  ;;  %v4596_v46 = vadd.f32 %v4595_v43, %v4594_v35  ;;  %v376_v56 = vmax.f32 %v344_v45, 0.0 }
  0xf2   :  { %v4573_v44 = vpop.f32.mrf.mxu0  ;;  %v4597_v49 = vpop.f32.mrf.mxu1 }
  0xf3   :  { %v315_v48 = vadd.f32 %v4572_v41, %v5349_v4  ;;  %402 = vrot.lane.b32.xlu1 %v368_v42, %s5096_s2  ;;  %v347_v51 = vadd.f32 %v4596_v46, %v5349_v4  ;;  %v4445_v46 = vpack.c.bf16 %v484_v18, %v484_v18 }
  0xf4   :  { %v4574_v50 = vpop.f32.mrf.mxu0  ;;  %v4598_v54 = vpop.f32.mrf.mxu1 }
  0xf5   :  { %v369_v52 = vmax.f32 %v315_v48, 0.0  ;;  %v4575_v53 = vadd.f32 %v4574_v50, %v4573_v44  ;;  %v4599_v57 = vadd.f32 %v4598_v54, %v4597_v49  ;;  %v377_v58 = vmax.f32 %v347_v51, 0.0  ;;  %v502_v54 = vld [vmem:[#allocation2 + $0x130] sm:$0xff] }
  0xf6   :  { %v4576_v55 = vpop.f32.mrf.mxu0  ;;  %v4600_v61 = vpop.f32.mrf.mxu1  ;;  %v4115_v51 = vrot.slane %v4445_v46, 9 }
  0xf7   :  { %v5390_v59 = vpack.c.bf16 %v369_v52, %v368_v42  ;;  %v320_v60 = vadd.f32 %v4575_v53, %v5349_v4  ;;  %404 = vrot.lane.b32.xlu1 %v369_v52, %s5096_s2  ;;  %v5394_v63 = vpack.c.bf16 %v377_v58, %v376_v56  ;;  %v352_v5 = vadd.f32 %v4599_v57, %v5349_v4 }
  0xf8   :  { %v4577_v62 = vpop.f32.mrf.mxu0  ;;  %v4601_v2 = vpop.f32.mrf.mxu1  ;;  %v5443_v57 = vpack.c.bf16 %v502_v54, %v502_v54 }
  0xf9   :  { %7482 = vst [vmem:[#allocation8_spill] sm:$0xff] %v5390_v59  ;;  %7483 = vst [vmem:[#allocation9_spill] sm:$0xff] %v5394_v63  ;;  %v370_v0 = vmax.f32 %v320_v60, 0.0  ;;  %v4578_v1 = vadd.f32 %v4577_v62, %v4576_v55  ;;  %v4602_v6 = vadd.f32 %v4601_v2, %v4600_v61  ;;  %v378_v15 = vmax.f32 %v352_v5, 0.0  ;;  %v503_v55 = vld [vmem:[#allocation2 + $0x138] sm:$0x3] }
  0xfa   :  { %v4579_v3 = vpop.f32.mrf.mxu0  ;;  %v4603_v8 = vpop.f32.mrf.mxu1  ;;  %v4976_v62 = vld [vmem:[%s7422_s3 + $0x78] sm:$0xff]   ;;  %v4979_v2 = vld [vmem:[%s7422_s3 + $0x30] sm:$0xff]   ;;  %v4981_v5 = vld [vmem:[%s7422_s3 + $0x28] sm:$0xff]  }
  0xfb   :  { %v323_v7 = vadd.f32 %v4578_v1, %v5349_v4  ;;  %406 = vrot.lane.b32.xlu0 %v370_v0, %s5096_s2  ;;  %v355_v10 = vadd.f32 %v4602_v6, %v5349_v4  ;;  %v4978_v1 = vld [vmem:[%s7422_s3 + $0x70] sm:$0xff]   ;;  %4609 = vmatprep.subr.bf16.mxu1 %v4976_v62  ;;  %v4982_v6 = vld [vmem:[%s7422_s3 + $0x60] sm:$0xff]   ;;  %v5532_v62 = vld [vmem:[%s7422_s3 + $0x118] sm:$0xff]  }
  0xfc   :  { %v4580_v9 = vpop.f32.mrf.mxu0  ;;  %v4604_v13 = vpop.f32.mrf.mxu1  ;;  %v5006_v63 = vld [vmem:[%s7422_s3 + $0xc8] sm:$0xff]  }
  0xfd   :  { %v4581_v11 = vadd.f32 %v4580_v9, %v4579_v3  ;;  %v371_v12 = vmax.f32 %v323_v7, 0.0  ;;  %v4605_v16 = vadd.f32 %v4604_v13, %v4603_v8  ;;  %v379_v17 = vmax.f32 %v355_v10, 0.0  ;;  %v4980_v3 = vld [vmem:[%s7422_s3 + $0x68] sm:$0xff]   ;;  %v4983_v7 = vld [vmem:[%s7422_s3 + $0x20] sm:$0xff]   ;;  %v4984_v8 = vld [vmem:[%s7422_s3 + $0x58] sm:$0xff]  }
  0xfe   :  { %v4582_v14 = vpop.f32.mrf.mxu0  ;;  %v4606_v21 = vpop.f32.mrf.mxu1  ;;  %v4985_v9 = vld [vmem:[%s7422_s3 + $0x18] sm:$0xff]   ;;  %v4986_v10 = vld [vmem:[%s7422_s3 + $0x50] sm:$0xff]   ;;  %v608_v13 = vshrl.u32 %v5360_v24, 16 }
  0xff   :  { %v328_v19 = vadd.f32 %v4581_v11, %v5349_v4  ;;  %v5401_v20 = vpack.c.bf16 %v371_v12, %v370_v0  ;;  %408 = vrot.lane.b32.xlu1 %v371_v12, %s5096_s2  ;;  %v5404_v26 = vpack.c.bf16 %v379_v17, %v378_v15  ;;  %v360_v31 = vadd.f32 %v4605_v16, %v5349_v4  ;;  %v4977_v0 = vld [vmem:[%s7422_s3 + $0x38] sm:$0xff]   ;;  %v4987_v11 = vld [vmem:[%s7422_s3 + $0x10] sm:$0xff]   ;;  %v4988_v12 = vld [vmem:[%s7422_s3 + $0x48] sm:$0xff]  }
 0x100   :  { %v4583_v22 = vpop.f32.mrf.mxu0  ;;  %v4607_v29 = vpop.f32.mrf.mxu1  ;;  %4610 = vmatpush3.bf16.msra.mxu1 %v4977_v0  ;;  %v723_v16 = vshll.u32 %v4445_v46, 16 }
 0x101   :  { %7484 = vst [vmem:[#allocation10_spill] sm:$0xff] %v5401_v20  ;;  %7485 = vst [vmem:[#allocation11_spill] sm:$0xff] %v5404_v26  ;;  %v372_v27 = vmax.f32 %v328_v19, 0.0  ;;  %v4584_v28 = vadd.f32 %v4583_v22, %v4582_v14  ;;  %v4608_v34 = vadd.f32 %v4607_v29, %v4606_v21  ;;  %v380_v40 = vmax.f32 %v360_v31, 0.0  ;;  %4611 = vmatprep.subr.bf16.mxu1 %v4978_v1 }
 0x102   :  { %v611_v14 = vshll.u32 %v5360_v24, 16  ;;  %v610_v21 = vrot.slane %v608_v13, 4  ;;  %v617_v24 = vshll.u32 %v5362_v25, 16  ;;  %v969_v25 = vshrl.u32 %v5443_v57, 16 }
 0x103   :  { %v331_v35 = vadd.f32 %v4584_v28, %v5349_v4  ;;  %414 = vrot.lane.b32.xlu1 %v374_v30, %s5096_s2  ;;  %410 = vrot.lane.b32.xlu0 %v372_v27, %s5096_s2  ;;  %v363_v37 = vadd.f32 %v4608_v34, %v5349_v4  ;;  %v485_v4 = vld [vmem:[#allocation2 + $0xa8] sm:$0x3]  ;;  %v483_v30 = vld [vmem:[#allocation2 + $0x98] sm:$0x3]  ;;  %v725_v28 = vrot.slane %v723_v16, 5 }
 0x104   :  { %v5427_v44 = vpack.c.bf16 %v483_v30, %v483_v30  ;;  %v5429_v45 = vpack.c.bf16 %v485_v4, %v485_v4  ;;  %4612 = vmatpush3.bf16.msra.mxu1 %v4979_v2  ;;  %v613_v22 = vrot.slane %v611_v14, 5  ;;  %v971_v0 = vrot.slane %v969_v25, 4 }
 0x105   :  { %v373_v39 = vmax.f32 %v331_v35, 0.0  ;;  %v381_v41 = vmax.f32 %v363_v37, 0.0  ;;  %4613 = vmatprep.subr.bf16.mxu1 %v4980_v3  ;;  %v4989_v35 = vld [vmem:[%s7422_s3 + $0x8] sm:$0xff]  }
 0x106   :  { %v984_v49 = vrot.slane %v5427_v44, 5  ;;  %v868_v52 = vrot.slane %v5429_v45, 5  ;;  %v614_v37 = vor.u32 %v613_v22, %v610_v21  ;;  %v729_v18 = vshll.u32 %v5429_v45, 16 }
 0x107   :  { %416 = vrot.lane.b32.xlu1 %v375_v32, %s5096_s2  ;;  %v5416_v42 = vpack.c.bf16 %v373_v39, %v372_v27  ;;  %412 = vrot.lane.b32.xlu0 %v373_v39, %s5096_s2  ;;  %v5419_v43 = vpack.c.bf16 %v381_v41, %v380_v40  ;;  %v4465_v32 = vpack.c.bf16 %v482_v23, %v482_v23  ;;  %v964_v30 = vshll.u32 %v5427_v44, 16 }
 0x108   :  { %v5439_v53 = vsel %vm5370_vm4, %v4115_v51, %v868_v52  ;;  %4614 = vmatpush3.bf16.msra.mxu1 %v4981_v5  ;;  %v5520_v54 = vrot.slane %v729_v18, 5 }
 0x109   :  { %7486 = vst [vmem:[#allocation12_spill] sm:$0xff] %v5416_v42  ;;  %7487 = vst [vmem:[#allocation13_spill] sm:$0xff] %v5419_v43  ;;  %v4133_v48 = vrot.slane %v4465_v32, 9  ;;  %4615 = vmatprep.subr.bf16.mxu1 %v4982_v6  ;;  %v958_v19 = vshll.u32 %v4465_v32, 16 }
 0x10b   :  { %418 = vrot.lane.b32.xlu0 %v376_v56, %s5096_s2  ;;  %420 = vrot.lane.b32.xlu1 %v377_v58, %s5096_s2  ;;  %v5434_v50 = vsel %vm5370_vm4, %v4133_v48, %v984_v49  ;;  %v5441_v56 = vpack.c.bf16 %v503_v55, %v503_v55  ;;  %v4134_v58 = vrot.slane %v5443_v57, 9  ;;  %v960_v34 = vrot.slane %v958_v19, 5 }
 0x10c   :  { %4616 = vmatpush3.bf16.msra.mxu1 %v4983_v7  ;;  %v5510_v48 = vrot.slane %v617_v24, 5 }
 0x10d   :  { %v988_v60 = vrot.slane %v5441_v56, 5  ;;  %4617 = vmatprep.subr.bf16.mxu1 %v4984_v8  ;;  %v978_v2 = vshll.u32 %v5441_v56, 16  ;;  %v4993_v8 = vld [vmem:[%s7422_s3 + $0xf8] sm:$0xff]  }
 0x10e   :  { %4673 = vmatprep.subr.bf16.mxu0 %v4993_v8 }
 0x10f   :  { %422 = vrot.lane.b32.xlu0 %v378_v15, %s5096_s2  ;;  %424 = vrot.lane.b32.xlu1 %v379_v17, %s5096_s2  ;;  %v5449_v61 = vsel %vm5370_vm4, %v4134_v58, %v988_v60  ;;  %v720_v15 = vshrl.u32 %v4445_v46, 16  ;;  %v955_v17 = vshrl.u32 %v4465_v32, 16  ;;  %v972_v32 = vshll.u32 %v5443_v57, 16 }
 0x110   :  { %4618 = vmatpush3.bf16.msra.mxu1 %v4985_v9  ;;  %v5508_v46 = vrot.slane %v614_v37, 4  ;;  %v5524_v57 = vrot.slane %v964_v30, 5  ;;  %v4994_v9 = vld [vmem:[%s7422_s3 + $0xb8] sm:$0xff]  }
 0x111   :  { %4619 = vmatprep.subr.bf16.mxu1 %v4986_v10  ;;  %v722_v27 = vrot.slane %v720_v15, 4  ;;  %v957_v31 = vrot.slane %v955_v17, 4  ;;  %v974_v1 = vrot.slane %v972_v32, 5  ;;  %4674 = vmatpush3.bf16.msra.mxu0 %v4994_v9 }
 0x112   :  { %v620_v3 = vsel %vm5516_vm7, %v5508_v46, %v5510_v48 }
 0x113   :  { %426 = vrot.lane.b32.xlu0 %v380_v40, %s5096_s2  ;;  %428 = vrot.lane.b32.xlu1 %v381_v41, %s5096_s2  ;;  %v726_v39 = vor.u32 %v725_v28, %v722_v27  ;;  %v4990_v40 = vld [vmem:[%s7422_s3 + $0x40] sm:$0xff]   ;;  %v961_v23 = vor.u32 %v960_v34, %v957_v31  ;;  %v975_v28 = vor.u32 %v974_v1, %v971_v0 }
 0x114   :  { %4620 = vmatpush3.bf16.msra.mxu1 %v4987_v11  ;;  %v4991_v41 = vld [vmem:[%s7422_s3] sm:$0xff]  }
 0x115   :  { %4621 = vmatprep.subr.bf16.mxu1 %v4988_v12  ;;  %v5512_v49 = vrot.slane %v726_v39, 4  ;;  %v5522_v55 = vrot.slane %v961_v23, 4 }
 0x118   :  { %4622 = vmatpush3.bf16.msra.mxu1 %v4989_v35 }
 0x119   :  { %4623 = vmatprep.subr.bf16.mxu1 %v4990_v40 }
 0x11c   :  { %4624 = vmatpush3.bf16.msra.mxu1 %v4991_v41 }
 0x11d   :  { %4889 = vmatprep.subr.bf16.mxu1 %v5532_v62 }
 0x15d   :  { %v399_v29 = vpop.permute.xlu0 %398 }
 0x15e   :  { %448 = vst.msk [vmem:[#allocation2 + $0x11] sm:$0xff] %vm44_vm0, %v399_v29  ;;  %v5565_v29 = vrot.slane %v978_v2, 5 }
 0x161   :  { %v401_v4 = vpop.permute.xlu0 %400 }
 0x162   :  { %449 = vst.msk [vmem:[#allocation2 + $0x21] sm:$0xff] %vm44_vm0, %v401_v4 }
 0x165   :  { %v403_v45 = vpop.permute.xlu1 %402  ;;  %v5514_v51 = vld [vmem:[#allocation2 + $0x10] sm:$0xff]  ;;  %v467_v44 = vld [vmem:[#allocation2 + $0x18] sm:$0x3] }
 0x166   :  { %450 = vst.msk [vmem:[#allocation2 + $0x31] sm:$0xff] %vm44_vm0, %v403_v45  ;;  %v4431_v58 = vpack.c.bf16 %v5514_v51, %v5514_v51  ;;  %v4432_v60 = vpack.c.bf16 %v467_v44, %v467_v44 }
 0x168   :  { %v622_v5 = vshrl.u32 %v4431_v58, 16  ;;  %v625_v6 = vshll.u32 %v4431_v58, 16  ;;  %v4108_v7 = vrot.slane %v4431_v58, 9  ;;  %v631_v11 = vshll.u32 %v4432_v60, 16 }
 0x169   :  { %v405_v10 = vpop.permute.xlu1 %404  ;;  %v5546_v56 = vld [vmem:[#allocation2 + $0x20] sm:$0xff]  ;;  %v469_v12 = vld [vmem:[#allocation2 + $0x28] sm:$0x3]  ;;  %v840_v14 = vrot.slane %v4432_v60, 5  ;;  %v5579_v58 = vrot.slane %v975_v28, 4 }
 0x16a   :  { %451 = vst.msk [vmem:[#allocation2 + $0x41] sm:$0xff] %vm44_vm0, %v405_v10  ;;  %v4433_v16 = vpack.c.bf16 %v5546_v56, %v5546_v56  ;;  %v4477_v17 = vpack.c.bf16 %v5546_v56, %v5514_v51  ;;  %v624_v19 = vrot.slane %v622_v5, 4  ;;  %v627_v21 = vrot.slane %v625_v6, 5  ;;  %v4995_v5 = vld [vmem:[%s7422_s3 + $0xf0] sm:$0xff]  }
 0x16b   :  { %v4434_v22 = vpack.c.bf16 %v469_v12, %v469_v12  ;;  %v5563_v27 = vsel %vm5370_vm4, %v4108_v7, %v840_v14  ;;  %v633_v39 = vrot.slane %v631_v11, 5  ;;  %v4996_v6 = vld [vmem:[%s7422_s3 + $0xb0] sm:$0xff]   ;;  %v4997_v7 = vld [vmem:[%s7422_s3 + $0xe8] sm:$0xff]   ;;  %4675 = vmatprep.subr.bf16.mxu0 %v4995_v5 }
 0x16c   :  { %1070 = vrot.lane.b32.xlu0 %v4477_v17, %s5097_s15  ;;  %v628_v31 = vor.u32 %v627_v21, %v624_v19  ;;  %v636_v34 = vshrl.u32 %v4433_v16, 16  ;;  %v639_v35 = vshll.u32 %v4433_v16, 16  ;;  %v4109_v37 = vrot.slane %v4433_v16, 9  ;;  %4676 = vmatpush3.bf16.msra.mxu0 %v4996_v6 }
 0x16d   :  { %v407_v24 = vpop.permute.xlu0 %406  ;;  %v5568_v40 = vld [vmem:[#allocation2 + $0x30] sm:$0xff]  ;;  %v471_v41 = vld [vmem:[#allocation2 + $0x38] sm:$0x3]  ;;  %v645_v4 = vshll.u32 %v4434_v22, 16  ;;  %v844_v18 = vrot.slane %v4434_v22, 5  ;;  %4677 = vmatprep.subr.bf16.mxu0 %v4997_v7 }
 0x16e   :  { %452 = vst.msk [vmem:[#allocation2 + $0x51] sm:$0xff] %vm44_vm0, %v407_v24  ;;  %v629_v30 = vrot.slane %v628_v31, 4  ;;  %v4435_v25 = vpack.c.bf16 %v5568_v40, %v5568_v40  ;;  %v4436_v32 = vpack.c.bf16 %v471_v41, %v471_v41  ;;  %v638_v46 = vrot.slane %v636_v34, 4 }
 0x16f   :  { %v641_v48 = vrot.slane %v639_v35, 5  ;;  %v647_v45 = vrot.slane %v645_v4, 5  ;;  %v5577_v44 = vsel %vm5370_vm4, %v4109_v37, %v844_v18  ;;  %v4998_v35 = vld [vmem:[%s7422_s3 + $0xa8] sm:$0xff]  }
 0x170   :  { %v5583_v60 = vsel %vm5516_vm7, %v629_v30, %v633_v39  ;;  %v650_v0 = vshrl.u32 %v4435_v25, 16  ;;  %v653_v1 = vshll.u32 %v4435_v25, 16  ;;  %v659_v2 = vshll.u32 %v4436_v32, 16  ;;  %4678 = vmatpush3.bf16.msra.mxu0 %v4998_v35 }
 0x171   :  { %7490 = vst [vmem:[#allocation14_spill] sm:$0xff] %v5583_v60  ;;  %v409_v8 = vpop.permute.xlu1 %408  ;;  %v4143_v9 = vcombine.low %v620_v3, %v5583_v60  ;;  %v5595_v10 = vld [vmem:[#allocation2 + $0x40] sm:$0xff]  ;;  %v642_v11 = vor.u32 %v641_v48, %v638_v46  ;;  %v473_v12 = vld [vmem:[#allocation2 + $0x48] sm:$0x3]  ;;  %v4110_v16 = vrot.slane %v4435_v25, 9  ;;  %v848_v34 = vrot.slane %v4436_v32, 5 }
 0x172   :  { %7491 = vst [vmem:[#allocation15_spill] sm:$0xff] %v5595_v10  ;;  %453 = vst.msk [vmem:[#allocation2 + $0x61] sm:$0xff] %vm44_vm0, %v409_v8  ;;  %v4437_v17 = vpack.c.bf16 %v5595_v10, %v5595_v10  ;;  %v4478_v19 = vpack.c.bf16 %v5595_v10, %v5568_v40  ;;  %v652_v21 = vrot.slane %v650_v0, 4  ;;  %v655_v22 = vrot.slane %v653_v1, 5 }
 0x173   :  { %1022 = vrot.lane.b32.xlu1 %v4143_v9, %s5097_s15  ;;  %v643_v3 = vrot.slane %v642_v11, 4  ;;  %v661_v28 = vrot.slane %v659_v2, 5  ;;  %v4438_v31 = vpack.c.bf16 %v473_v12, %v473_v12  ;;  %v5617_v48 = vsel %vm5370_vm4, %v4110_v16, %v848_v34 }
 0x174   :  { %1072 = vrot.lane.b32.xlu0 %v4478_v19, %s5097_s15  ;;  %v656_v37 = vor.u32 %v655_v22, %v652_v21  ;;  %v664_v24 = vshrl.u32 %v4437_v17, 16  ;;  %v667_v39 = vshll.u32 %v4437_v17, 16  ;;  %v4111_v41 = vrot.slane %v4437_v17, 9  ;;  %v5000_v19 = vld [vmem:[%s7422_s3 + $0xe0] sm:$0xff]  }
 0x175   :  { %v415_v4 = vpop.permute.xlu1 %414  ;;  %v411_v18 = vpop.permute.xlu0 %410  ;;  %v5611_v30 = vsel %vm5516_vm7, %v643_v3, %v647_v45  ;;  %v5613_v25 = vld [vmem:[#allocation2 + $0x50] sm:$0xff]  ;;  %v475_v32 = vld [vmem:[#allocation2 + $0x58] sm:$0x3]  ;;  %v673_v46 = vshll.u32 %v4438_v31, 16  ;;  %v852_v0 = vrot.slane %v4438_v31, 5  ;;  %v5001_v21 = vld [vmem:[%s7422_s3 + $0xa0] sm:$0xff]   ;;  %4679 = vmatprep.subr.bf16.mxu0 %v5000_v19 }
 0x176   :  { %7492 = vst [vmem:[#allocation16_spill] sm:$0xff] %v5611_v30  ;;  %7493 = vst [vmem:[#allocation17_spill] sm:$0xff] %v5613_v25  ;;  %v657_v1 = vrot.slane %v656_v37, 4  ;;  %v4439_v45 = vpack.c.bf16 %v5613_v25, %v5613_v25  ;;  %v4440_v5 = vpack.c.bf16 %v475_v32, %v475_v32  ;;  %v666_v6 = vrot.slane %v664_v24, 4  ;;  %v5002_v32 = vld [vmem:[%s7422_s3 + $0xd8] sm:$0xff]   ;;  %4680 = vmatpush3.bf16.msra.mxu0 %v5001_v21 }
 0x177   :  { %456 = vst.msk [vmem:[#allocation2 + $0xb1] sm:$0xff] %vm44_vm0, %v415_v4  ;;  %454 = vst.msk [vmem:[#allocation2 + $0x71] sm:$0xff] %vm44_vm0, %v411_v18  ;;  %v669_v7 = vrot.slane %v667_v39, 5  ;;  %v675_v8 = vrot.slane %v673_v46, 5  ;;  %v5627_v9 = vsel %vm5370_vm4, %v4111_v41, %v852_v0  ;;  %4681 = vmatprep.subr.bf16.mxu0 %v5002_v32 }
 0x178   :  { %v5631_v11 = vsel %vm5516_vm7, %v657_v1, %v661_v28  ;;  %v678_v12 = vshrl.u32 %v4439_v45, 16  ;;  %v681_v16 = vshll.u32 %v4439_v45, 16  ;;  %v687_v17 = vshll.u32 %v4440_v5, 16 }
 0x179   :  { %7494 = vst [vmem:[#allocation18_spill] sm:$0xff] %v5631_v11  ;;  %v417_v22 = vpop.permute.xlu1 %416  ;;  %v413_v3 = vpop.permute.xlu0 %412  ;;  %v4144_v31 = vcombine.low %v5611_v30, %v5631_v11  ;;  %v5641_v34 = vld [vmem:[#allocation2 + $0x60] sm:$0xff]  ;;  %v670_v28 = vor.u32 %v669_v7, %v666_v6  ;;  %v477_v35 = vld [vmem:[#allocation2 + $0x68] sm:$0x3]  ;;  %v4112_v37 = vrot.slane %v4439_v45, 9  ;;  %v856_v24 = vrot.slane %v4440_v5, 5 }
 0x17a   :  { %7495 = vst [vmem:[#allocation19_spill] sm:$0xff] %v5641_v34  ;;  %457 = vst.msk [vmem:[#allocation2 + $0xc1] sm:$0xff] %vm44_vm0, %v417_v22  ;;  %v5647_v39 = vpack.c.bf16 %v5641_v34, %v5641_v34  ;;  %v4479_v41 = vpack.c.bf16 %v5641_v34, %v5613_v25  ;;  %v680_v4 = vrot.slane %v678_v12, 4  ;;  %v683_v18 = vrot.slane %v681_v16, 5  ;;  %v5003_v5 = vld [vmem:[%s7422_s3 + $0x98] sm:$0xff]  }
 0x17b   :  { %455 = vst.msk [vmem:[#allocation2 + $0x81] sm:$0xff] %vm44_vm0, %v413_v3  ;;  %1024 = vrot.lane.b32.xlu1 %v4144_v31, %s5097_s15  ;;  %v671_v46 = vrot.slane %v670_v28, 4  ;;  %v689_v0 = vrot.slane %v687_v17, 5  ;;  %v5655_v1 = vpack.c.bf16 %v477_v35, %v477_v35  ;;  %v5659_v45 = vsel %vm5370_vm4, %v4112_v37, %v856_v24  ;;  %4682 = vmatpush3.bf16.msra.mxu0 %v5003_v5 }
 0x17c   :  { %1074 = vrot.lane.b32.xlu0 %v4479_v41, %s5097_s15  ;;  %v684_v6 = vor.u32 %v683_v18, %v680_v4  ;;  %v692_v7 = vshrl.u32 %v5647_v39, 16  ;;  %v695_v12 = vshll.u32 %v5647_v39, 16  ;;  %v5680_v37 = vcombine.low %v5577_v44, %v5617_v48 }
 0x17d   :  { %v419_v17 = vpop.permute.xlu0 %418  ;;  %v421_v19 = vpop.permute.xlu1 %420  ;;  %v5670_v22 = vsel %vm5516_vm7, %v671_v46, %v675_v8  ;;  %v701_v28 = vshll.u32 %v5655_v1, 16 }
 0x17e   :  { %7496 = vst [vmem:[#allocation20_spill] sm:$0xff] %v5670_v22  ;;  %v5672_v21 = vld [vmem:[#allocation2 + $0x70] sm:$0xff]  ;;  %v479_v31 = vld [vmem:[#allocation2 + $0x78] sm:$0x3]  ;;  %458 = vst.msk [vmem:[#allocation2 + $0xd1] sm:$0xff] %vm44_vm0, %v419_v17  ;;  %v685_v24 = vrot.slane %v684_v6, 4 }
 0x17f   :  { %7497 = vst [vmem:[#allocation21_spill] sm:$0xff] %v5672_v21  ;;  %v5674_v3 = vld [vmem:[#allocation2 + $0xb0] sm:$0xff]  ;;  %459 = vst.msk [vmem:[#allocation2 + $0xe1] sm:$0xff] %vm44_vm0, %v421_v19  ;;  %v5688_v41 = vpack.c.bf16 %v5672_v21, %v5672_v21  ;;  %v487_v18 = vld [vmem:[#allocation2 + $0xb8] sm:$0x3]  ;;  %v5694_v32 = vpack.c.bf16 %v479_v31, %v479_v31  ;;  %v694_v46 = vrot.slane %v692_v7, 4 }
 0x180   :  { %7498 = vst [vmem:[#allocation22_spill] sm:$0xff] %v5674_v3  ;;  %v5692_v4 = vpack.c.bf16 %v5674_v3, %v5674_v3  ;;  %v697_v2 = vrot.slane %v695_v12, 5  ;;  %v703_v17 = vrot.slane %v701_v28, 5  ;;  %v5698_v6 = vsel %vm5516_vm7, %v685_v24, %v689_v0 }
 0x181   :  { %7499 = vst [vmem:[#allocation23_spill] sm:$0xff] %v5698_v6  ;;  %v706_v19 = vshrl.u32 %v5688_v41, 16  ;;  %v709_v8 = vshll.u32 %v5688_v41, 16  ;;  %v5702_v23 = vpack.c.bf16 %v487_v18, %v487_v18  ;;  %v423_v15 = vpop.permute.xlu0 %422  ;;  %v4145_v16 = vcombine.low %v5670_v22, %v5698_v6  ;;  %v425_v7 = vpop.permute.xlu1 %424  ;;  %v5708_v12 = vld [vmem:[#allocation2 + $0xc0] sm:$0xff]  ;;  %v489_v24 = vld [vmem:[#allocation2 + $0xc8] sm:$0x3] }
 0x182   :  { %v5706_v31 = vld [vmem:[#allocation2 + $0x80] sm:$0xff]  ;;  %7501 = vst [vmem:[#allocation25_spill] sm:$0xff] %v5708_v12  ;;  %v698_v5 = vor.u32 %v697_v2, %v694_v46  ;;  %v715_v28 = vshll.u32 %v5694_v32, 16  ;;  %v734_v0 = vshrl.u32 %v5692_v4, 16  ;;  %460 = vst.msk [vmem:[#allocation2 + $0xf1] sm:$0xff] %vm44_vm0, %v423_v15  ;;  %v5722_v14 = vpack.c.bf16 %v5708_v12, %v5708_v12  ;;  %v5004_v15 = vld [vmem:[%s7422_s3 + $0xd0] sm:$0xff]  }
 0x183   :  { %7500 = vst [vmem:[#allocation24_spill] sm:$0xff] %v5706_v31  ;;  %v5715_v18 = vpack.c.bf16 %v5706_v31, %v5706_v31  ;;  %v4480_v35 = vpack.c.bf16 %v5706_v31, %v5672_v21  ;;  %461 = vst.msk [vmem:[#allocation2 + $0x101] sm:$0xff] %vm44_vm0, %v425_v7  ;;  %v4481_v2 = vpack.c.bf16 %v5708_v12, %v5674_v3  ;;  %v5005_v46 = vld [vmem:[%s7422_s3 + $0x90] sm:$0xff]   ;;  %1026 = vrot.lane.b32.xlu1 %v4145_v16, %s5097_s15  ;;  %v5007_v16 = vld [vmem:[%s7422_s3 + $0x88] sm:$0xff]  }
 0x184   :  { %v699_v13 = vrot.slane %v698_v5, 4  ;;  %v708_v43 = vrot.slane %v706_v19, 4  ;;  %v711_v7 = vrot.slane %v709_v8, 5  ;;  %v717_v26 = vrot.slane %v715_v28, 5  ;;  %4683 = vmatprep.subr.bf16.mxu0 %v5004_v15 }
 0x185   :  { %1076 = vrot.lane.b32.xlu0 %v4480_v35, %s5097_s15  ;;  %v736_v38 = vrot.slane %v734_v0, 4  ;;  %v737_v42 = vshll.u32 %v5692_v4, 16  ;;  %v743_v20 = vshll.u32 %v5702_v23, 16  ;;  %v5739_v59 = vpack.c.bf16 %v489_v24, %v489_v24  ;;  %v427_v8 = vpop.permute.xlu0 %426  ;;  %v429_v19 = vpop.permute.xlu1 %428  ;;  %v5748_v35 = vld [vmem:[#allocation2 + $0xd0] sm:$0xff]  ;;  %v491_v33 = vld [vmem:[#allocation2 + $0xd8] sm:$0x3]  ;;  %4684 = vmatpush3.bf16.msra.mxu0 %v5005_v46 }
 0x186   :  { %v5746_v5 = vsel %vm5516_vm7, %v699_v13, %v703_v17  ;;  %v712_v28 = vor.u32 %v711_v7, %v708_v43  ;;  %7503 = vst [vmem:[#allocation27_spill] sm:$0xff] %v5748_v35  ;;  %v5750_v0 = vld [vmem:[#allocation2 + $0xe0] sm:$0xff]  ;;  %v748_v24 = vshrl.u32 %v5722_v14, 16  ;;  %v751_v15 = vshll.u32 %v5722_v14, 16  ;;  %462 = vst.msk [vmem:[#allocation2 + $0x111] sm:$0xff] %vm44_vm0, %v427_v8  ;;  %4685 = vmatprep.subr.bf16.mxu0 %v5006_v63 }
 0x187   :  { %7502 = vst [vmem:[#allocation26_spill] sm:$0xff] %v5746_v5  ;;  %7504 = vst [vmem:[#allocation28_spill] sm:$0xff] %v5750_v0  ;;  %v5760_v43 = vpack.c.bf16 %v5748_v35, %v5748_v35  ;;  %v5764_v13 = vpack.c.bf16 %v5750_v0, %v5750_v0  ;;  %v4482_v17 = vpack.c.bf16 %v5750_v0, %v5748_v35  ;;  %v739_v7 = vrot.slane %v737_v42, 5  ;;  %v493_v12 = vld [vmem:[#allocation2 + $0xe8] sm:$0x3] }
 0x188   :  { %463 = vst.msk [vmem:[#allocation2 + $0x121] sm:$0xff] %vm44_vm0, %v429_v19  ;;  %v713_v46 = vrot.slane %v712_v28, 4  ;;  %v745_v8 = vrot.slane %v743_v20, 5  ;;  %v5768_v22 = vpack.c.bf16 %v491_v33, %v491_v33  ;;  %v750_v19 = vrot.slane %v748_v24, 4 }
 0x189   :  { %1078 = vrot.lane.b32.xlu0 %v4481_v2, %s5097_s15  ;;  %v753_v31 = vrot.slane %v751_v15, 5  ;;  %v757_v6 = vshll.u32 %v5739_v59, 16  ;;  %v762_v11 = vshrl.u32 %v5760_v43, 16  ;;  %v740_v0 = vor.u32 %v739_v7, %v736_v38  ;;  %v5777_v63 = vld [vmem:[#allocation2 + $0xf0] sm:$0xff]  ;;  %v495_v2 = vld [vmem:[#allocation2 + $0xf8] sm:$0x3]  ;;  %4686 = vmatpush3.bf16.msra.mxu0 %v5007_v16 }
 0x18a   :  { %v5775_v30 = vsel %vm5516_vm7, %v713_v46, %v717_v26  ;;  %7505 = vst [vmem:[#allocation29_spill] sm:$0xff] %v5777_v63  ;;  %v5779_v42 = vld [vmem:[#allocation2 + $0x100] sm:$0xff]  ;;  %v765_v33 = vshll.u32 %v5760_v43, 16  ;;  %v771_v20 = vshll.u32 %v5768_v22, 16  ;;  %v5787_v24 = vpack.c.bf16 %v5777_v63, %v5777_v63 }
 0x18b   :  { %7506 = vst [vmem:[#allocation30_spill] sm:$0xff] %v5779_v42  ;;  %v4146_v28 = vcombine.low %v5746_v5, %v5775_v30  ;;  %v5791_v38 = vpack.c.bf16 %v5779_v42, %v5779_v42  ;;  %v4483_v26 = vpack.c.bf16 %v5779_v42, %v5777_v63  ;;  %v5009_v15 = vld [vmem:[%s7422_s3 + $0xc0] sm:$0xff]   ;;  %v741_v46 = vrot.slane %v740_v0, 4 }
 0x18c   :  { %v5010_v16 = vld [vmem:[%s7422_s3 + $0x80] sm:$0xff]   ;;  %v754_v7 = vor.u32 %v753_v31, %v750_v19  ;;  %v759_v5 = vrot.slane %v757_v6, 5  ;;  %v764_v35 = vrot.slane %v762_v11, 4  ;;  %v767_v60 = vrot.slane %v765_v33, 5  ;;  %4687 = vmatprep.subr.bf16.mxu0 %v5009_v15  ;;  %v497_v33 = vld [vmem:[#allocation2 + $0x108] sm:$0x3] }
 0x18d   :  { %1028 = vrot.lane.b32.xlu1 %v4146_v28, %s5097_s15  ;;  %1080 = vrot.lane.b32.xlu0 %v4482_v17, %s5097_s15  ;;  %v773_v3 = vrot.slane %v771_v20, 5  ;;  %v5803_v21 = vpack.c.bf16 %v493_v12, %v493_v12  ;;  %v5805_v42 = vpack.c.bf16 %v495_v2, %v495_v2  ;;  %v5809_v63 = vsel %vm5516_vm7, %v741_v46, %v745_v8  ;;  %v5811_v25 = vld [vmem:[#allocation2 + $0x110] sm:$0xff] }
 0x18e   :  { %7507 = vst [vmem:[#allocation31_spill] sm:$0xff] %v5809_v63  ;;  %v755_v34 = vrot.slane %v754_v7, 4  ;;  %7508 = vst [vmem:[#allocation32_spill] sm:$0xff] %v5811_v25  ;;  %v776_v11 = vshrl.u32 %v5764_v13, 16  ;;  %v779_v6 = vshll.u32 %v5764_v13, 16  ;;  %v7510_v12 = vsel %vm5516_vm7, %v5512_v49, %v5520_v54  ;;  %4688 = vmatpush3.bf16.msra.mxu0 %v5010_v16 }
 0x18f   :  { %v5813_v31 = vld [vmem:[#allocation2 + $0x120] sm:$0xff]  ;;  %v4147_v0 = vcombine.low %v7510_v12, %v5809_v63  ;;  %v768_v17 = vor.u32 %v767_v60, %v764_v35  ;;  %v5825_v8 = vpack.c.bf16 %v5811_v25, %v5811_v25  ;;  %v499_v60 = vld [vmem:[#allocation2 + $0x118] sm:$0x3]  ;;  %v785_v15 = vshll.u32 %v5803_v21, 16 }
 0x190   :  { %7509 = vst [vmem:[#allocation33_spill] sm:$0xff] %v5813_v31  ;;  %v5829_v19 = vpack.c.bf16 %v5813_v31, %v5813_v31  ;;  %v5833_v20 = vsel %vm5516_vm7, %v755_v34, %v759_v5  ;;  %v4484_v2 = vpack.c.bf16 %v5813_v31, %v5811_v25  ;;  %v778_v49 = vrot.slane %v776_v11, 4 }
 0x191   :  { %7511 = vst [vmem:[#allocation34_spill] sm:$0xff] %v5833_v20  ;;  %v781_v54 = vrot.slane %v779_v6, 5  ;;  %1030 = vrot.lane.b32.xlu1 %v4147_v0, %s5097_s15  ;;  %1082 = vrot.lane.b32.xlu0 %v4483_v26, %s5097_s15  ;;  %v769_v35 = vrot.slane %v768_v17, 4  ;;  %v790_v16 = vshrl.u32 %v5787_v24, 16  ;;  %v793_v5 = vshll.u32 %v5787_v24, 16 }
 0x192   :  { %v799_v46 = vshll.u32 %v5805_v42, 16  ;;  %v5845_v7 = vpack.c.bf16 %v497_v33, %v497_v33  ;;  %v787_v26 = vrot.slane %v785_v15, 5  ;;  %v5851_v12 = vpack.c.bf16 %v499_v60, %v499_v60 }
 0x193   :  { %v782_v34 = vor.u32 %v781_v54, %v778_v49  ;;  %v5849_v11 = vsel %vm5516_vm7, %v769_v35, %v773_v3  ;;  %v792_v6 = vrot.slane %v790_v16, 4  ;;  %v795_v28 = vrot.slane %v793_v5, 5 }
 0x194   :  { %v4148_v0 = vcombine.low %v5833_v20, %v5849_v11  ;;  %v801_v49 = vrot.slane %v799_v46, 5  ;;  %v804_v54 = vshrl.u32 %v5791_v38, 16  ;;  %v807_v33 = vshll.u32 %v5791_v38, 16 }
 0x195   :  { %v783_v17 = vrot.slane %v782_v34, 4  ;;  %1084 = vrot.lane.b32.xlu0 %v4484_v2, %s5097_s15  ;;  %v813_v31 = vshll.u32 %v5845_v7, 16  ;;  %v818_v3 = vshrl.u32 %v5825_v8, 16  ;;  %v796_v35 = vor.u32 %v795_v28, %v792_v6 }
 0x196   :  { %1032 = vrot.lane.b32.xlu1 %v4148_v0, %s5097_s15  ;;  %v821_v15 = vshll.u32 %v5825_v8, 16  ;;  %v827_v16 = vshll.u32 %v5851_v12, 16  ;;  %v806_v34 = vrot.slane %v804_v54, 4  ;;  %v809_v5 = vrot.slane %v807_v33, 5  ;;  %v481_v0 = vld [vmem:[#allocation2 + $0x88] sm:$0x3] }
 0x197   :  { %v5863_v60 = vsel %vm5516_vm7, %v783_v17, %v787_v26  ;;  %v815_v46 = vrot.slane %v813_v31, 5  ;;  %v797_v20 = vrot.slane %v796_v35, 4  ;;  %v820_v63 = vrot.slane %v818_v3, 4 }
 0x198   :  { %v4172_v2 = vcombine.low %v5849_v11, %v5863_v60  ;;  %v823_v25 = vrot.slane %v821_v15, 5  ;;  %v829_v10 = vrot.slane %v827_v16, 5  ;;  %v7512_v26 = vcombine.low %v5563_v27, %v5577_v44 }
 0x199   :  { %v810_v28 = vor.u32 %v809_v5, %v806_v34  ;;  %v7513_v6 = vrot.slane %v5655_v1, 5  ;;  %v7514_v17 = vrot.slane %v5647_v39, 9  ;;  %v5881_v31 = vcombine.low %v5627_v9, %v5659_v45 }
 0x19a   :  { %1106 = vrot.lane.b32.xlu0 %v7512_v26, %s5097_s15  ;;  %v4176_v33 = vcombine.low %v5617_v48, %v5627_v9  ;;  %v5887_v3 = vsel %vm5516_vm7, %v797_v20, %v801_v49  ;;  %v824_v44 = vor.u32 %v823_v25, %v820_v63  ;;  %v4114_v1 = vrot.slane %v5688_v41, 9 }
 0x19b   :  { %v861_v54 = vsel %vm5370_vm4, %v7514_v17, %v7513_v6  ;;  %v4149_v39 = vcombine.low %v5863_v60, %v5887_v3  ;;  %v811_v15 = vrot.slane %v810_v28, 4  ;;  %v864_v16 = vrot.slane %v5694_v32, 5 }
 0x19c   :  { %v4177_v35 = vcombine.low %v5659_v45, %v861_v54  ;;  %v4462_v34 = vpack.c.bf16 %v481_v0, %v481_v0  ;;  %v825_v5 = vrot.slane %v824_v44, 4  ;;  %v4127_v26 = vrot.slane %v5715_v18, 9 }
 0x19d   :  { %v909_v48 = vshrl.u32 %v5715_v18, 16  ;;  %v912_v9 = vshll.u32 %v5715_v18, 16  ;;  %1034 = vrot.lane.b32.xlu1 %v4149_v39, %s5097_s15  ;;  %v5900_v25 = vsel %vm5516_vm7, %v811_v15, %v815_v46  ;;  %v865_v45 = vsel %vm5370_vm4, %v4114_v1, %v864_v16 }
 0x19e   :  { %1110 = vrot.lane.b32.xlu0 %v4177_v35, %s5097_s15  ;;  %v938_v41 = vrot.slane %v4462_v34, 5  ;;  %v918_v32 = vshll.u32 %v4462_v34, 16  ;;  %v5907_v63 = vsel %vm5516_vm7, %v825_v5, %v829_v10  ;;  %v4173_v18 = vcombine.low %v5887_v3, %v5900_v25  ;;  %v501_v35 = vld [vmem:[#allocation2 + $0x128] sm:$0x3] }
 0x19f   :  { %v5911_v20 = vcombine.low %v861_v54, %v865_v45  ;;  %v911_v49 = vrot.slane %v909_v48, 4  ;;  %v4150_v46 = vcombine.low %v5900_v25, %v5907_v63  ;;  %v914_v28 = vrot.slane %v912_v9, 5 }
 0x1a0   :  { %v5917_v0 = vsel %vm5370_vm4, %v4127_v26, %v938_v41  ;;  %v920_v6 = vrot.slane %v918_v32, 5  ;;  %v4118_v44 = vrot.slane %v5760_v43, 9  ;;  %v880_v54 = vrot.slane %v5768_v22, 5 }
 0x1a1   :  { %v4178_v17 = vcombine.low %v865_v45, %v5917_v0  ;;  %v4187_v10 = vcombine.low %v5917_v0, %v5434_v50  ;;  %1036 = vrot.lane.b32.xlu1 %v4150_v46, %s5097_s15  ;;  %v915_v1 = vor.u32 %v914_v28, %v911_v49  ;;  %v4119_v39 = vrot.slane %v5764_v13, 9  ;;  %v5069_v0 = vld [vmem:[#allocation2 + $0x130] sm:$0xff] }
 0x1a2   :  { %v884_v15 = vrot.slane %v5803_v21, 5  ;;  %v4116_v16 = vrot.slane %v5692_v4, 9  ;;  %v881_v34 = vsel %vm5370_vm4, %v4118_v44, %v880_v54  ;;  %v872_v5 = vrot.slane %v5702_v23, 5 }
 0x1a3   :  { %1112 = vrot.lane.b32.xlu0 %v4178_v17, %s5097_s15  ;;  %v4117_v43 = vrot.slane %v5722_v14, 9  ;;  %v876_v22 = vrot.slane %v5739_v59, 5  ;;  %v916_v26 = vrot.slane %v915_v1, 4  ;;  %v4464_v13 = vpack.c.bf16 %v501_v35, %v501_v35 }
 0x1a4   :  { %v885_v48 = vsel %vm5370_vm4, %v4119_v39, %v884_v15  ;;  %v923_v21 = vshrl.u32 %v5829_v19, 16  ;;  %v5939_v4 = vsel %vm5370_vm4, %v4116_v16, %v872_v5  ;;  %v926_v23 = vshll.u32 %v5829_v19, 16 }
 0x1a5   :  { %v4180_v9 = vcombine.low %v881_v34, %v885_v48  ;;  %v877_v45 = vsel %vm5370_vm4, %v4117_v43, %v876_v22  ;;  %1108 = vrot.lane.b32.xlu1 %v4176_v33, %s5097_s15  ;;  %v5947_v59 = vsel %vm5516_vm7, %v916_v26, %v920_v6  ;;  %v4155_v14 = vcombine.low %v5439_v53, %v5939_v4  ;;  %v7523_v53 = vld [vmem:[#allocation16_spill] sm:$0xff] }
 0x1a6   :  { %v5951_v41 = vcombine.low %v877_v45, %v881_v34  ;;  %v981_v32 = vsel %vm5516_vm7, %v5579_v58, %v5565_v29  ;;  %v4170_v49 = vcombine.low %v5775_v30, %v5947_v59  ;;  %v7515_v33 = vsel %vm5516_vm7, %v5522_v55, %v5524_v57 }
 0x1a7   :  { %v4185_v46 = vcombine.low %v5947_v59, %v7515_v33  ;;  %1116 = vrot.lane.b32.xlu0 %v4180_v9, %s5097_s15  ;;  %v925_v28 = vrot.slane %v923_v21, 4  ;;  %v928_v6 = vrot.slane %v926_v23, 5  ;;  %v932_v17 = vshll.u32 %v4464_v13, 16  ;;  %v4999_v33 = vld [vmem:[%s7422_s3 + $0x110] sm:$0xff]  }
 0x1a8   :  { %v4120_v44 = vrot.slane %v5787_v24, 9  ;;  %v888_v54 = vrot.slane %v5805_v42, 5  ;;  %v4121_v29 = vrot.slane %v5791_v38, 9  ;;  %v892_v35 = vrot.slane %v5845_v7, 5 }
 0x1a9   :  { %v929_v58 = vor.u32 %v928_v6, %v925_v28  ;;  %v4122_v1 = vrot.slane %v5825_v8, 9  ;;  %v896_v55 = vrot.slane %v5851_v12, 5  ;;  %1128 = vrot.lane.b32.xlu1 %v4185_v46, %s5097_s15  ;;  %v934_v57 = vrot.slane %v932_v17, 5  ;;  %v5011_v17 = vld [vmem:[%s7422_s3 + $0x100] sm:$0xff]  }
 0x1aa   :  { %v889_v39 = vsel %vm5370_vm4, %v4120_v44, %v888_v54  ;;  %v4128_v15 = vrot.slane %v5829_v19, 9  ;;  %v942_v24 = vrot.slane %v4464_v13, 5  ;;  %v893_v42 = vsel %vm5370_vm4, %v4121_v29, %v892_v35  ;;  %v7517_v29 = vld [vmem:[#allocation15_spill] sm:$0xff] }
 0x1ab   :  { %v930_v16 = vrot.slane %v929_v58, 4  ;;  %v5978_v38 = vcombine.low %v885_v48, %v889_v39  ;;  %v897_v8 = vsel %vm5370_vm4, %v4122_v1, %v896_v55  ;;  %v4179_v7 = vcombine.low %v5939_v4, %v877_v45  ;;  %v5066_v45 = vld [vmem:[#allocation2] sm:$0xff] }
 0x1ac   :  { %v5985_v12 = vsel %vm5370_vm4, %v4128_v15, %v942_v24  ;;  %v5987_v34 = vcombine.low %v893_v42, %v897_v8  ;;  %v4181_v26 = vcombine.low %v889_v39, %v893_v42  ;;  %v7516_v21 = vcombine.low %v5385_v47, %v5563_v27  ;;  %v5008_v47 = vld [vmem:[%s7422_s3 + $0x108] sm:$0xff]   ;;  %v7520_v15 = vld [vmem:[#allocation21_spill] sm:$0xff] }
 0x1ad   :  { %v5991_v19 = vsel %vm5516_vm7, %v930_v16, %v934_v57  ;;  %v4188_v5 = vcombine.low %v5985_v12, %v5449_v61  ;;  %1114 = vrot.lane.b32.xlu1 %v4179_v7, %s5097_s15  ;;  %v4182_v48 = vcombine.low %v897_v8, %v5985_v12  ;;  %v4469_v23 = vpack.c.bf16 %v5514_v51, %v5066_v45  ;;  %v7519_v39 = vld [vmem:[#allocation19_spill] sm:$0xff] }
 0x1ae   :  { %v4174_v43 = vcombine.low %v5907_v63, %v5991_v19  ;;  %v4186_v22 = vcombine.low %v5991_v19, %v981_v32  ;;  %v4470_v51 = vpack.c.bf16 %v5568_v40, %v5546_v56  ;;  %v7518_v56 = vld [vmem:[#allocation17_spill] sm:$0xff]  ;;  %v4472_v24 = vpack.c.bf16 %v7520_v15, %v7519_v39 }
 0x1af   :  { %v4471_v40 = vpack.c.bf16 %v7518_v56, %v7517_v29 }
 0x1b0   :  { %1130 = vrot.lane.b32.xlu0 %v4186_v22, %s5097_s15 }
 0x1b1   :  { %1118 = vrot.lane.b32.xlu1 %v4181_v26, %s5097_s15 }
 0x1b5   :  { %1120 = vrot.lane.b32.xlu1 %v4182_v48, %s5097_s15  ;;  %v5067_v48 = vld [vmem:[#allocation2 + $0xa0] sm:$0xff] }
 0x1de   :  { %v1071_v13 = vpop.permute.xlu0 %1070 }
 0x1df   :  { %v1170_v9 = vsel %vm44_vm0, %v7516_v21, %v1071_v13  ;;  %v7521_v13 = vld [vmem:[#allocation22_spill] sm:$0xff] }
 0x1e0   :  { %1585 = vmatprep.mubr.bf16.mxu1 %v1170_v9  ;;  %v4473_v21 = vpack.c.bf16 %v7521_v13, %v5067_v48  ;;  %v7535_v48 = vld [vmem:[#allocation23_spill] sm:$0xff]  ;;  %v7536_v13 = vld [vmem:[#allocation26_spill] sm:$0xff] }
 0x1e5   :  { %v1023_v32 = vpop.permute.xlu1 %1022 }
 0x1e6   :  { %v1138_v46 = vsel %vm44_vm0, %v4469_v23, %v1023_v32  ;;  %v1073_v28 = vpop.permute.xlu0 %1072 }
 0x1e7   :  { %1586 = vmatmul.mubr.bf16.vlgmr.msra.gmra.mxu1 %v1138_v46  ;;  %v1174_v6 = vsel %vm44_vm0, %v5680_v37, %v1073_v28  ;;  %v7522_v46 = vld [vmem:[#allocation14_spill] sm:$0xff]  ;;  %v7525_v28 = vld [vmem:[#allocation25_spill] sm:$0xff] }
 0x1e8   :  { %4890 = vmatpush3.bf16.msra.mxu1 %v5532_v62  ;;  %1593 = vmatprep.mubr.bf16.mxu1 %v1174_v6  ;;  %v7524_v4 = vcombine.low %v7522_v46, %v7523_v53  ;;  %v7526_v6 = vld [vmem:[#allocation27_spill] sm:$0xff]  ;;  %v7539_v53 = vld [vmem:[#allocation34_spill] sm:$0xff] }
 0x1e9   :  { %4891 = vmatprep.subr.bf16.mxu1 %v4999_v33  ;;  %v7538_v46 = vld [vmem:[#allocation31_spill] sm:$0xff] }
 0x1ec   :  { %4892 = vmatpush3.bf16.msra.mxu1 %v4999_v33 }
 0x1ed   :  { %v1025_v27 = vpop.permute.xlu1 %1024  ;;  %4893 = vmatprep.subr.bf16.mxu1 %v5008_v47 }
 0x1ee   :  { %v1075_v44 = vpop.permute.xlu0 %1074  ;;  %v1142_v54 = vsel %vm44_vm0, %v4470_v51, %v1025_v27 }
 0x1ef   :  { %1594 = vmatmul.mubr.bf16.gmra.mxu1 %v1142_v54  ;;  %1682 = vmatprep.mubr.bf16.mxu0 %v1142_v54  ;;  %v1178_v62 = vsel %vm44_vm0, %v5881_v31, %v1075_v44  ;;  %v7527_v54 = vld [vmem:[#allocation28_spill] sm:$0xff] }
 0x1f0   :  { %1601 = vmatprep.mubr.bf16.mxu1 %v1178_v62  ;;  %4894 = vmatpush3.bf16.msra.mxu1 %v5008_v47  ;;  %v4474_v47 = vpack.c.bf16 %v7526_v6, %v7525_v28  ;;  %v7528_v62 = vld [vmem:[#allocation29_spill] sm:$0xff] }
 0x1f1   :  { %4895 = vmatprep.subr.bf16.mxu1 %v5011_v17  ;;  %v4475_v29 = vpack.c.bf16 %v7528_v62, %v7527_v54 }
 0x1f4   :  { %4896 = vmatpush3.bf16.msra.mxu1 %v5011_v17 }
 0x1f5   :  { %v1027_v58 = vpop.permute.xlu1 %1026 }
 0x1f6   :  { %v1146_v1 = vsel %vm44_vm0, %v4471_v40, %v1027_v58  ;;  %v7529_v40 = vld [vmem:[#allocation18_spill] sm:$0xff]  ;;  %v7530_v58 = vld [vmem:[#allocation20_spill] sm:$0xff] }
 0x1f7   :  { %v1077_v35 = vpop.permute.xlu0 %1076  ;;  %1602 = vmatmul.mubr.bf16.gmra.mxu1 %v1146_v1 }
 0x1f8   :  { %v1182_v55 = vsel %vm44_vm0, %v5911_v20, %v1077_v35  ;;  %v7531_v35 = vcombine.low %v7529_v40, %v7530_v58 }
 0x1f9   :  { %1609 = vmatprep.mubr.bf16.mxu1 %v1182_v55 }
 0x1fb   :  { %v1079_v57 = vpop.permute.xlu0 %1078 }
 0x1fc   :  { %v1186_v7 = vsel %vm44_vm0, %v4155_v14, %v1079_v57 }
 0x1ff   :  { %v1029_v16 = vpop.permute.xlu1 %1028  ;;  %v1081_v42 = vpop.permute.xlu0 %1080 }
 0x200   :  { %v1150_v8 = vsel %vm44_vm0, %v4472_v24, %v1029_v16  ;;  %v1190_v32 = vsel %vm44_vm0, %v5951_v41, %v1081_v42  ;;  %v7532_v24 = vld [vmem:[#allocation30_spill] sm:$0xff]  ;;  %v7533_v16 = vld [vmem:[#allocation32_spill] sm:$0xff] }
 0x201   :  { %1610 = vmatmul.mubr.bf16.gmra.mxu1 %v1150_v8  ;;  %v4476_v42 = vpack.c.bf16 %v7533_v16, %v7532_v24 }
 0x202   :  { %1617 = vmatprep.mubr.bf16.mxu1 %v1186_v7  ;;  %v5068_v7 = vld [vmem:[#allocation2 + $0x90] sm:$0xff] }
 0x203   :  { %v1031_v22 = vpop.permute.xlu1 %1030  ;;  %v1083_v26 = vpop.permute.xlu0 %1082 }
 0x204   :  { %v1154_v45 = vsel %vm44_vm0, %v4473_v21, %v1031_v22  ;;  %v1194_v17 = vsel %vm44_vm0, %v5978_v38, %v1083_v26  ;;  %v7534_v22 = vld [vmem:[#allocation24_spill] sm:$0xff]  ;;  %v7537_v21 = vcombine.low %v7535_v48, %v7536_v13 }
 0x205   :  { %v4485_v26 = vpack.c.bf16 %v5068_v7, %v7534_v22 }
 0x207   :  { %v1085_v9 = vpop.permute.xlu0 %1084 }
 0x208   :  { %v1033_v23 = vpop.permute.xlu1 %1032  ;;  %v1198_v57 = vsel %vm44_vm0, %v5987_v34, %v1085_v9 }
 0x209   :  { %1618 = vmatmul.mubr.bf16.gmra.mxu1 %v1154_v45  ;;  %v1158_v27 = vsel %vm44_vm0, %v4474_v47, %v1033_v23 }
 0x20a   :  { %1625 = vmatprep.mubr.bf16.mxu1 %v1190_v32 }
 0x20c   :  { %v1107_v33 = vpop.permute.xlu0 %1106 }
 0x20d   :  { %v1202_v14 = vsel %vm44_vm0, %v7524_v4, %v1107_v33  ;;  %v7540_v4 = vcombine.low %v7538_v46, %v7539_v53 }
 0x20e   :  { %1683 = vmatmul.mubr.bf16.vlgmr.msra.gmra.mxu0 %v1202_v14 }
 0x20f   :  { %1690 = vmatprep.mubr.bf16.mxu0 %v1146_v1  ;;  %v1035_v51 = vpop.permute.xlu1 %1034 }
 0x210   :  { %v1162_v55 = vsel %vm44_vm0, %v4475_v29, %v1035_v51  ;;  %v1111_v39 = vpop.permute.xlu0 %1110 }
 0x211   :  { %1626 = vmatmul.mubr.bf16.gmra.mxu1 %v1158_v27  ;;  %v1210_v45 = vsel %vm44_vm0, %v7537_v21, %v1111_v39 }
 0x212   :  { %1633 = vmatprep.mubr.bf16.mxu1 %v1194_v17 }
 0x213   :  { %v1037_v44 = vpop.permute.xlu1 %1036 }
 0x214   :  { %v1166_v23 = vsel %vm44_vm0, %v4476_v42, %v1037_v44 }
 0x217   :  { %v1109_v56 = vpop.permute.xlu1 %1108 }
 0x218   :  { %v1206_v1 = vsel %vm44_vm0, %v7531_v35, %v1109_v56 }
 0x219   :  { %1691 = vmatmul.mubr.bf16.gmra.mxu0 %v1206_v1  ;;  %1634 = vmatmul.mubr.bf16.gmra.mxu1 %v1162_v55 }
 0x21a   :  { %1698 = vmatprep.mubr.bf16.mxu0 %v1150_v8  ;;  %1641 = vmatprep.mubr.bf16.mxu1 %v1198_v57  ;;  %v1113_v8 = vpop.permute.xlu0 %1112 }
 0x21b   :  { %v1129_v15 = vpop.permute.xlu1 %1128  ;;  %v1214_v32 = vsel %vm44_vm0, %v4170_v49, %v1113_v8 }
 0x21c   :  { %v1234_v9 = vsel %vm44_vm0, %v4485_v26, %v1129_v15 }
 0x21e   :  { %v1117_v30 = vpop.permute.xlu0 %1116 }
 0x21f   :  { %v1115_v33 = vpop.permute.xlu1 %1114 }
 0x221   :  { %1699 = vmatmul.mubr.bf16.gmra.mxu0 %v1210_v45  ;;  %1642 = vmatmul.mubr.bf16.gmra.mxu1 %v1166_v23 }
 0x222   :  { %1706 = vmatprep.mubr.bf16.mxu0 %v1234_v9  ;;  %4897 = vmatprep.mubr.msk.bf16.mxu1 %vm44_vm0, %v5680_v37  ;;  %v1218_v37 = vsel %vm44_vm0, %v7540_v4, %v1115_v33 }
 0x223   :  { %v1119_v50 = vpop.permute.xlu1 %1118 }
 0x224   :  { %v1226_v11 = vsel %vm44_vm0, %v4173_v18, %v1119_v50 }
 0x229   :  { %1707 = vmatmul.mubr.bf16.gmra.mxu0 %v1214_v32  ;;  %4898 = vmatmul.mubr.msk.bf16.vlgmr.msra.gmra.mxu1 %vm44_vm0, %v5881_v31  ;;  %v1222_v31 = vsel %vm44_vm0, %v4172_v2, %v1117_v30  ;;  %v1121_v2 = vpop.permute.xlu1 %1120 }
 0x22a   :  { %1714 = vmatprep.mubr.bf16.mxu0 %v1158_v27  ;;  %4901 = vmatprep.mubr.msk.bf16.mxu1 %vm44_vm0, %v5911_v20  ;;  %v1131_v20 = vpop.permute.xlu0 %1130 }
 0x231   :  { %1715 = vmatmul.mubr.bf16.gmra.mxu0 %v1218_v37  ;;  %4902 = vmatmul.mubr.msk.bf16.gmra.mxu1 %vm44_vm0, %v4187_v10  ;;  %v7541_v10 = vld [vmem:[#allocation33_spill] sm:$0xff] }
 0x232   :  { %1722 = vmatprep.mubr.bf16.mxu0 %v1162_v55  ;;  %4905 = vmatprep.mubr.msk.bf16.mxu1 %vm44_vm0, %v5951_v41  ;;  %v4486_v59 = vpack.c.bf16 %v5069_v0, %v7541_v10  ;;  %v1230_v41 = vsel %vm44_vm0, %v4174_v43, %v1121_v2 }
 0x234   :  { %v1238_v60 = vsel %vm44_vm0, %v4486_v59, %v1131_v20 }
 0x239   :  { %1723 = vmatmul.mubr.bf16.gmra.mxu0 %v1222_v31  ;;  %4906 = vmatmul.mubr.msk.bf16.gmra.mxu1 %vm44_vm0, %v5978_v38 }
 0x23a   :  { %1730 = vmatprep.mubr.bf16.mxu0 %v1166_v23  ;;  %4909 = vmatprep.mubr.msk.bf16.mxu1 %vm44_vm0, %v5987_v34  ;;  %v6146_v23 = vld [vmem:[%s7423_s4] ss:$0 sm:$0xff] }
 0x241   :  { %1731 = vmatmul.mubr.bf16.gmra.mxu0 %v1226_v11  ;;  %4910 = vmatmul.mubr.msk.bf16.gmra.mxu1 %vm44_vm0, %v4188_v5 }
 0x242   :  { %1738 = vmatprep.mubr.bf16.mxu0 %v1238_v60 }
 0x249   :  { %1739 = vmatmul.mubr.bf16.gmra.mxu0 %v1230_v41 }
 0x2a7   :  { %v4625_v49 = vpop.f32.mrf.mxu1 }
 0x2a9   :  { %v4626_v3 = vpop.f32.mrf.mxu1 }
 0x2aa   :  { %v4627_v21 = vadd.f32 %v4626_v3, %v4625_v49 }
 0x2ab   :  { %v4628_v25 = vpop.f32.mrf.mxu1 }
 0x2ac   :  { %v1588_v37 = vadd.f32 %v4627_v21, %v6146_v23 }
 0x2ad   :  { %v4629_v18 = vpop.f32.mrf.mxu1 }
 0x2ae   :  { %v4630_v30 = vadd.f32 %v4629_v18, %v4628_v25 }
 0x2af   :  { %v4631_v38 = vpop.f32.mrf.mxu1 }
 0x2b1   :  { %v4632_v34 = vpop.f32.mrf.mxu1 }
 0x2b2   :  { %v4633_v45 = vadd.f32 %v4632_v34, %v4631_v38  ;;  %v1591_v38 = vadd.f32 %v4630_v30, %v6146_v23 }
 0x2b3   :  { %v4634_v14 = vpop.f32.mrf.mxu1 }
 0x2b4   :  { %v1596_v31 = vadd.f32 %v4633_v45, %v6146_v23 }
 0x2b5   :  { %v4635_v28 = vpop.f32.mrf.mxu1 }
 0x2b6   :  { %v4636_v32 = vadd.f32 %v4635_v28, %v4634_v14 }
 0x2b7   :  { %v4637_v6 = vpop.f32.mrf.mxu1 }
 0x2b8   :  { %v1599_v10 = vadd.f32 %v4636_v32, %v6146_v23 }
 0x2b9   :  { %v4638_v61 = vpop.f32.mrf.mxu1 }
 0x2ba   :  { %v4639_v2 = vadd.f32 %v4638_v61, %v4637_v6 }
 0x2bb   :  { %v6111_v12 = vpop.f32.mrf.mxu1 }
 0x2bd   :  { %v6113_v5 = vpop.f32.mrf.mxu1 }
 0x2be   :  { %v4642_v6 = vadd.f32 %v6113_v5, %v6111_v12 }
 0x2c0   :  { %v1607_v5 = vadd.f32 %v4642_v6, %v6146_v23 }
 0x2c1   :  { %v4643_v47 = vpop.f32.mrf.mxu1 }
 0x2c3   :  { %v4644_v51 = vpop.f32.mrf.mxu1 }
 0x2c4   :  { %v4645_v41 = vadd.f32 %v4644_v51, %v4643_v47 }
 0x2c5   :  { %v4646_v63 = vpop.f32.mrf.mxu1 }
 0x2c6   :  { %v1612_v61 = vadd.f32 %v4645_v41, %v6146_v23 }
 0x2c7   :  { %v4647_v19 = vpop.f32.mrf.mxu1 }
 0x2c8   :  { %v4648_v25 = vadd.f32 %v4647_v19, %v4646_v63 }
 0x2c9   :  { %v6115_v43 = vpop.f32.mrf.mxu1 }
 0x2ca   :  { %v1615_v19 = vadd.f32 %v4648_v25, %v6146_v23 }
 0x2cb   :  { %v6117_v27 = vpop.f32.mrf.mxu1 }
 0x2cc   :  { %v4651_v30 = vadd.f32 %v6117_v27, %v6115_v43 }
 0x2cd   :  { %v6119_v17 = vpop.f32.mrf.mxu1 }
 0x2ce   :  { %v4689_v44 = vpop.f32.mrf.mxu0 }
 0x2cf   :  { %v6121_v54 = vpop.f32.mrf.mxu1 }
 0x2d0   :  { %v4690_v62 = vpop.f32.mrf.mxu0  ;;  %v4654_v43 = vadd.f32 %v6121_v54, %v6119_v17 }
 0x2d1   :  { %v6123_v29 = vpop.f32.mrf.mxu1  ;;  %v4691_v33 = vadd.f32 %v4690_v62, %v4689_v44 }
 0x2d2   :  { %v4692_v56 = vpop.f32.mrf.mxu0 }
 0x2d3   :  { %v6125_v40 = vpop.f32.mrf.mxu1  ;;  %v1685_v60 = vadd.f32 %v4691_v33, %v1588_v37 }
 0x2d4   :  { %v4693_v58 = vpop.f32.mrf.mxu0  ;;  %v4657_v27 = vadd.f32 %v6125_v40, %v6123_v29  ;;  %v1623_v29 = vadd.f32 %v4654_v43, %v6146_v23 }
 0x2d5   :  { %v6127_v35 = vpop.f32.mrf.mxu1  ;;  %v4694_v59 = vadd.f32 %v4693_v58, %v4692_v56  ;;  %v1604_v56 = vadd.f32 %v4639_v2, %v6146_v23 }
 0x2d6   :  { %v1628_v40 = vadd.f32 %v4657_v27, %v6146_v23 }
 0x2d7   :  { %v6129_v1 = vpop.f32.mrf.mxu1 }
 0x2d9   :  { %v4695_v55 = vpop.f32.mrf.mxu0  ;;  %v6131_v57 = vpop.f32.mrf.mxu1 }
 0x2db   :  { %v4696_v39 = vpop.f32.mrf.mxu0  ;;  %v6133_v15 = vpop.f32.mrf.mxu1 }
 0x2dc   :  { %v4697_v46 = vadd.f32 %v4696_v39, %v4695_v55 }
 0x2dd   :  { %v4698_v24 = vpop.f32.mrf.mxu0  ;;  %v6135_v16 = vpop.f32.mrf.mxu1 }
 0x2de   :  { %v1693_v11 = vadd.f32 %v4697_v46, %v1596_v31 }
 0x2df   :  { %v4699_v42 = vpop.f32.mrf.mxu0  ;;  %v6137_v7 = vpop.f32.mrf.mxu1 }
 0x2e0   :  { %v4700_v50 = vadd.f32 %v4699_v42, %v4698_v24  ;;  %v1688_v42 = vadd.f32 %v4694_v59, %v1591_v38  ;;  %v1620_v38 = vadd.f32 %v4651_v30, %v6146_v23 }
 0x2e1   :  { %v4701_v22 = vpop.f32.mrf.mxu0  ;;  %v6139_v26 = vpop.f32.mrf.mxu1 }
 0x2e2   :  { %v1696_v28 = vadd.f32 %v4700_v50, %v1599_v10 }
 0x2e3   :  { %v4702_v48 = vpop.f32.mrf.mxu0  ;;  %v6141_v13 = vpop.f32.mrf.mxu1 }
 0x2e4   :  { %v4703_v55 = vadd.f32 %v4702_v48, %v4701_v22 }
 0x2e5   :  { %v4704_v9 = vpop.f32.mrf.mxu0  ;;  %v6148_v8 = vpop.f32.mrf.mxu1 }
 0x2e6   :  { %v1701_v12 = vadd.f32 %v4703_v55, %v1604_v56  ;;  %v4660_v55 = vadd.f32 %v6129_v1, %v6127_v35  ;;  %v4663_v35 = vadd.f32 %v6133_v15, %v6131_v57 }
 0x2e7   :  { %v4705_v53 = vpop.f32.mrf.mxu0  ;;  %v6150_v4 = vpop.f32.mrf.mxu1 }
 0x2e8   :  { %v4706_v33 = vadd.f32 %v4705_v53, %v4704_v9  ;;  %v1636_v30 = vadd.f32 %v4663_v35, %v6146_v23  ;;  %v1962_v35 = vld [vmem:[#allocation2 + $0xa8] sm:$0x3] }
 0x2e9   :  { %v4707_v20 = vpop.f32.mrf.mxu0  ;;  %v4899_v0 = vpop.f32.mrf.mxu1 }
 0x2ea   :  { %v1790_v34 = vadd.f32 %v4899_v0, %v1693_v11  ;;  %v1704_v41 = vadd.f32 %v4706_v33, %v1607_v5 }
 0x2eb   :  { %v4708_v49 = vpop.f32.mrf.mxu0  ;;  %v1781_v3 = vpop.f32.mrf.mxu1 }
 0x2ec   :  { %v1782_v14 = vadd.f32 %v1781_v3, %v1685_v60  ;;  %v4709_v18 = vadd.f32 %v4708_v49, %v4707_v20  ;;  %v1846_v58 = vmax.f32 %v1790_v34, 0.0 }
 0x2ed   :  { %v4710_v44 = vpop.f32.mrf.mxu0  ;;  %v4900_v62 = vpop.f32.mrf.mxu1 }
 0x2ee   :  { %v1844_v39 = vmax.f32 %v1782_v14, 0.0  ;;  %v1793_v24 = vadd.f32 %v4900_v62, %v1696_v28  ;;  %v1709_v48 = vadd.f32 %v4709_v18, %v1612_v61 }
 0x2ef   :  { %v4711_v47 = vpop.f32.mrf.mxu0  ;;  %v1784_v51 = vpop.f32.mrf.mxu1 }
 0x2f0   :  { %v4712_v21 = vadd.f32 %v4711_v47, %v4710_v44  ;;  %v1847_v45 = vmax.f32 %v1793_v24, 0.0  ;;  %v1785_v63 = vadd.f32 %v1784_v51, %v1688_v42  ;;  %1876 = vrot.lane.b32.xlu0 %v1844_v39, %s5096_s2 }
 0x2f1   :  { %v4713_v22 = vpop.f32.mrf.mxu0  ;;  %v4903_v32 = vpop.f32.mrf.mxu1 }
 0x2f2   :  { %v6162_v46 = vpack.c.bf16 %v1847_v45, %v1846_v58  ;;  %v1845_v37 = vmax.f32 %v1785_v63, 0.0  ;;  %v1806_v50 = vadd.f32 %v4903_v32, %v1709_v48  ;;  %v1712_v9 = vadd.f32 %v4712_v21, %v1615_v19 }
 0x2f3   :  { %v4714_v31 = vpop.f32.mrf.mxu0  ;;  %v1797_v20 = vpop.f32.mrf.mxu1 }
 0x2f4   :  { %7542 = vst [vmem:[#allocation15_spill] sm:$0xff] %v6162_v46  ;;  %v6167_v0 = vpack.c.bf16 %v1845_v37, %v1844_v39  ;;  %v1798_v10 = vadd.f32 %v1797_v20, %v1701_v12  ;;  %1878 = vrot.lane.b32.xlu1 %v1845_v37, %s5096_s2  ;;  %1880 = vrot.lane.b32.xlu0 %v1846_v58, %s5096_s2  ;;  %v1850_v34 = vmax.f32 %v1806_v50, 0.0 }
 0x2f5   :  { %v4716_v53 = vpop.f32.mrf.mxu0  ;;  %v4904_v59 = vpop.f32.mrf.mxu1  ;;  %v4715_v11 = vadd.f32 %v4714_v31, %v4713_v22  ;;  %v4666_v31 = vadd.f32 %v6137_v7, %v6135_v16  ;;  %v4669_v16 = vadd.f32 %v6141_v13, %v6139_v26 }
 0x2f6   :  { %7543 = vst [vmem:[#allocation17_spill] sm:$0xff] %v6167_v0  ;;  %v1848_v60 = vmax.f32 %v1798_v10, 0.0  ;;  %v1809_v2 = vadd.f32 %v4904_v59, %v1712_v9 }
 0x2f7   :  { %v4717_v49 = vpop.f32.mrf.mxu0  ;;  %v1800_v3 = vpop.f32.mrf.mxu1  ;;  %v1717_v54 = vadd.f32 %v4715_v11, %v1620_v38 }
 0x2f8   :  { %v1851_v14 = vmax.f32 %v1809_v2, 0.0  ;;  %v1801_v28 = vadd.f32 %v1800_v3, %v1704_v41  ;;  %1882 = vrot.lane.b32.xlu1 %v1847_v45, %s5096_s2  ;;  %1884 = vrot.lane.b32.xlu0 %v1848_v60, %s5096_s2  ;;  %v4718_v44 = vadd.f32 %v4717_v49, %v4716_v53  ;;  %v1631_v45 = vadd.f32 %v4660_v55, %v6146_v23 }
 0x2f9   :  { %v4719_v25 = vpop.f32.mrf.mxu0  ;;  %v4907_v18 = vpop.f32.mrf.mxu1 }
 0x2fa   :  { %v6178_v62 = vpack.c.bf16 %v1851_v14, %v1850_v34  ;;  %v1849_v17 = vmax.f32 %v1801_v28, 0.0  ;;  %v1720_v21 = vadd.f32 %v4718_v44, %v1623_v29  ;;  %v4672_v28 = vadd.f32 %v6150_v4, %v6148_v8  ;;  %v6215_v4 = vld [vmem:[#allocation2] sm:$0xff] }
 0x2fb   :  { %v4720_v39 = vpop.f32.mrf.mxu0  ;;  %v1813_v24 = vpop.f32.mrf.mxu1  ;;  %7549 = vst [vmem:[#allocation25_spill] sm:$0xff] %v6215_v4 }
 0x2fc   :  { %7544 = vst [vmem:[#allocation19_spill] sm:$0xff] %v6178_v62  ;;  %v6184_v42 = vpack.c.bf16 %v1849_v17, %v1848_v60  ;;  %v4721_v56 = vadd.f32 %v4720_v39, %v4719_v25  ;;  %v1814_v6 = vadd.f32 %v1813_v24, %v1717_v54  ;;  %1886 = vrot.lane.b32.xlu1 %v1849_v17, %s5096_s2 }
 0x2fd   :  { %1888 = vrot.lane.b32.xlu0 %v1850_v34, %s5096_s2  ;;  %v4722_v61 = vpop.f32.mrf.mxu0  ;;  %v4908_v47 = vpop.f32.mrf.mxu1  ;;  %v1639_v60 = vadd.f32 %v4666_v31, %v6146_v23  ;;  %v1647_v54 = vadd.f32 %v4672_v28, %v6146_v23  ;;  %v5024_v28 = vld [vmem:[%s7424_s5 + $0x48] sm:$0xff]  }
 0x2fe   :  { %7545 = vst [vmem:[#allocation21_spill] sm:$0xff] %v6184_v42  ;;  %v1725_v51 = vadd.f32 %v4721_v56, %v1628_v40  ;;  %v1852_v58 = vmax.f32 %v1814_v6, 0.0  ;;  %v1942_v56 = vld [vmem:[#allocation2 + $0x8] sm:$0x3] }
 0x2ff   :  { %v4723_v1 = vpop.f32.mrf.mxu0  ;;  %v1816_v63 = vpop.f32.mrf.mxu1 }
 0x300   :  { %v1822_v19 = vadd.f32 %v4907_v18, %v1725_v51  ;;  %v4724_v22 = vadd.f32 %v4723_v1, %v4722_v61  ;;  %v1817_v48 = vadd.f32 %v1816_v63, %v1720_v21  ;;  %1892 = vrot.lane.b32.xlu1 %v1852_v58, %s5096_s2  ;;  %v4487_v61 = vpack.c.bf16 %v6215_v4, %v6215_v4  ;;  %v1959_v1 = vld [vmem:[#allocation2 + $0x90] sm:$0xff]  ;;  %v1960_v63 = vld [vmem:[#allocation2 + $0x98] sm:$0x3] }
 0x301   :  { %1890 = vrot.lane.b32.xlu0 %v1851_v14, %s5096_s2  ;;  %v4725_v32 = vpop.f32.mrf.mxu0  ;;  %v4911_v33 = vpop.f32.mrf.mxu1  ;;  %v1644_v14 = vadd.f32 %v4669_v16, %v6146_v23  ;;  %v5015_v16 = vld [vmem:[%s7424_s5 + $0x30] sm:$0xff]  }
 0x302   :  { %v1854_v37 = vmax.f32 %v1822_v19, 0.0  ;;  %v1728_v12 = vadd.f32 %v4724_v22, %v1631_v45  ;;  %v1853_v5 = vmax.f32 %v1817_v48, 0.0  ;;  %v4266_v51 = vrot.slane %v4487_v61, 9  ;;  %v1961_v45 = vld [vmem:[#allocation2 + $0xa0] sm:$0xff] }
 0x303   :  { %v4726_v57 = vpop.f32.mrf.mxu0  ;;  %v1829_v15 = vpop.f32.mrf.mxu1  ;;  %v4523_v19 = vpack.c.bf16 %v1959_v1, %v1959_v1  ;;  %v6229_v22 = vpack.c.bf16 %v1960_v63, %v1960_v63  ;;  %v4503_v48 = vpack.c.bf16 %v1961_v45, %v1961_v45 }
 0x304   :  { %v1825_v50 = vadd.f32 %v4908_v47, %v1728_v12  ;;  %v6196_v20 = vpack.c.bf16 %v1853_v5, %v1852_v58  ;;  %v4727_v10 = vadd.f32 %v4726_v57, %v4725_v32  ;;  %1894 = vrot.lane.b32.xlu1 %v1853_v5, %s5096_s2  ;;  %v6219_v47 = vpack.c.bf16 %v1942_v56, %v1942_v56  ;;  %v1979_v57 = vld [vmem:[#allocation2 + $0x130] sm:$0xff] }
 0x305   :  { %1896 = vrot.lane.b32.xlu0 %v1854_v37, %s5096_s2  ;;  %v4728_v9 = vpop.f32.mrf.mxu0  ;;  %v4912_v53 = vpop.f32.mrf.mxu1  ;;  %v6231_v32 = vpack.c.bf16 %v1962_v35, %v1962_v35  ;;  %v4274_v5 = vrot.slane %v4503_v48, 9 }
 0x306   :  { %7546 = vst [vmem:[#allocation22_spill] sm:$0xff] %v6196_v20  ;;  %v1855_v59 = vmax.f32 %v1825_v50, 0.0  ;;  %v1733_v11 = vadd.f32 %v4727_v10, %v1636_v30  ;;  %v2307_v58 = vrot.slane %v6219_v47, 5  ;;  %v4525_v50 = vpack.c.bf16 %v1979_v57, %v1979_v57 }
 0x307   :  { %v4729_v2 = vpop.f32.mrf.mxu0  ;;  %v1832_v49 = vpop.f32.mrf.mxu1  ;;  %v2339_v30 = vrot.slane %v6231_v32, 5  ;;  %v2091_v45 = vshll.u32 %v6219_v47, 16  ;;  %v2203_v35 = vshll.u32 %v6231_v32, 16  ;;  %v2435_v57 = vshll.u32 %v6229_v22, 16  ;;  %v5028_v47 = vld [vmem:[%s7424_s5] sm:$0xff]   ;;  %v5029_v32 = vld [vmem:[%s7424_s5 + $0xb8] sm:$0xff]  }
 0x308   :  { %v6203_v7 = vpack.c.bf16 %v1855_v59, %v1854_v37  ;;  %v1830_v41 = vadd.f32 %v1829_v15, %v1733_v11  ;;  %v4730_v43 = vadd.f32 %v4729_v2, %v4728_v9  ;;  %1898 = vrot.lane.b32.xlu1 %v1855_v59, %s5096_s2  ;;  %v6227_v21 = vsel %vm5370_vm4, %v4266_v51, %v2307_v58  ;;  %v1980_v15 = vld [vmem:[#allocation2 + $0x138] sm:$0x3]  ;;  %v5014_v2 = vld [vmem:[%s7424_s5 + $0x70] sm:$0xff]  }
 0x309   :  { %v4731_v27 = vpop.f32.mrf.mxu0  ;;  %7551 = vst [vmem:[#allocation28_spill] sm:$0xff] %v6227_v21  ;;  %v2455_v37 = vrot.slane %v6229_v22, 5  ;;  %v6241_v31 = vsel %vm5370_vm4, %v4274_v5, %v2339_v30  ;;  %v6243_v10 = vpack.c.bf16 %v1980_v15, %v1980_v15  ;;  %v4293_v9 = vrot.slane %v4525_v50, 9  ;;  %v5012_v11 = vld [vmem:[%s7424_s5 + $0x78] sm:$0xff]  }
 0x30a   :  { %7547 = vst [vmem:[#allocation14_spill] sm:$0xff] %v6203_v7  ;;  %v1856_v3 = vmax.f32 %v1830_v41, 0.0  ;;  %v1736_v38 = vadd.f32 %v4730_v43, %v1639_v60  ;;  %v5013_v60 = vld [vmem:[%s7424_s5 + $0x38] sm:$0xff]   ;;  %4749 = vmatprep.subr.bf16.mxu1 %v5012_v11  ;;  %v5016_v41 = vld [vmem:[%s7424_s5 + $0x68] sm:$0xff]  }
 0x30b   :  { %v4732_v34 = vpop.f32.mrf.mxu0  ;;  %4750 = vmatpush3.bf16.msra.mxu1 %v5013_v60  ;;  %v5017_v43 = vld [vmem:[%s7424_s5 + $0x28] sm:$0xff]   ;;  %v2449_v22 = vshll.u32 %v6243_v10, 16 }
 0x30c   :  { %v1833_v25 = vadd.f32 %v1832_v49, %v1736_v38  ;;  %v4733_v18 = vadd.f32 %v4732_v34, %v4731_v27  ;;  %1900 = vrot.lane.b32.xlu0 %v1856_v3, %s5096_s2  ;;  %4751 = vmatprep.subr.bf16.mxu1 %v5014_v2  ;;  %v5018_v27 = vld [vmem:[%s7424_s5 + $0x60] sm:$0xff]   ;;  %v5021_v38 = vld [vmem:[%s7424_s5 + $0x18] sm:$0xff]   ;;  %v5022_v34 = vld [vmem:[%s7424_s5 + $0x50] sm:$0xff]  }
 0x30d   :  { %v4734_v26 = vpop.f32.mrf.mxu0  ;;  %v5019_v49 = vld [vmem:[%s7424_s5 + $0x20] sm:$0xff]  }
 0x30e   :  { %v1857_v13 = vmax.f32 %v1833_v25, 0.0  ;;  %v1741_v44 = vadd.f32 %v4733_v18, %v1644_v14  ;;  %v5023_v14 = vld [vmem:[%s7424_s5 + $0x10] sm:$0xff]   ;;  %v2082_v25 = vshrl.u32 %v4487_v61, 16  ;;  %v2085_v18 = vshll.u32 %v4487_v61, 16  ;;  %v5025_v61 = vld [vmem:[%s7424_s5 + $0x8] sm:$0xff]  }
 0x30f   :  { %v4735_v17 = vpop.f32.mrf.mxu0  ;;  %4752 = vmatpush3.bf16.msra.mxu1 %v5015_v16 }
 0x310   :  { %v6211_v29 = vpack.c.bf16 %v1857_v13, %v1856_v3  ;;  %v4736_v40 = vadd.f32 %v4735_v17, %v4734_v26  ;;  %1902 = vrot.lane.b32.xlu1 %v1857_v13, %s5096_s2  ;;  %v1838_v55 = vadd.f32 %v4911_v33, %v1741_v44  ;;  %v4292_v33 = vrot.slane %v4523_v19, 9  ;;  %4753 = vmatprep.subr.bf16.mxu1 %v5016_v41  ;;  %v5020_v3 = vld [vmem:[%s7424_s5 + $0x58] sm:$0xff]  }
 0x311   :  { %v2194_v26 = vshrl.u32 %v4503_v48, 16  ;;  %v2197_v13 = vshll.u32 %v4503_v48, 16  ;;  %v2426_v44 = vshrl.u32 %v4523_v19, 16  ;;  %v2429_v17 = vshll.u32 %v4523_v19, 16  ;;  %v5026_v19 = vld [vmem:[%s7424_s5 + $0x40] sm:$0xff]   ;;  %v5027_v48 = vld [vmem:[%s7424_s5 + $0xf8] sm:$0xff]  }
 0x312   :  { %7548 = vst [vmem:[#allocation16_spill] sm:$0xff] %v6211_v29  ;;  %v1744_v39 = vadd.f32 %v4736_v40, %v1647_v54  ;;  %v1858_v24 = vmax.f32 %v1838_v55, 0.0  ;;  %v6236_v12 = vsel %vm5370_vm4, %v4292_v33, %v2455_v37  ;;  %v2084_v54 = vrot.slane %v2082_v25, 4  ;;  %4813 = vmatprep.subr.bf16.mxu0 %v5027_v48 }
 0x313   :  { %4754 = vmatpush3.bf16.msra.mxu1 %v5017_v43  ;;  %v2087_v40 = vrot.slane %v2085_v18, 5  ;;  %v2440_v55 = vshrl.u32 %v4525_v50, 16  ;;  %v2199_v56 = vrot.slane %v2197_v13, 5  ;;  %v2431_v51 = vrot.slane %v2429_v17, 5  ;;  %4814 = vmatpush3.bf16.msra.mxu0 %v5029_v32 }
 0x314   :  { %1904 = vrot.lane.b32.xlu0 %v1858_v24, %s5096_s2  ;;  %v1841_v8 = vadd.f32 %v4912_v53, %v1744_v39  ;;  %v2459_v53 = vrot.slane %v6243_v10, 5  ;;  %4755 = vmatprep.subr.bf16.mxu1 %v5018_v27  ;;  %v2443_v39 = vshll.u32 %v4525_v50, 16  ;;  %v6312_v50 = vrot.slane %v2091_v45, 5 }
 0x315   :  { %v2088_v58 = vor.u32 %v2087_v40, %v2084_v54  ;;  %v2442_v1 = vrot.slane %v2440_v55, 4  ;;  %v6323_v27 = vrot.slane %v2435_v57, 5 }
 0x316   :  { %v1859_v6 = vmax.f32 %v1841_v8, 0.0  ;;  %v6248_v59 = vsel %vm5370_vm4, %v4293_v9, %v2459_v53  ;;  %v2196_v8 = vrot.slane %v2194_v26, 4  ;;  %v2445_v63 = vrot.slane %v2443_v39, 5 }
 0x317   :  { %4756 = vmatpush3.bf16.msra.mxu1 %v5019_v49  ;;  %v6310_v15 = vrot.slane %v2088_v58, 4  ;;  %v6315_v9 = vrot.slane %v2203_v35, 5  ;;  %v5031_v58 = vld [vmem:[%s7424_s5 + $0xf0] sm:$0xff]  }
 0x318   :  { %1906 = vrot.lane.b32.xlu1 %v1859_v6, %s5096_s2  ;;  %v6222_v23 = vpack.c.bf16 %v1859_v6, %v1858_v24  ;;  %4757 = vmatprep.subr.bf16.mxu1 %v5020_v3  ;;  %v2428_v6 = vrot.slane %v2426_v44, 4  ;;  %v2200_v5 = vor.u32 %v2199_v56, %v2196_v8  ;;  %v2446_v53 = vor.u32 %v2445_v63, %v2442_v1 }
 0x319   :  { %v2094_v3 = vsel %vm5516_vm7, %v6310_v15, %v6312_v50  ;;  %4815 = vmatprep.subr.bf16.mxu0 %v5031_v58  ;;  %v5034_v15 = vld [vmem:[%s7424_s5 + $0xa8] sm:$0xff]   ;;  %v5035_v50 = vld [vmem:[%s7424_s5 + $0xe0] sm:$0xff]  }
 0x31a   :  { %7550 = vst [vmem:[#allocation27_spill] sm:$0xff] %v6222_v23  ;;  %v2432_v30 = vor.u32 %v2431_v51, %v2428_v6  ;;  %v6319_v41 = vrot.slane %v2200_v5, 4  ;;  %v6340_v18 = vrot.slane %v2446_v53, 4  ;;  %v5037_v23 = vld [vmem:[%s7424_s5 + $0xd8] sm:$0xff]  }
 0x31b   :  { %4758 = vmatpush3.bf16.msra.mxu1 %v5021_v38  ;;  %v6333_v38 = vrot.slane %v2449_v22, 5 }
 0x31c   :  { %4759 = vmatprep.subr.bf16.mxu1 %v5022_v34  ;;  %v6321_v43 = vrot.slane %v2432_v30, 4  ;;  %v6338_v34 = vld [vmem:[%s7424_s5 + $0x118] sm:$0xff]   ;;  %7555 = vst [vmem:[#allocation30_spill] sm:$0xff] %v6340_v18 }
 0x31d   :  { %7553 = vst [vmem:[#allocation18_spill] sm:$0xff] %v6333_v38  ;;  %7554 = vst [vmem:[#allocation20_spill] sm:$0xff] %v6338_v34 }
 0x31f   :  { %4760 = vmatpush3.bf16.msra.mxu1 %v5023_v14 }
 0x320   :  { %4761 = vmatprep.subr.bf16.mxu1 %v5024_v28 }
 0x323   :  { %4762 = vmatpush3.bf16.msra.mxu1 %v5025_v61  ;;  %v7574_v36 = vld [vmem:[#allocation30_spill] sm:$0xff] }
 0x324   :  { %4763 = vmatprep.subr.bf16.mxu1 %v5026_v19  ;;  %v5032_v19 = vld [vmem:[%s7424_s5 + $0xb0] sm:$0xff]  }
 0x325   :  { %4816 = vmatpush3.bf16.msra.mxu0 %v5032_v19 }
 0x327   :  { %4764 = vmatpush3.bf16.msra.mxu1 %v5028_v47 }
 0x328   :  { %4913 = vmatprep.subr.bf16.mxu1 %v6338_v34 }
 0x362   :  { %v1877_v24 = vpop.permute.xlu0 %1876 }
 0x363   :  { %1925 = vst.msk [vmem:[#allocation2 + $0x11] sm:$0xff] %vm1924_vm8, %v1877_v24 }
 0x366   :  { %v1881_v33 = vpop.permute.xlu0 %1880  ;;  %v1879_v37 = vpop.permute.xlu1 %1878 }
 0x367   :  { %1927 = vst.msk [vmem:[#allocation2 + $0x31] sm:$0xff] %vm1924_vm8, %v1881_v33  ;;  %1926 = vst.msk [vmem:[#allocation2 + $0x21] sm:$0xff] %vm1924_vm8, %v1879_v37 }
 0x36a   :  { %v1885_v11 = vpop.permute.xlu0 %1884  ;;  %v1883_v60 = vpop.permute.xlu1 %1882  ;;  %v6317_v2 = vld [vmem:[#allocation2 + $0x10] sm:$0xff]  ;;  %v1944_v16 = vld [vmem:[#allocation2 + $0x18] sm:$0x3] }
 0x36b   :  { %7552 = vst [vmem:[#allocation29_spill] sm:$0xff] %v6317_v2  ;;  %1929 = vst.msk [vmem:[#allocation2 + $0x51] sm:$0xff] %vm1924_vm8, %v1885_v11  ;;  %v4489_v10 = vpack.c.bf16 %v6317_v2, %v6317_v2  ;;  %v4490_v49 = vpack.c.bf16 %v1944_v16, %v1944_v16 }
 0x36c   :  { %1928 = vst.msk [vmem:[#allocation2 + $0x41] sm:$0xff] %vm1924_vm8, %v1883_v60 }
 0x36d   :  { %v2096_v14 = vshrl.u32 %v4489_v10, 16  ;;  %v2099_v28 = vshll.u32 %v4489_v10, 16  ;;  %v2105_v25 = vshll.u32 %v4490_v49, 16  ;;  %v4267_v55 = vrot.slane %v4489_v10, 9 }
 0x36e   :  { %v1887_v13 = vpop.permute.xlu1 %1886  ;;  %v6342_v44 = vld [vmem:[#allocation2 + $0x20] sm:$0xff]  ;;  %v6344_v17 = vld [vmem:[#allocation2 + $0x30] sm:$0xff]  ;;  %v1946_v54 = vld [vmem:[#allocation2 + $0x28] sm:$0x3]  ;;  %v2311_v39 = vrot.slane %v4490_v49, 5 }
 0x36f   :  { %v1889_v26 = vpop.permute.xlu0 %1888  ;;  %1930 = vst.msk [vmem:[#allocation2 + $0x61] sm:$0xff] %vm1924_vm8, %v1887_v13  ;;  %v4535_v8 = vpack.c.bf16 %v6342_v44, %v6317_v2  ;;  %v6361_v56 = vpack.c.bf16 %v6342_v44, %v6342_v44  ;;  %v6365_v6 = vpack.c.bf16 %v6344_v17, %v6344_v17  ;;  %v2098_v51 = vrot.slane %v2096_v14, 4  ;;  %v1948_v61 = vld [vmem:[#allocation2 + $0x38] sm:$0x3]  ;;  %v5043_v2 = vld [vmem:[%s7424_s5 + $0x88] sm:$0xff]  }
 0x370   :  { %1931 = vst.msk [vmem:[#allocation2 + $0x71] sm:$0xff] %vm1924_vm8, %v1889_v26  ;;  %v2101_v45 = vrot.slane %v2099_v28, 5  ;;  %v2107_v35 = vrot.slane %v2105_v25, 5  ;;  %v6370_v1 = vpack.c.bf16 %v1946_v54, %v1946_v54  ;;  %v6372_v63 = vpack.c.bf16 %v1948_v61, %v1948_v61  ;;  %v5033_v25 = vld [vmem:[%s7424_s5 + $0xe8] sm:$0xff]  }
 0x371   :  { %2541 = vrot.lane.b32.xlu0 %v4535_v8, %s5097_s15  ;;  %v2110_v48 = vshrl.u32 %v6361_v56, 16  ;;  %v2113_v33 = vshll.u32 %v6361_v56, 16  ;;  %v2124_v37 = vshrl.u32 %v6365_v6, 16  ;;  %v2127_v5 = vshll.u32 %v6365_v6, 16  ;;  %4817 = vmatprep.subr.bf16.mxu0 %v5033_v25 }
 0x372   :  { %v1893_v57 = vpop.permute.xlu1 %1892  ;;  %v2102_v32 = vor.u32 %v2101_v45, %v2098_v51  ;;  %v6384_v22 = vld [vmem:[#allocation2 + $0x50] sm:$0xff]  ;;  %v2119_v53 = vshll.u32 %v6370_v1, 16  ;;  %v2133_v11 = vshll.u32 %v6372_v63, 16  ;;  %v6402_v28 = vsel %vm5370_vm4, %v4267_v55, %v2311_v39  ;;  %v1952_v51 = vld [vmem:[#allocation2 + $0x58] sm:$0x3]  ;;  %4818 = vmatpush3.bf16.msra.mxu0 %v5034_v15 }
 0x373   :  { %v1891_v30 = vpop.permute.xlu0 %1890  ;;  %v6382_v47 = vld [vmem:[#allocation2 + $0x40] sm:$0xff]  ;;  %v1950_v60 = vld [vmem:[#allocation2 + $0x48] sm:$0x3]  ;;  %1933 = vst.msk [vmem:[#allocation2 + $0xb1] sm:$0xff] %vm1924_vm8, %v1893_v57  ;;  %v2112_v14 = vrot.slane %v2110_v48, 4  ;;  %7556 = vst [vmem:[#allocation32_spill] sm:$0xff] %v6402_v28  ;;  %v6409_v13 = vpack.c.bf16 %v6384_v22, %v6384_v22  ;;  %4819 = vmatprep.subr.bf16.mxu0 %v5035_v50 }
 0x374   :  { %1932 = vst.msk [vmem:[#allocation2 + $0x81] sm:$0xff] %vm1924_vm8, %v1891_v30  ;;  %v4536_v10 = vpack.c.bf16 %v6382_v47, %v6344_v17  ;;  %v6398_v49 = vpack.c.bf16 %v6382_v47, %v6382_v47  ;;  %v2103_v26 = vrot.slane %v2102_v32, 4  ;;  %v2115_v54 = vrot.slane %v2113_v33, 5 }
 0x375   :  { %v2126_v8 = vrot.slane %v2124_v37, 4  ;;  %v2121_v61 = vrot.slane %v2119_v53, 5  ;;  %v2129_v58 = vrot.slane %v2127_v5, 5  ;;  %v2135_v45 = vrot.slane %v2133_v11, 5 }
 0x376   :  { %2543 = vrot.lane.b32.xlu0 %v4536_v10, %s5097_s15  ;;  %v6412_v19 = vpack.c.bf16 %v1950_v60, %v1950_v60  ;;  %v1895_v39 = vpop.permute.xlu1 %1894  ;;  %v6416_v48 = vsel %vm5516_vm7, %v2103_v26, %v2107_v35  ;;  %v6418_v30 = vld [vmem:[#allocation2 + $0x60] sm:$0xff]  ;;  %v2116_v57 = vor.u32 %v2115_v54, %v2112_v14  ;;  %v2138_v33 = vshrl.u32 %v6398_v49, 16  ;;  %v1954_v60 = vld [vmem:[#allocation2 + $0x68] sm:$0x3] }
 0x377   :  { %v1897_v55 = vpop.permute.xlu0 %1896  ;;  %7557 = vst [vmem:[#allocation24_spill] sm:$0xff] %v6416_v48  ;;  %v2141_v37 = vshll.u32 %v6398_v49, 16  ;;  %1934 = vst.msk [vmem:[#allocation2 + $0xc1] sm:$0xff] %vm1924_vm8, %v1895_v39  ;;  %v4302_v5 = vcombine.low %v2094_v3, %v6416_v48  ;;  %v4537_v35 = vpack.c.bf16 %v6418_v30, %v6384_v22  ;;  %v2130_v32 = vor.u32 %v2129_v58, %v2126_v8  ;;  %v6432_v53 = vld [vmem:[#allocation2 + $0x70] sm:$0xff] }
 0x378   :  { %1935 = vst.msk [vmem:[#allocation2 + $0xd1] sm:$0xff] %vm1924_vm8, %v1897_v55  ;;  %v6434_v11 = vpack.c.bf16 %v1952_v51, %v1952_v51  ;;  %v6438_v10 = vpack.c.bf16 %v6418_v30, %v6418_v30  ;;  %v2117_v14 = vrot.slane %v2116_v57, 4  ;;  %v2140_v25 = vrot.slane %v2138_v33, 4 }
 0x379   :  { %v2143_v26 = vrot.slane %v2141_v37, 5  ;;  %2493 = vrot.lane.b32.xlu1 %v4302_v5, %s5097_s15  ;;  %v2131_v3 = vrot.slane %v2130_v32, 4  ;;  %v2147_v54 = vshll.u32 %v6412_v19, 16  ;;  %v2152_v8 = vshrl.u32 %v6409_v13, 16  ;;  %v1956_v5 = vld [vmem:[#allocation2 + $0x78] sm:$0x3] }
 0x37a   :  { %2545 = vrot.lane.b32.xlu0 %v4537_v35, %s5097_s15  ;;  %v2155_v51 = vshll.u32 %v6409_v13, 16  ;;  %v1899_v58 = vpop.permute.xlu1 %1898  ;;  %v6453_v55 = vsel %vm5516_vm7, %v2117_v14, %v2121_v61  ;;  %v6459_v57 = vpack.c.bf16 %v6432_v53, %v6432_v53  ;;  %v6461_v37 = vld [vmem:[#allocation2 + $0xb0] sm:$0xff]  ;;  %v6463_v35 = vpack.c.bf16 %v1954_v60, %v1954_v60  ;;  %v1964_v40 = vld [vmem:[#allocation2 + $0xb8] sm:$0x3] }
 0x37b   :  { %7558 = vst [vmem:[#allocation23_spill] sm:$0xff] %v6453_v55  ;;  %v6455_v39 = vld [vmem:[#allocation2 + $0x80] sm:$0xff]  ;;  %v2144_v33 = vor.u32 %v2143_v26, %v2140_v25  ;;  %7560 = vst [vmem:[#allocation31_spill] sm:$0xff] %v6461_v37  ;;  %v6468_v32 = vsel %vm5516_vm7, %v2131_v3, %v2135_v45  ;;  %v2161_v25 = vshll.u32 %v6434_v11, 16  ;;  %v2149_v15 = vrot.slane %v2147_v54, 5 }
 0x37c   :  { %7559 = vst [vmem:[#allocation26_spill] sm:$0xff] %v6455_v39  ;;  %1936 = vst.msk [vmem:[#allocation2 + $0xe1] sm:$0xff] %vm1924_vm8, %v1899_v58  ;;  %v4538_v14 = vpack.c.bf16 %v6455_v39, %v6432_v53  ;;  %v4303_v60 = vcombine.low %v6453_v55, %v6468_v32  ;;  %v2154_v16 = vrot.slane %v2152_v8, 4  ;;  %v6479_v58 = vpack.c.bf16 %v6455_v39, %v6455_v39 }
 0x37d   :  { %7561 = vst [vmem:[#allocation34_spill] sm:$0xff] %v6468_v32  ;;  %v2145_v26 = vrot.slane %v2144_v33, 4  ;;  %v2157_v45 = vrot.slane %v2155_v51, 5  ;;  %v6484_v3 = vpack.c.bf16 %v6461_v37, %v6461_v37  ;;  %v6486_v61 = vpack.c.bf16 %v1956_v5, %v1956_v5  ;;  %v5036_v5 = vld [vmem:[%s7424_s5 + $0xa0] sm:$0xff]  }
 0x37e   :  { %2547 = vrot.lane.b32.xlu0 %v4538_v14, %s5097_s15  ;;  %v1901_v50 = vpop.permute.xlu0 %1900  ;;  %2495 = vrot.lane.b32.xlu1 %v4303_v60, %s5097_s15  ;;  %v6493_v8 = vld [vmem:[#allocation2 + $0xc0] sm:$0xff]  ;;  %v2166_v33 = vshrl.u32 %v6438_v10, 16  ;;  %v2169_v14 = vshll.u32 %v6438_v10, 16  ;;  %v2175_v51 = vshll.u32 %v6463_v35, 16  ;;  %v2163_v60 = vrot.slane %v2161_v25, 5 }
 0x37f   :  { %v6491_v54 = vsel %vm5516_vm7, %v2145_v26, %v2149_v15  ;;  %1937 = vst.msk [vmem:[#allocation2 + $0xf1] sm:$0xff] %vm1924_vm8, %v1901_v50  ;;  %v2158_v24 = vor.u32 %v2157_v45, %v2154_v16  ;;  %v4539_v15 = vpack.c.bf16 %v6493_v8, %v6461_v37  ;;  %v6511_v29 = vpack.c.bf16 %v6493_v8, %v6493_v8  ;;  %v6514_v25 = vld [vmem:[#allocation2 + $0xd0] sm:$0xff]  ;;  %v1966_v32 = vld [vmem:[#allocation2 + $0xc8] sm:$0x3] }
 0x380   :  { %7562 = vst [vmem:[#allocation33_spill] sm:$0xff] %v6491_v54  ;;  %v2168_v7 = vrot.slane %v2166_v33, 4  ;;  %v2171_v20 = vrot.slane %v2169_v14, 5  ;;  %v2180_v16 = vshrl.u32 %v6459_v57, 16  ;;  %4820 = vmatpush3.bf16.msra.mxu0 %v5036_v5  ;;  %v2177_v50 = vrot.slane %v2175_v51, 5 }
 0x381   :  { %v2159_v45 = vrot.slane %v2158_v24, 4  ;;  %v2183_v26 = vshll.u32 %v6459_v57, 16  ;;  %v2189_v62 = vshll.u32 %v6486_v61, 16  ;;  %4821 = vmatprep.subr.bf16.mxu0 %v5037_v23  ;;  %v6521_v33 = vpack.c.bf16 %v1964_v40, %v1964_v40  ;;  %v5038_v24 = vld [vmem:[%s7424_s5 + $0x98] sm:$0xff]   ;;  %v5040_v40 = vld [vmem:[%s7424_s5 + $0xd0] sm:$0xff]  }
 0x382   :  { %2549 = vrot.lane.b32.xlu0 %v4539_v15, %s5097_s15  ;;  %v1903_v42 = vpop.permute.xlu1 %1902  ;;  %v2172_v46 = vor.u32 %v2171_v20, %v2168_v7  ;;  %v2182_v0 = vrot.slane %v2180_v16, 4  ;;  %v2208_v14 = vshrl.u32 %v6484_v3, 16  ;;  %v6534_v20 = vpack.c.bf16 %v6514_v25, %v6514_v25 }
 0x383   :  { %v6519_v39 = vld [vmem:[#allocation2 + $0xe0] sm:$0xff]  ;;  %1938 = vst.msk [vmem:[#allocation2 + $0x101] sm:$0xff] %vm1924_vm8, %v1903_v42  ;;  %v6530_v51 = vsel %vm5516_vm7, %v2159_v45, %v2163_v60  ;;  %v2185_v23 = vrot.slane %v2183_v26, 5  ;;  %v2191_v15 = vrot.slane %v2189_v62, 5  ;;  %v1968_v60 = vld [vmem:[#allocation2 + $0xd8] sm:$0x3]  ;;  %v6546_v48 = vpack.c.bf16 %v1966_v32, %v1966_v32 }
 0x384   :  { %7563 = vst [vmem:[#allocation35_spill] sm:$0xff] %v6519_v39  ;;  %7564 = vst [vmem:[#allocation36_spill] sm:$0xff] %v6530_v51  ;;  %v4540_v7 = vpack.c.bf16 %v6519_v39, %v6514_v25  ;;  %v4304_v5 = vcombine.low %v6491_v54, %v6530_v51  ;;  %v2173_v42 = vrot.slane %v2172_v46, 4  ;;  %v2210_v16 = vrot.slane %v2208_v14, 4  ;;  %4822 = vmatpush3.bf16.msra.mxu0 %v5038_v24  ;;  %v1970_v34 = vld [vmem:[#allocation2 + $0xe8] sm:$0x3] }
 0x385   :  { %v2186_v26 = vor.u32 %v2185_v23, %v2182_v0  ;;  %v2211_v45 = vshll.u32 %v6484_v3, 16  ;;  %v2217_v55 = vshll.u32 %v6521_v33, 16  ;;  %4823 = vmatprep.subr.bf16.mxu0 %v5040_v40  ;;  %v6555_v62 = vpack.c.bf16 %v6519_v39, %v6519_v39 }
 0x386   :  { %2551 = vrot.lane.b32.xlu0 %v4540_v7, %s5097_s15  ;;  %2497 = vrot.lane.b32.xlu1 %v4304_v5, %s5097_s15  ;;  %v1905_v37 = vpop.permute.xlu0 %1904  ;;  %v6551_v46 = vsel %vm5516_vm7, %v2173_v42, %v2177_v50  ;;  %v2222_v0 = vshrl.u32 %v6511_v29, 16  ;;  %v2225_v14 = vshll.u32 %v6511_v29, 16  ;;  %v6562_v7 = vld [vmem:[#allocation2 + $0xf0] sm:$0xff]  ;;  %v6564_v40 = vpack.c.bf16 %v1968_v60, %v1968_v60  ;;  %v5042_v5 = vld [vmem:[%s7424_s5 + $0xc8] sm:$0xff]  }
 0x387   :  { %7565 = vst [vmem:[#allocation37_spill] sm:$0xff] %v6551_v46  ;;  %1939 = vst.msk [vmem:[#allocation2 + $0x111] sm:$0xff] %vm1924_vm8, %v1905_v37  ;;  %v2187_v32 = vrot.slane %v2186_v26, 4  ;;  %v2213_v23 = vrot.slane %v2211_v45, 5  ;;  %v5041_v50 = vld [vmem:[%s7424_s5 + $0x90] sm:$0xff]   ;;  %v2219_v42 = vrot.slane %v2217_v55, 5 }
 0x388   :  { %7566 = vst [vmem:[#allocation38_spill] sm:$0xff] %v6562_v7  ;;  %v2224_v54 = vrot.slane %v2222_v0, 4  ;;  %v2227_v37 = vrot.slane %v2225_v14, 5  ;;  %v2231_v26 = vshll.u32 %v6546_v48, 16  ;;  %v2236_v60 = vshrl.u32 %v6534_v20, 16  ;;  %4824 = vmatpush3.bf16.msra.mxu0 %v5041_v50 }
 0x389   :  { %v6575_v45 = vsel %vm5516_vm7, %v2187_v32, %v2191_v15  ;;  %v2214_v24 = vor.u32 %v2213_v23, %v2210_v16  ;;  %v2239_v51 = vshll.u32 %v6534_v20, 16  ;;  %v6588_v15 = vpack.c.bf16 %v6562_v7, %v6562_v7  ;;  %v1972_v23 = vld [vmem:[#allocation2 + $0xf8] sm:$0x3]  ;;  %4825 = vmatprep.subr.bf16.mxu0 %v5042_v5 }
 0x38a   :  { %v4305_v55 = vcombine.low %v6551_v46, %v6575_v45  ;;  %v1907_v0 = vpop.permute.xlu1 %1906  ;;  %v6584_v14 = vld [vmem:[#allocation2 + $0x100] sm:$0xff]  ;;  %v2228_v16 = vor.u32 %v2227_v37, %v2224_v54  ;;  %v2233_v32 = vrot.slane %v2231_v26, 5  ;;  %v2238_v39 = vrot.slane %v2236_v60, 4 }
 0x38b   :  { %7567 = vst [vmem:[#allocation39_spill] sm:$0xff] %v6584_v14  ;;  %1940 = vst.msk [vmem:[#allocation2 + $0x121] sm:$0xff] %vm1924_vm8, %v1907_v0  ;;  %v2215_v50 = vrot.slane %v2214_v24, 4  ;;  %v4541_v4 = vpack.c.bf16 %v6584_v14, %v6562_v7  ;;  %v2245_v46 = vshll.u32 %v6564_v40, 16  ;;  %v6597_v38 = vpack.c.bf16 %v6584_v14, %v6584_v14 }
 0x38c   :  { %2499 = vrot.lane.b32.xlu1 %v4305_v55, %s5097_s15  ;;  %v2229_v18 = vrot.slane %v2228_v16, 4  ;;  %v2241_v54 = vrot.slane %v2239_v51, 5  ;;  %v6599_v37 = vpack.c.bf16 %v1970_v34, %v1970_v34  ;;  %v6606_v24 = vpack.c.bf16 %v1972_v23, %v1972_v23  ;;  %4826 = vmatpush3.bf16.msra.mxu0 %v5043_v2  ;;  %v5044_v55 = vld [vmem:[%s7424_s5 + $0xc0] sm:$0xff]  }
 0x38d   :  { %v6603_v5 = vsel %vm5516_vm7, %v2215_v50, %v2219_v42  ;;  %2553 = vrot.lane.b32.xlu0 %v4541_v4, %s5097_s15  ;;  %v2250_v26 = vshrl.u32 %v6555_v62, 16  ;;  %v2253_v60 = vshll.u32 %v6555_v62, 16  ;;  %v5045_v34 = vld [vmem:[%s7424_s5 + $0x80] sm:$0xff]   ;;  %v7569_v4 = vsel %vm5516_vm7, %v6319_v41, %v6315_v9  ;;  %4827 = vmatprep.subr.bf16.mxu0 %v5044_v55 }
 0x38e   :  { %7568 = vst [vmem:[#allocation40_spill] sm:$0xff] %v6603_v5  ;;  %v4306_v51 = vcombine.low %v7569_v4, %v6603_v5  ;;  %v6624_v42 = vsel %vm5516_vm7, %v2229_v18, %v2233_v32  ;;  %v2242_v2 = vor.u32 %v2241_v54, %v2238_v39  ;;  %v2259_v0 = vshll.u32 %v6599_v37, 16  ;;  %v6630_v7 = vld [vmem:[#allocation2 + $0x110] sm:$0xff] }
 0x38f   :  { %7570 = vst [vmem:[#allocation41_spill] sm:$0xff] %v6624_v42  ;;  %v2252_v23 = vrot.slane %v2250_v26, 4  ;;  %v2255_v50 = vrot.slane %v2253_v60, 5  ;;  %v2264_v14 = vshrl.u32 %v6588_v15, 16  ;;  %7571 = vst [vmem:[#allocation42_spill] sm:$0xff] %v6630_v7  ;;  %v2247_v41 = vrot.slane %v2245_v46, 5 }
 0x390   :  { %2501 = vrot.lane.b32.xlu1 %v4306_v51, %s5097_s15  ;;  %v2243_v9 = vrot.slane %v2242_v2, 4  ;;  %v2267_v18 = vshll.u32 %v6588_v15, 16  ;;  %v2273_v39 = vshll.u32 %v6606_v24, 16  ;;  %v2261_v54 = vrot.slane %v2259_v0, 5  ;;  %v1974_v26 = vld [vmem:[#allocation2 + $0x108] sm:$0x3]  ;;  %4828 = vmatpush3.bf16.msra.mxu0 %v5045_v34 }
 0x391   :  { %v2256_v32 = vor.u32 %v2255_v50, %v2252_v23  ;;  %v2266_v4 = vrot.slane %v2264_v14, 4  ;;  %v4268_v16 = vrot.slane %v6361_v56, 9  ;;  %v6644_v46 = vpack.c.bf16 %v6630_v7, %v6630_v7  ;;  %v1976_v2 = vld [vmem:[#allocation2 + $0x118] sm:$0x3] }
 0x392   :  { %v6638_v60 = vsel %vm5516_vm7, %v2243_v9, %v2247_v41  ;;  %v2269_v55 = vrot.slane %v2267_v18, 5  ;;  %v6640_v5 = vld [vmem:[#allocation2 + $0x120] sm:$0xff]  ;;  %v2315_v51 = vrot.slane %v6370_v1, 5  ;;  %v2275_v0 = vrot.slane %v2273_v39, 5 }
 0x393   :  { %7572 = vst [vmem:[#allocation43_spill] sm:$0xff] %v6638_v60  ;;  %v4307_v14 = vcombine.low %v6624_v42, %v6638_v60  ;;  %v2257_v56 = vrot.slane %v2256_v32, 4  ;;  %v4542_v34 = vpack.c.bf16 %v6640_v5, %v6630_v7  ;;  %v6655_v41 = vpack.c.bf16 %v1974_v26, %v1974_v26 }
 0x394   :  { %v2270_v23 = vor.u32 %v2269_v55, %v2266_v4  ;;  %v2316_v50 = vsel %vm5370_vm4, %v4268_v16, %v2315_v51  ;;  %v6664_v39 = vpack.c.bf16 %v1976_v2, %v1976_v2  ;;  %v2278_v32 = vshrl.u32 %v6597_v38, 16 }
 0x395   :  { %2503 = vrot.lane.b32.xlu1 %v4307_v14, %s5097_s15  ;;  %v6660_v1 = vsel %vm5516_vm7, %v2257_v56, %v2261_v54  ;;  %2555 = vrot.lane.b32.xlu0 %v4542_v34, %s5097_s15  ;;  %v4334_v18 = vcombine.low %v6402_v28, %v2316_v50  ;;  %v2281_v26 = vshll.u32 %v6597_v38, 16  ;;  %v2287_v55 = vshll.u32 %v6655_v41, 16 }
 0x396   :  { %v2271_v16 = vrot.slane %v2270_v23, 4  ;;  %v2280_v51 = vrot.slane %v2278_v32, 4  ;;  %v2292_v54 = vshrl.u32 %v6644_v46, 16  ;;  %v2295_v14 = vshll.u32 %v6644_v46, 16 }
 0x397   :  { %v2301_v56 = vshll.u32 %v6664_v39, 16  ;;  %v2283_v34 = vrot.slane %v2281_v26, 5  ;;  %v2289_v23 = vrot.slane %v2287_v55, 5  ;;  %v4271_v9 = vrot.slane %v6409_v13, 9 }
 0x398   :  { %v6676_v2 = vsel %vm5516_vm7, %v2271_v16, %v2275_v0  ;;  %v2294_v32 = vrot.slane %v2292_v54, 4  ;;  %v2297_v60 = vrot.slane %v2295_v14, 5  ;;  %v2327_v21 = vrot.slane %v6434_v11, 5 }
 0x399   :  { %v4308_v4 = vcombine.low %v6660_v1, %v6676_v2  ;;  %2577 = vrot.lane.b32.xlu0 %v4334_v18, %s5097_s15  ;;  %v2303_v42 = vrot.slane %v2301_v56, 5  ;;  %v2284_v28 = vor.u32 %v2283_v34, %v2280_v51  ;;  %v4272_v7 = vrot.slane %v6438_v10, 9 }
 0x39a   :  { %v2331_v0 = vrot.slane %v6463_v35, 5  ;;  %v2298_v16 = vor.u32 %v2297_v60, %v2294_v32  ;;  %v4269_v13 = vrot.slane %v6365_v6, 9  ;;  %v2319_v26 = vrot.slane %v6372_v63, 5 }
 0x39b   :  { %2505 = vrot.lane.b32.xlu1 %v4308_v4, %s5097_s15  ;;  %v4270_v55 = vrot.slane %v6398_v49, 9  ;;  %v2285_v18 = vrot.slane %v2284_v28, 4  ;;  %v2328_v54 = vsel %vm5370_vm4, %v4271_v9, %v2327_v21  ;;  %v2323_v10 = vrot.slane %v6412_v19, 5  ;;  %v1958_v4 = vld [vmem:[#allocation2 + $0x88] sm:$0x3] }
 0x39c   :  { %v2332_v11 = vsel %vm5370_vm4, %v4272_v7, %v2331_v0  ;;  %v2299_v51 = vrot.slane %v2298_v16, 4  ;;  %v2320_v60 = vsel %vm5370_vm4, %v4269_v13, %v2319_v26  ;;  %v4273_v6 = vrot.slane %v6459_v57, 9 }
 0x39d   :  { %v4336_v35 = vcombine.low %v2328_v54, %v2332_v11  ;;  %v6699_v63 = vsel %vm5516_vm7, %v2285_v18, %v2289_v23  ;;  %v2324_v21 = vsel %vm5370_vm4, %v4270_v55, %v2323_v10  ;;  %v6703_v49 = vcombine.low %v2316_v50, %v2320_v60 }
 0x39e   :  { %v2335_v28 = vrot.slane %v6486_v61, 5  ;;  %v6708_v19 = vpack.c.bf16 %v6640_v5, %v6640_v5  ;;  %v6712_v7 = vsel %vm5516_vm7, %v2299_v51, %v2303_v42  ;;  %v4332_v57 = vcombine.low %v6676_v2, %v6699_v63  ;;  %v7603_v2 = vld [vmem:[#allocation6_spill] sm:$0xff] }
 0x39f   :  { %2581 = vrot.lane.b32.xlu0 %v4336_v35, %s5097_s15  ;;  %v6717_v9 = vcombine.low %v2324_v21, %v2328_v54  ;;  %v4309_v50 = vcombine.low %v6699_v63, %v6712_v7  ;;  %v4520_v14 = vpack.c.bf16 %v1958_v4, %v1958_v4  ;;  %v4286_v56 = vrot.slane %v6479_v58, 9  ;;  %v1978_v35 = vld [vmem:[#allocation2 + $0x128] sm:$0x3]  ;;  %v7604_v63 = vld [vmem:[#allocation17_spill] sm:$0xff] }
 0x3a0   :  { %v2336_v61 = vsel %vm5370_vm4, %v4273_v6, %v2335_v28  ;;  %v2380_v42 = vshrl.u32 %v6479_v58, 16  ;;  %v2383_v23 = vshll.u32 %v6479_v58, 16  ;;  %v4277_v32 = vrot.slane %v6534_v20, 9 }
 0x3a1   :  { %v6724_v34 = vcombine.low %v2332_v11, %v2336_v61  ;;  %2507 = vrot.lane.b32.xlu1 %v4309_v50, %s5097_s15  ;;  %v2409_v0 = vrot.slane %v4520_v14, 5  ;;  %v2389_v16 = vshll.u32 %v4520_v14, 16  ;;  %v2351_v13 = vrot.slane %v6564_v40, 5 }
 0x3a2   :  { %v4278_v26 = vrot.slane %v6555_v62, 9  ;;  %v2382_v55 = vrot.slane %v2380_v42, 4  ;;  %v2385_v18 = vrot.slane %v2383_v23, 5  ;;  %v2355_v54 = vrot.slane %v6599_v37, 5 }
 0x3a3   :  { %v4275_v11 = vrot.slane %v6484_v3, 9  ;;  %v4335_v10 = vcombine.low %v2320_v60, %v2324_v21  ;;  %v6736_v58 = vsel %vm5370_vm4, %v4286_v56, %v2409_v0  ;;  %v2391_v20 = vrot.slane %v2389_v16, 5 }
 0x3a4   :  { %v2343_v51 = vrot.slane %v6521_v33, 5  ;;  %v4337_v4 = vcombine.low %v2336_v61, %v6736_v58  ;;  %v4346_v62 = vcombine.low %v6736_v58, %v6236_v12  ;;  %v2386_v40 = vor.u32 %v2385_v18, %v2382_v55 }
 0x3a5   :  { %v2352_v37 = vsel %vm5370_vm4, %v4277_v32, %v2351_v13  ;;  %2579 = vrot.lane.b32.xlu1 %v4335_v10, %s5097_s15  ;;  %v2356_v3 = vsel %vm5370_vm4, %v4278_v26, %v2355_v54  ;;  %v4276_v33 = vrot.slane %v6511_v29, 9  ;;  %v2347_v6 = vrot.slane %v6546_v48, 5 }
 0x3a6   :  { %v6749_v60 = vsel %vm5370_vm4, %v4275_v11, %v2343_v51  ;;  %2583 = vrot.lane.b32.xlu0 %v4337_v4, %s5097_s15  ;;  %v2387_v21 = vrot.slane %v2386_v40, 4  ;;  %v4522_v50 = vpack.c.bf16 %v1978_v35, %v1978_v35  ;;  %v2394_v61 = vshrl.u32 %v6708_v19, 16 }
 0x3a7   :  { %v4314_v28 = vcombine.low %v6241_v31, %v6749_v60  ;;  %v2348_v14 = vsel %vm5370_vm4, %v4276_v33, %v2347_v6  ;;  %v2397_v56 = vshll.u32 %v6708_v19, 16  ;;  %v4279_v42 = vrot.slane %v6588_v15, 9 }
 0x3a8   :  { %v2359_v29 = vrot.slane %v6606_v24, 5  ;;  %v6764_v48 = vsel %vm5516_vm7, %v2387_v21, %v2391_v20  ;;  %v4339_v23 = vcombine.low %v2352_v37, %v2356_v3  ;;  %v6766_v32 = vcombine.low %v2348_v14, %v2352_v37  ;;  %v7578_v21 = vld [vmem:[#allocation38_spill] sm:$0xff] }
 0x3a9   :  { %v2396_v0 = vrot.slane %v2394_v61, 4  ;;  %v4329_v16 = vcombine.low %v6575_v45, %v6764_v48  ;;  %v7573_v13 = vsel %vm5516_vm7, %v6321_v43, %v6323_v27  ;;  %v2399_v26 = vrot.slane %v2397_v56, 5  ;;  %v7580_v56 = vld [vmem:[#allocation42_spill] sm:$0xff] }
 0x3aa   :  { %v4344_v15 = vcombine.low %v6764_v48, %v7573_v13  ;;  %v2403_v24 = vshll.u32 %v4522_v50, 16  ;;  %2587 = vrot.lane.b32.xlu0 %v4339_v23, %s5097_s15  ;;  %v2360_v55 = vsel %vm5370_vm4, %v4279_v42, %v2359_v29  ;;  %v4280_v18 = vrot.slane %v6597_v38, 9  ;;  %v5050_v29 = vld [vmem:[%s7427_s8 + $0x14] ss:$8 sps:$4 sm:$0xff]   ;;  %v5057_v45 = vld [vmem:[%s7426_s7] ss:$8 sps:$4 sm:$0xff]  }
 0x3ab   :  { %v2363_v54 = vrot.slane %v6655_v41, 5  ;;  %v4281_v11 = vrot.slane %v6644_v46, 9  ;;  %v4338_v10 = vcombine.low %v6749_v60, %v2348_v14  ;;  %v2400_v43 = vor.u32 %v2399_v26, %v2396_v0  ;;  %v7579_v14 = vld [vmem:[#allocation39_spill] sm:$0xff]  ;;  %3411 = vmatprep.subr.bf16.mxu0 %v5050_v29  ;;  %v7581_v0 = vld [vmem:[#allocation28_spill] sm:$0xff]  ;;  %v7599_v48 = vld [vmem:[#allocation41_spill] sm:$0xff] }
 0x3ac   :  { %2599 = vrot.lane.b32.xlu1 %v4344_v15, %s5097_s15  ;;  %v6784_v27 = vcombine.low %v2356_v3, %v2360_v55  ;;  %v2367_v20 = vrot.slane %v6664_v39, 5  ;;  %v2405_v51 = vrot.slane %v2403_v24, 5  ;;  %v4287_v35 = vrot.slane %v6708_v19, 9  ;;  %v7582_v13 = vld [vmem:[#allocation32_spill] sm:$0xff]  ;;  %v5056_v60 = vld [vmem:[%s7427_s8 + $0x4] ss:$8 sps:$4 sm:$0xff]  }
 0x3ad   :  { %v2413_v4 = vrot.slane %v4522_v50, 5  ;;  %v4528_v38 = vpack.c.bf16 %v6344_v17, %v6342_v44  ;;  %v2401_v40 = vrot.slane %v2400_v43, 4  ;;  %v2364_v46 = vsel %vm5370_vm4, %v4280_v18, %v2363_v54  ;;  %v7585_v18 = vld [vmem:[#allocation29_spill] sm:$0xff]  ;;  %v5039_v43 = vld [vmem:[%s7424_s5 + $0x110] sm:$0xff]  }
 0x3ae   :  { %v2368_v41 = vsel %vm5370_vm4, %v4281_v11, %v2367_v20  ;;  %v4529_v37 = vpack.c.bf16 %v6384_v22, %v6382_v47  ;;  %v4530_v19 = vpack.c.bf16 %v6432_v53, %v6418_v30  ;;  %v4532_v47 = vpack.c.bf16 %v6514_v25, %v6493_v8  ;;  %v7575_v22 = vld [vmem:[#allocation18_spill] sm:$0xff]  ;;  %v7577_v53 = vld [vmem:[#allocation35_spill] sm:$0xff] }
 0x3af   :  { %v6798_v39 = vsel %vm5370_vm4, %v4287_v35, %v2413_v4  ;;  %v6800_v3 = vcombine.low %v2364_v46, %v2368_v41  ;;  %v6807_v44 = vsel %vm5516_vm7, %v2401_v40, %v2405_v51  ;;  %v7576_v33 = vsel %vm5516_vm7, %v7574_v36, %v7575_v22  ;;  %v7586_v35 = vld [vmem:[#allocation20_spill] sm:$0xff]  ;;  %v5046_v4 = vld [vmem:[%s7424_s5 + $0x108] sm:$0xff]   ;;  %v5047_v36 = vld [vmem:[%s7424_s5 + $0x100] sm:$0xff]  }
 0x3b0   :  { %2585 = vrot.lane.b32.xlu1 %v4338_v10, %s5097_s15  ;;  %v4347_v17 = vcombine.low %v6798_v39, %v6248_v59  ;;  %v4345_v6 = vcombine.low %v6807_v44, %v7576_v33  ;;  %v4333_v30 = vcombine.low %v6712_v7, %v6807_v44  ;;  %v4533_v50 = vpack.c.bf16 %v7578_v21, %v7577_v53  ;;  %v5060_v59 = vld [vmem:[%s7428_s9 + $0x10] ss:$8 sps:$4 sm:$0xff]   ;;  %v5063_v44 = vld [vmem:[%s7428_s9] ss:$8 sps:$4 sm:$0xff]  }
 0x3b1   :  { %v4340_v61 = vcombine.low %v2360_v55, %v2364_v46  ;;  %v4534_v42 = vpack.c.bf16 %v7580_v56, %v7579_v14  ;;  %v4341_v52 = vcombine.low %v2368_v41, %v6798_v39  ;;  %v7583_v15 = vcombine.low %v7581_v0, %v7582_v13  ;;  %v7584_v55 = vld [vmem:[#allocation25_spill] sm:$0xff]  ;;  %v5059_v14 = vld [vmem:[%s7426_s7 + $0x4] ss:$8 sps:$4 sm:$0xff]   ;;  %v7605_v7 = vld [vmem:[#allocation8_spill] sm:$0xff] }
 0x3b2   :  { %2601 = vrot.lane.b32.xlu0 %v4345_v6, %s5097_s15  ;;  %v4527_v54 = vpack.c.bf16 %v7585_v18, %v7584_v55  ;;  %v5053_v6 = vld [vmem:[%s7426_s7 + $0x14] ss:$8 sps:$4 sm:$0xff]   ;;  %v5070_v55 = vld [vmem:[#allocation2 + $0xa0] sm:$0xff]  ;;  %v7587_v18 = vld [vmem:[#allocation31_spill] sm:$0xff] }
 0x3b3   :  { %v7607_v39 = vld [vmem:[#allocation10_spill] sm:$0xff] }
 0x3b4   :  { %2589 = vrot.lane.b32.xlu1 %v4340_v61, %s5097_s15 }
 0x3b8   :  { %2591 = vrot.lane.b32.xlu1 %v4341_v52, %s5097_s15 }
 0x3e3   :  { %v2542_v23 = vpop.permute.xlu0 %2541 }
 0x3e4   :  { %v2641_v26 = vsel %vm44_vm0, %v7583_v15, %v2542_v23 }
 0x3e5   :  { %3056 = vmatprep.mubr.bf16.mxu1 %v2641_v26 }
 0x3e8   :  { %v2544_v24 = vpop.permute.xlu0 %2543 }
 0x3e9   :  { %v2645_v51 = vsel %vm44_vm0, %v6703_v49, %v2544_v24 }
 0x3eb   :  { %v2494_v11 = vpop.permute.xlu1 %2493 }
 0x3ec   :  { %v2546_v10 = vpop.permute.xlu0 %2545  ;;  %v2609_v20 = vsel %vm44_vm0, %v4527_v54, %v2494_v11  ;;  %v4531_v54 = vpack.c.bf16 %v7587_v18, %v5070_v55 }
 0x3ed   :  { %3057 = vmatmul.mubr.bf16.vlgmr.msra.gmra.mxu1 %v2609_v20  ;;  %v2649_v22 = vsel %vm44_vm0, %v6717_v9, %v2546_v10  ;;  %v5048_v10 = vld [vmem:[%s7427_s8 + $0x10] ss:$8 sps:$4 sm:$0xff]   ;;  %v7589_v20 = vld [vmem:[#allocation23_spill] sm:$0xff] }
 0x3ee   :  { %4914 = vmatpush3.bf16.msra.mxu1 %v7586_v35  ;;  %3064 = vmatprep.mubr.bf16.mxu1 %v2645_v51  ;;  %v5054_v35 = vld [vmem:[%s7427_s8] ss:$8 sps:$4 sm:$0xff]  }
 0x3ef   :  { %4915 = vmatprep.subr.bf16.mxu1 %v5039_v43 }
 0x3f0   :  { %v2496_v40 = vpop.permute.xlu1 %2495  ;;  %v2548_v46 = vpop.permute.xlu0 %2547 }
 0x3f1   :  { %v2613_v41 = vsel %vm44_vm0, %v4528_v38, %v2496_v40  ;;  %v2653_v29 = vsel %vm44_vm0, %v6724_v34, %v2548_v46 }
 0x3f2   :  { %3153 = vmatprep.mubr.bf16.mxu0 %v2613_v41  ;;  %4916 = vmatpush3.bf16.msra.mxu1 %v5039_v43  ;;  %v7588_v43 = vld [vmem:[#allocation24_spill] sm:$0xff] }
 0x3f3   :  { %4917 = vmatprep.subr.bf16.mxu1 %v5046_v4 }
 0x3f4   :  { %v2550_v33 = vpop.permute.xlu0 %2549 }
 0x3f5   :  { %3065 = vmatmul.mubr.bf16.gmra.mxu1 %v2613_v41  ;;  %v2657_v26 = vsel %vm44_vm0, %v4314_v28, %v2550_v33  ;;  %v7592_v33 = vld [vmem:[#allocation33_spill] sm:$0xff] }
 0x3f6   :  { %3072 = vmatprep.mubr.bf16.mxu1 %v2649_v22  ;;  %4918 = vmatpush3.bf16.msra.mxu1 %v5046_v4  ;;  %v7591_v22 = vld [vmem:[#allocation34_spill] sm:$0xff] }
 0x3f7   :  { %4919 = vmatprep.subr.bf16.mxu1 %v5047_v36 }
 0x3f8   :  { %v2498_v38 = vpop.permute.xlu1 %2497  ;;  %v2552_v52 = vpop.permute.xlu0 %2551 }
 0x3f9   :  { %v2617_v61 = vsel %vm44_vm0, %v4529_v37, %v2498_v38  ;;  %v2661_v28 = vsel %vm44_vm0, %v6766_v32, %v2552_v52  ;;  %v5071_v52 = vld [vmem:[#allocation2 + $0x90] sm:$0xff] }
 0x3fa   :  { %4920 = vmatpush3.bf16.msra.mxu1 %v5047_v36 }
 0x3fb   :  { %3568 = vmatprep.subr.bf16.mxu1 %v5053_v6  ;;  %v7593_v6 = vcombine.low %v7591_v22, %v7592_v33 }
 0x3fd   :  { %3073 = vmatmul.mubr.bf16.gmra.mxu1 %v2617_v61 }
 0x3fe   :  { %v2500_v23 = vpop.permute.xlu1 %2499  ;;  %3080 = vmatprep.mubr.bf16.mxu1 %v2653_v29  ;;  %v7594_v29 = vld [vmem:[#allocation26_spill] sm:$0xff] }
 0x3ff   :  { %v2554_v0 = vpop.permute.xlu0 %2553  ;;  %v2621_v15 = vsel %vm44_vm0, %v4530_v19, %v2500_v23  ;;  %v7590_v19 = vcombine.low %v7588_v43, %v7589_v20  ;;  %v4543_v23 = vpack.c.bf16 %v5071_v52, %v7594_v29  ;;  %v7610_v43 = vld [vmem:[#allocation19_spill] sm:$0xff] }
 0x400   :  { %v2665_v41 = vsel %vm44_vm0, %v6784_v27, %v2554_v0  ;;  %v7595_v0 = vld [vmem:[#allocation36_spill] sm:$0xff]  ;;  %v7611_v20 = vld [vmem:[#allocation7_spill] sm:$0xff] }
 0x402   :  { %v2502_v13 = vpop.permute.xlu1 %2501 }
 0x403   :  { %v2625_v31 = vsel %vm44_vm0, %v4531_v54, %v2502_v13  ;;  %v7596_v13 = vld [vmem:[#allocation37_spill] sm:$0xff] }
 0x404   :  { %v5062_v54 = vld [vmem:[%s7428_s9 + $0x14] ss:$8 sps:$4 sm:$0xff]  }
 0x405   :  { %3081 = vmatmul.mubr.bf16.gmra.mxu1 %v2621_v15 }
 0x406   :  { %3088 = vmatprep.mubr.bf16.mxu1 %v2657_v26  ;;  %v7597_v26 = vcombine.low %v7595_v0, %v7596_v13 }
 0x407   :  { %v2556_v24 = vpop.permute.xlu0 %2555  ;;  %v2504_v37 = vpop.permute.xlu1 %2503 }
 0x408   :  { %v2629_v46 = vsel %vm44_vm0, %v4532_v47, %v2504_v37  ;;  %v2669_v25 = vsel %vm44_vm0, %v6800_v3, %v2556_v24  ;;  %v5051_v37 = vld [vmem:[%s7426_s7 + $0x10] ss:$8 sps:$4 sm:$0xff]  }
 0x40b   :  { %v2578_v11 = vpop.permute.xlu0 %2577 }
 0x40c   :  { %v2673_v51 = vsel %vm44_vm0, %v7590_v19, %v2578_v11  ;;  %v7612_v19 = vld [vmem:[#allocation22_spill] sm:$0xff] }
 0x40d   :  { %3154 = vmatmul.mubr.bf16.vlgmr.msra.gmra.mxu0 %v2673_v51  ;;  %3089 = vmatmul.mubr.bf16.gmra.mxu1 %v2625_v31  ;;  %v2506_v4 = vpop.permute.xlu1 %2505  ;;  %v7613_v51 = vld [vmem:[#allocation9_spill] sm:$0xff]  ;;  %v7614_v31 = vld [vmem:[#allocation14_spill] sm:$0xff] }
 0x40e   :  { %3161 = vmatprep.mubr.bf16.mxu0 %v2617_v61  ;;  %3096 = vmatprep.mubr.bf16.mxu1 %v2661_v28  ;;  %v2633_v8 = vsel %vm44_vm0, %v4533_v50, %v2506_v4  ;;  %v7616_v28 = vld [vmem:[#allocation16_spill] sm:$0xff]  ;;  %v7618_v4 = vld [vmem:[#allocation27_spill] sm:$0xff] }
 0x40f   :  { %3412 = vmatpush1.bf16.msra.mxu0 %v5048_v10  ;;  %v7609_v10 = vld [vmem:[#allocation12_spill] sm:$0xff] }
 0x410   :  { %3413 = vmatprep.subr.bf16.mxu0 %v5056_v60  ;;  %v7615_v60 = vld [vmem:[#allocation11_spill] sm:$0xff] }
 0x411   :  { %v2582_v47 = vpop.permute.xlu0 %2581 }
 0x413   :  { %3414 = vmatpush1.bf16.msra.mxu0 %v5054_v35  ;;  %v2508_v40 = vpop.permute.xlu1 %2507  ;;  %v7617_v35 = vld [vmem:[#allocation13_spill] sm:$0xff] }
 0x414   :  { %v2637_v21 = vsel %vm44_vm0, %v4534_v42, %v2508_v40  ;;  %3737 = vmatprep.subr.bf16.mxu0 %v5062_v54 }
 0x415   :  { %3097 = vmatmul.mubr.bf16.gmra.mxu1 %v2629_v46 }
 0x416   :  { %3104 = vmatprep.mubr.bf16.mxu1 %v2665_v41 }
 0x417   :  { %v2580_v36 = vpop.permute.xlu1 %2579 }
 0x418   :  { %v2677_v38 = vsel %vm44_vm0, %v7593_v6, %v2580_v36  ;;  %v2584_v50 = vpop.permute.xlu0 %2583 }
 0x419   :  { %3162 = vmatmul.mubr.bf16.gmra.mxu0 %v2677_v38  ;;  %v2685_v24 = vsel %vm44_vm0, %v4329_v16, %v2584_v50 }
 0x41a   :  { %3169 = vmatprep.mubr.bf16.mxu0 %v2621_v15  ;;  %v2681_v15 = vsel %vm44_vm0, %v7597_v26, %v2582_v47 }
 0x41d   :  { %3105 = vmatmul.mubr.bf16.gmra.mxu1 %v2633_v8 }
 0x41e   :  { %3112 = vmatprep.mubr.bf16.mxu1 %v2669_v25  ;;  %v2600_v61 = vpop.permute.xlu1 %2599 }
 0x41f   :  { %v2705_v53 = vsel %vm44_vm0, %v4543_v23, %v2600_v61 }
 0x421   :  { %3170 = vmatmul.mubr.bf16.gmra.mxu0 %v2681_v15 }
 0x422   :  { %3177 = vmatprep.mubr.bf16.mxu0 %v2705_v53  ;;  %v2586_v56 = vpop.permute.xlu1 %2585 }
 0x425   :  { %3113 = vmatmul.mubr.bf16.gmra.mxu1 %v2637_v21 }
 0x426   :  { %4921 = vmatprep.mubr.msk.bf16.mxu1 %vm44_vm0, %v6703_v49  ;;  %v7598_v49 = vld [vmem:[#allocation40_spill] sm:$0xff]  ;;  %v2590_v12 = vpop.permute.xlu1 %2589 }
 0x427   :  { %v7600_v16 = vcombine.low %v7598_v49, %v7599_v48 }
 0x429   :  { %3178 = vmatmul.mubr.bf16.gmra.mxu0 %v2685_v24  ;;  %v2689_v42 = vsel %vm44_vm0, %v7600_v16, %v2586_v56 }
 0x42a   :  { %3185 = vmatprep.mubr.bf16.mxu0 %v2629_v46 }
 0x42d   :  { %4922 = vmatmul.mubr.msk.bf16.vlgmr.msra.gmra.mxu1 %vm44_vm0, %v6717_v9  ;;  %v2588_v9 = vpop.permute.xlu0 %2587 }
 0x42e   :  { %4925 = vmatprep.mubr.msk.bf16.mxu1 %vm44_vm0, %v6724_v34  ;;  %3569 = vmatpush1.bf16.msra.mxu1 %v5051_v37  ;;  %v7601_v34 = vld [vmem:[#allocation43_spill] sm:$0xff] }
 0x42f   :  { %3570 = vmatprep.subr.bf16.mxu1 %v5059_v14  ;;  %v7602_v55 = vcombine.low %v7601_v34, %v6660_v1 }
 0x431   :  { %3186 = vmatmul.mubr.bf16.gmra.mxu0 %v2689_v42  ;;  %v2693_v18 = vsel %vm44_vm0, %v7602_v55, %v2588_v9  ;;  %v2602_v58 = vpop.permute.xlu0 %2601 }
 0x432   :  { %3571 = vmatpush1.bf16.msra.mxu1 %v5057_v45  ;;  %3193 = vmatprep.mubr.bf16.mxu0 %v2633_v8 }
 0x435   :  { %4926 = vmatmul.mubr.msk.bf16.gmra.mxu1 %vm44_vm0, %v4346_v62  ;;  %v5072_v62 = vld [vmem:[#allocation2 + $0x130] sm:$0xff] }
 0x436   :  { %4929 = vmatprep.mubr.msk.bf16.mxu1 %vm44_vm0, %v6766_v32  ;;  %v4544_v1 = vpack.c.bf16 %v5072_v62, %v6640_v5  ;;  %v2697_v32 = vsel %vm44_vm0, %v4332_v57, %v2590_v12  ;;  %v7606_v57 = vld [vmem:[#allocation15_spill] sm:$0xff] }
 0x438   :  { %v2709_v11 = vsel %vm44_vm0, %v4544_v1, %v2602_v58 }
 0x439   :  { %3194 = vmatmul.mubr.bf16.gmra.mxu0 %v2693_v18 }
 0x43a   :  { %3201 = vmatprep.mubr.bf16.mxu0 %v2637_v21 }
 0x43d   :  { %4930 = vmatmul.mubr.msk.bf16.gmra.mxu1 %vm44_vm0, %v6784_v27  ;;  %v2592_v27 = vpop.permute.xlu1 %2591 }
 0x43e   :  { %4933 = vmatprep.mubr.msk.bf16.mxu1 %vm44_vm0, %v6800_v3  ;;  %v5098_v3 = vmov 0   ;;  %v2701_v5 = vsel %vm44_vm0, %v4333_v30, %v2592_v27  ;;  %v7608_v30 = vld [vmem:[#allocation21_spill] sm:$0xff] }
 0x441   :  { %3202 = vmatmul.mubr.bf16.gmra.mxu0 %v2697_v32 }
 0x442   :  { %3209 = vmatprep.mubr.bf16.mxu0 %v2709_v11 }
 0x445   :  { %4934 = vmatmul.mubr.msk.bf16.gmra.mxu1 %vm44_vm0, %v4347_v17  ;;  %v5065_v17 = vld [vmem:[%s7428_s9 + $0x4] ss:$8 sps:$4 sm:$0xff]  }
 0x446   :  { %3588 = vmatprep.mubr.bf16.mxu1 %v5098_v3 }
 0x449   :  { %3210 = vmatmul.mubr.bf16.gmra.mxu0 %v2701_v5 }
 0x44a   :  { %3431 = vmatprep.mubr.bf16.mxu0 %v5098_v3 }
 0x44d   :  { %4409 = vmatmul.mubr.msk.bf16.vlgmr.msra.gmra.mxu1 %vm1924_vm8, %v7603_v2 }
 0x44e   :  { %3598 = vmatprep.mubr.bf16.mxu1 %v5098_v3 }
 0x451   :  { %4397 = vmatmul.mubr.msk.bf16.vlgmr.msra.gmra.mxu0 %vm1924_vm8, %v7604_v63 }
 0x452   :  { %3441 = vmatprep.mubr.bf16.mxu0 %v5098_v3  ;;  %3738 = vmatpush1.bf16.msra.mxu0 %v5060_v59  ;;  %v7071_v59 = vld [vmem:[%s7425_s6] ss:$0 sm:$0xff] }
 0x453   :  { %3739 = vmatprep.subr.bf16.mxu0 %v5065_v17 }
 0x455   :  { %4410 = vmatmul.mubr.msk.bf16.gmra.mxu1 %vm1924_vm8, %v7605_v7 }
 0x456   :  { %3608 = vmatprep.mubr.bf16.mxu1 %v5098_v3  ;;  %3740 = vmatpush1.bf16.msra.mxu0 %v5063_v44 }
 0x459   :  { %4398 = vmatmul.mubr.msk.bf16.gmra.mxu0 %vm1924_vm8, %v7606_v57 }
 0x45a   :  { %3451 = vmatprep.mubr.bf16.mxu0 %v5098_v3 }
 0x45d   :  { %4411 = vmatmul.mubr.msk.bf16.gmra.mxu1 %vm1924_vm8, %v7607_v39 }
 0x45e   :  { %3618 = vmatprep.mubr.bf16.mxu1 %v5098_v3 }
 0x461   :  { %4399 = vmatmul.mubr.msk.bf16.gmra.mxu0 %vm1924_vm8, %v7608_v30 }
 0x462   :  { %3461 = vmatprep.mubr.bf16.mxu0 %v5098_v3 }
 0x465   :  { %4412 = vmatmul.mubr.msk.bf16.gmra.mxu1 %vm1924_vm8, %v7609_v10 }
 0x466   :  { %3628 = vmatprep.mubr.bf16.mxu1 %v5098_v3 }
 0x469   :  { %4400 = vmatmul.mubr.msk.bf16.gmra.mxu0 %vm1924_vm8, %v7610_v43 }
 0x46a   :  { %3471 = vmatprep.mubr.bf16.mxu0 %v5098_v3 }
 0x46d   :  { %4413 = vmatmul.mubr.msk.bf16.gmra.mxu1 %vm1924_vm8, %v7611_v20 }
 0x46e   :  { %3638 = vmatprep.mubr.bf16.mxu1 %v5098_v3 }
 0x471   :  { %4401 = vmatmul.mubr.msk.bf16.gmra.mxu0 %vm1924_vm8, %v7612_v19 }
 0x472   :  { %3481 = vmatprep.mubr.bf16.mxu0 %v5098_v3 }
 0x475   :  { %4414 = vmatmul.mubr.msk.bf16.gmra.mxu1 %vm1924_vm8, %v7613_v51 }
 0x476   :  { %3648 = vmatprep.mubr.bf16.mxu1 %v5098_v3 }
 0x479   :  { %4402 = vmatmul.mubr.msk.bf16.gmra.mxu0 %vm1924_vm8, %v7614_v31 }
 0x47a   :  { %3491 = vmatprep.mubr.bf16.mxu0 %v5098_v3 }
 0x47d   :  { %4415 = vmatmul.mubr.msk.bf16.gmra.mxu1 %vm1924_vm8, %v7615_v60 }
 0x47e   :  { %3658 = vmatprep.mubr.bf16.mxu1 %v5098_v3 }
 0x481   :  { %4403 = vmatmul.mubr.msk.bf16.gmra.mxu0 %vm1924_vm8, %v7616_v28 }
 0x482   :  { %3501 = vmatprep.mubr.bf16.mxu0 %v5098_v3 }
 0x485   :  { %4416 = vmatmul.mubr.msk.bf16.gmra.mxu1 %vm1924_vm8, %v7617_v35 }
 0x489   :  { %4404 = vmatmul.mubr.msk.bf16.gmra.mxu0 %vm1924_vm8, %v7618_v4 }
 0x48a   :  { %3757 = vmatprep.mubr.bf16.mxu0 %v5098_v3 }
 0x4ad   :  { %v4765_v40 = vpop.f32.mrf.mxu1 }
 0x4af   :  { %v4766_v46 = vpop.f32.mrf.mxu1 }
 0x4b0   :  { %v4767_v5 = vadd.f32 %v4766_v46, %v4765_v40 }
 0x4b1   :  { %v4768_v41 = vpop.f32.mrf.mxu1 }
 0x4b2   :  { %v3059_v17 = vadd.f32 %v4767_v5, %v7071_v59 }
 0x4b3   :  { %v4769_v36 = vpop.f32.mrf.mxu1 }
 0x4b4   :  { %v4770_v7 = vadd.f32 %v4769_v36, %v4768_v41 }
 0x4b5   :  { %v4771_v22 = vpop.f32.mrf.mxu1 }
 0x4b6   :  { %v3062_v20 = vadd.f32 %v4770_v7, %v7071_v59 }
 0x4b7   :  { %v4772_v33 = vpop.f32.mrf.mxu1 }
 0x4b8   :  { %v4773_v28 = vadd.f32 %v4772_v33, %v4771_v22 }
 0x4b9   :  { %v4774_v6 = vpop.f32.mrf.mxu1 }
 0x4ba   :  { %v3067_v5 = vadd.f32 %v4773_v28, %v7071_v59 }
 0x4bb   :  { %v4775_v38 = vpop.f32.mrf.mxu1 }
 0x4bc   :  { %v4776_v19 = vadd.f32 %v4775_v38, %v4774_v6 }
 0x4bd   :  { %v7020_v8 = vpop.f32.mrf.mxu1 }
 0x4be   :  { %v3070_v36 = vadd.f32 %v4776_v19, %v7071_v59 }
 0x4bf   :  { %v7022_v25 = vpop.f32.mrf.mxu1 }
 0x4c1   :  { %v7024_v47 = vpop.f32.mrf.mxu1 }
 0x4c3   :  { %v7026_v61 = vpop.f32.mrf.mxu1 }
 0x4c4   :  { %v4782_v22 = vadd.f32 %v7026_v61, %v7024_v47 }
 0x4c5   :  { %v7028_v52 = vpop.f32.mrf.mxu1 }
 0x4c7   :  { %v7030_v29 = vpop.f32.mrf.mxu1 }
 0x4c9   :  { %v7032_v23 = vpop.f32.mrf.mxu1 }
 0x4cb   :  { %v7034_v0 = vpop.f32.mrf.mxu1 }
 0x4cd   :  { %v4829_v13 = vpop.f32.mrf.mxu0  ;;  %v7036_v26 = vpop.f32.mrf.mxu1 }
 0x4cf   :  { %v4830_v15 = vpop.f32.mrf.mxu0  ;;  %v7038_v53 = vpop.f32.mrf.mxu1 }
 0x4d0   :  { %v4831_v57 = vadd.f32 %v4830_v15, %v4829_v13 }
 0x4d1   :  { %v7040_v21 = vpop.f32.mrf.mxu1  ;;  %v4832_v50 = vpop.f32.mrf.mxu0 }
 0x4d2   :  { %v3156_v31 = vadd.f32 %v4831_v57, %v3059_v17 }
 0x4d3   :  { %v7042_v24 = vpop.f32.mrf.mxu1  ;;  %v4833_v14 = vpop.f32.mrf.mxu0 }
 0x4d4   :  { %v4834_v30 = vadd.f32 %v4833_v14, %v4832_v50 }
 0x4d5   :  { %v7044_v37 = vpop.f32.mrf.mxu1 }
 0x4d6   :  { %v3159_v46 = vadd.f32 %v4834_v30, %v3062_v20 }
 0x4d7   :  { %v7046_v56 = vpop.f32.mrf.mxu1 }
 0x4d9   :  { %v7048_v45 = vpop.f32.mrf.mxu1  ;;  %v4835_v49 = vpop.f32.mrf.mxu0 }
 0x4db   :  { %v7050_v48 = vpop.f32.mrf.mxu1  ;;  %v4836_v16 = vpop.f32.mrf.mxu0 }
 0x4dc   :  { %v4837_v13 = vadd.f32 %v4836_v16, %v4835_v49  ;;  %v4779_v49 = vadd.f32 %v7022_v25, %v7020_v8  ;;  %v4788_v8 = vadd.f32 %v7034_v0, %v7032_v23 }
 0x4dd   :  { %v7052_v42 = vpop.f32.mrf.mxu1  ;;  %v4838_v9 = vpop.f32.mrf.mxu0 }
 0x4de   :  { %v3164_v33 = vadd.f32 %v4837_v13, %v3067_v5  ;;  %v4785_v13 = vadd.f32 %v7030_v29, %v7028_v52  ;;  %v3086_v5 = vadd.f32 %v4788_v8, %v7071_v59  ;;  %v4794_v52 = vadd.f32 %v7042_v24, %v7040_v21 }
 0x4df   :  { %v7054_v34 = vpop.f32.mrf.mxu1  ;;  %v4839_v55 = vpop.f32.mrf.mxu0 }
 0x4e0   :  { %v4840_v35 = vadd.f32 %v4839_v55, %v4838_v9 }
 0x4e1   :  { %v7056_v18 = vpop.f32.mrf.mxu1  ;;  %v4841_v54 = vpop.f32.mrf.mxu0 }
 0x4e2   :  { %v3167_v38 = vadd.f32 %v4840_v35, %v3070_v36 }
 0x4e3   :  { %v7058_v12 = vpop.f32.mrf.mxu1  ;;  %v4842_v58 = vpop.f32.mrf.mxu0 }
 0x4e4   :  { %v4843_v28 = vadd.f32 %v4842_v58, %v4841_v54 }
 0x4e5   :  { %v7060_v62 = vpop.f32.mrf.mxu1  ;;  %v4844_v1 = vpop.f32.mrf.mxu0 }
 0x4e7   :  { %v7062_v32 = vpop.f32.mrf.mxu1  ;;  %v4845_v11 = vpop.f32.mrf.mxu0 }
 0x4e8   :  { %v4846_v16 = vadd.f32 %v4845_v11, %v4844_v1 }
 0x4e9   :  { %v7064_v27 = vpop.f32.mrf.mxu1  ;;  %v7066_v2 = vpop.f32.mrf.mxu0 }
 0x4eb   :  { %v7073_v63 = vpop.f32.mrf.mxu1  ;;  %v4848_v39 = vpop.f32.mrf.mxu0 }
 0x4ed   :  { %v4923_v44 = vpop.f32.mrf.mxu1  ;;  %v4850_v10 = vpop.f32.mrf.mxu0 }
 0x4ee   :  { %v3261_v20 = vadd.f32 %v4923_v44, %v3164_v33 }
 0x4ef   :  { %v3252_v43 = vpop.f32.mrf.mxu1  ;;  %v4851_v51 = vpop.f32.mrf.mxu0 }
 0x4f0   :  { %v3253_v40 = vadd.f32 %v3252_v43, %v3156_v31  ;;  %v3078_v31 = vadd.f32 %v4782_v22, %v7071_v59  ;;  %v4852_v54 = vadd.f32 %v4851_v51, %v4850_v10 }
 0x4f1   :  { %v4924_v60 = vpop.f32.mrf.mxu1  ;;  %v7077_v4 = vpop.f32.mrf.mxu0 }
 0x4f2   :  { %v3315_v6 = vmax.f32 %v3253_v40, 0.0  ;;  %v3264_v55 = vadd.f32 %v4924_v60, %v3167_v38  ;;  %v3075_v60 = vadd.f32 %v4779_v49, %v7071_v59  ;;  %v3317_v40 = vmax.f32 %v3261_v20, 0.0 }
 0x4f3   :  { %v3255_v41 = vpop.f32.mrf.mxu1  ;;  %v4854_v15 = vpop.f32.mrf.mxu0  ;;  %v3183_v33 = vadd.f32 %v4852_v54, %v3086_v5  ;;  %v4803_v54 = vadd.f32 %v7054_v34, %v7052_v42  ;;  %v4809_v42 = vadd.f32 %v7062_v32, %v7060_v62 }
 0x4f4   :  { %v3256_v50 = vadd.f32 %v3255_v41, %v3159_v46  ;;  %v3318_v47 = vmax.f32 %v3264_v55, 0.0  ;;  %v3175_v41 = vadd.f32 %v4846_v16, %v3078_v31  ;;  %v3172_v1 = vadd.f32 %v4843_v28, %v3075_v60 }
 0x4f5   :  { %v4927_v14 = vpop.f32.mrf.mxu1  ;;  %v4856_v7 = vpop.f32.mrf.mxu0  ;;  %v4855_v16 = vadd.f32 %v4854_v15, %v7077_v4 }
 0x4f6   :  { %v3316_v57 = vmax.f32 %v3256_v50, 0.0  ;;  %v3670_v25 = vpack.c.bf16 %v3318_v47, %v3317_v40 }
 0x4f7   :  { %v3268_v17 = vpop.f32.mrf.mxu1  ;;  %v4857_v9 = vpop.f32.mrf.mxu0 }
 0x4f8   :  { %v3669_v30 = vpack.c.bf16 %v3316_v57, %v3315_v6  ;;  %v3269_v58 = vadd.f32 %v3268_v17, %v3172_v1  ;;  %v4849_v6 = vadd.f32 %v4848_v39, %v7066_v2  ;;  %v3083_v57 = vadd.f32 %v4785_v13, %v7071_v59 }
 0x4f9   :  { %v4928_v43 = vpop.f32.mrf.mxu1  ;;  %v7085_v19 = vpop.f32.mrf.mxu0  ;;  %v4858_v49 = vadd.f32 %v4857_v9, %v4856_v7  ;;  %v3094_v39 = vadd.f32 %v4794_v52, %v7071_v59 }
 0x4fa   :  { %4421 = vmatmul.mubr.msk.bf16.vlgmr.msra.gmra.mxu0 %vm1924_vm8, %v3669_v30  ;;  %v3319_v22 = vmax.f32 %v3269_v58, 0.0  ;;  %v3180_v29 = vadd.f32 %v4849_v6, %v3083_v57  ;;  %v3280_v10 = vadd.f32 %v4928_v43, %v3183_v33  ;;  %v4791_v30 = vadd.f32 %v7038_v53, %v7036_v26 }
 0x4fb   :  { %3767 = vmatprep.mubr.bf16.mxu0 %v5098_v3  ;;  %v4860_v61 = vpop.f32.mrf.mxu0  ;;  %v3271_v35 = vpop.f32.mrf.mxu1  ;;  %v3191_v28 = vadd.f32 %v4858_v49, %v3094_v39  ;;  %v4800_v26 = vadd.f32 %v7050_v48, %v7048_v45 }
 0x4fc   :  { %v3272_v44 = vadd.f32 %v3271_v35, %v3175_v41  ;;  %v3277_v2 = vadd.f32 %v4927_v14, %v3180_v29  ;;  %v3322_v20 = vmax.f32 %v3280_v10, 0.0  ;;  %v3091_v43 = vadd.f32 %v4791_v30, %v7071_v59 }
 0x4fd   :  { %v4862_v46 = vpop.f32.mrf.mxu0  ;;  %v4931_v36 = vpop.f32.mrf.mxu1  ;;  %v4797_v35 = vadd.f32 %v7046_v56, %v7044_v37  ;;  %v3102_v15 = vadd.f32 %v4800_v26, %v7071_v59  ;;  %v4861_v40 = vadd.f32 %v4860_v61, %v7085_v19  ;;  %v4806_v37 = vadd.f32 %v7058_v12, %v7056_v18 }
 0x4fe   :  { %v3320_v23 = vmax.f32 %v3272_v44, 0.0  ;;  %v3321_v31 = vmax.f32 %v3277_v2, 0.0  ;;  %v3188_v14 = vadd.f32 %v4855_v16, %v3091_v43  ;;  %v3107_v12 = vadd.f32 %v4803_v54, %v7071_v59 }
 0x4ff   :  { %v4863_v11 = vpop.f32.mrf.mxu0  ;;  %v3284_v38 = vpop.f32.mrf.mxu1  ;;  %v3099_v8 = vadd.f32 %v4797_v35, %v7071_v59  ;;  %v3110_v61 = vadd.f32 %v4806_v37, %v7071_v59  ;;  %v3115_v10 = vadd.f32 %v4809_v42, %v7071_v59 }
 0x500   :  { %v3671_v51 = vpack.c.bf16 %v3320_v23, %v3319_v22  ;;  %v3672_v53 = vpack.c.bf16 %v3322_v20, %v3321_v31  ;;  %v4864_v60 = vadd.f32 %v4863_v11, %v4862_v46  ;;  %v3285_v4 = vadd.f32 %v3284_v38, %v3188_v14 }
 0x501   :  { %v4865_v50 = vpop.f32.mrf.mxu0  ;;  %v4932_v55 = vpop.f32.mrf.mxu1  ;;  %v3196_v56 = vadd.f32 %v4861_v40, %v3099_v8  ;;  %v4812_v38 = vadd.f32 %v7073_v63, %v7064_v27 }
 0x502   :  { %4422 = vmatmul.mubr.msk.bf16.gmra.mxu0 %vm1924_vm8, %v3670_v25  ;;  %v3323_v25 = vmax.f32 %v3285_v4, 0.0  ;;  %v3199_v1 = vadd.f32 %v4864_v60, %v3102_v15 }
 0x503   :  { %3777 = vmatprep.mubr.bf16.mxu0 %v5098_v3  ;;  %v4866_v0 = vpop.f32.mrf.mxu0  ;;  %v3287_v24 = vpop.f32.mrf.mxu1  ;;  %v3293_v58 = vadd.f32 %v4931_v36, %v3196_v56  ;;  %v3118_v29 = vadd.f32 %v4812_v38, %v7071_v59 }
 0x504   :  { %v3288_v7 = vadd.f32 %v3287_v24, %v3191_v28  ;;  %v3296_v46 = vadd.f32 %v4932_v55, %v3199_v1  ;;  %v4867_v5 = vadd.f32 %v4866_v0, %v4865_v50 }
 0x505   :  { %v4868_v17 = vpop.f32.mrf.mxu0  ;;  %v4935_v47 = vpop.f32.mrf.mxu1  ;;  %v3325_v57 = vmax.f32 %v3293_v58, 0.0 }
 0x506   :  { %v3324_v41 = vmax.f32 %v3288_v7, 0.0  ;;  %v3326_v6 = vmax.f32 %v3296_v46, 0.0  ;;  %v3204_v36 = vadd.f32 %v4867_v5, %v3107_v12 }
 0x507   :  { %v4869_v21 = vpop.f32.mrf.mxu0  ;;  %v3300_v48 = vpop.f32.mrf.mxu1 }
 0x508   :  { %v3673_v11 = vpack.c.bf16 %v3324_v41, %v3323_v25  ;;  %v4870_v19 = vadd.f32 %v4869_v21, %v4868_v17  ;;  %v3674_v34 = vpack.c.bf16 %v3326_v6, %v3325_v57  ;;  %v3301_v0 = vadd.f32 %v3300_v48, %v3204_v36 }
 0x509   :  { %v4871_v9 = vpop.f32.mrf.mxu0  ;;  %v4936_v13 = vpop.f32.mrf.mxu1  ;;  %v3872_v57 = vlaneseq }
 0x50a   :  { %4423 = vmatmul.mubr.msk.bf16.gmra.mxu0 %vm1924_vm8, %v3671_v51  ;;  %v3207_v22 = vadd.f32 %v4870_v19, %v3110_v61  ;;  %v3327_v17 = vmax.f32 %v3301_v0, 0.0 }
 0x50b   :  { %3787 = vmatprep.mubr.bf16.mxu0 %v5098_v3  ;;  %v4872_v45 = vpop.f32.mrf.mxu0  ;;  %v3303_v18 = vpop.f32.mrf.mxu1 }
 0x50c   :  { %v3304_v52 = vadd.f32 %v3303_v18, %v3207_v22  ;;  %v4873_v50 = vadd.f32 %v4872_v45, %v4871_v9 }
 0x50d   :  { %v4874_v44 = vpop.f32.mrf.mxu0 }
 0x50e   :  { %v3328_v63 = vmax.f32 %v3304_v52, 0.0  ;;  %v3212_v51 = vadd.f32 %v4873_v50, %v3115_v10 }
 0x50f   :  { %v4875_v23 = vpop.f32.mrf.mxu0 }
 0x510   :  { %v4876_v33 = vadd.f32 %v4875_v23, %v4874_v44  ;;  %v3675_v62 = vpack.c.bf16 %v3328_v63, %v3327_v17  ;;  %v3309_v32 = vadd.f32 %v4935_v47, %v3212_v51  ;;  %v3590_v47 = vpop.f32.mrf.mxu1 }
 0x511   :  { %v3433_v39 = vpop.f32.mrf.mxu0 }
 0x512   :  { %4424 = vmatmul.mubr.msk.bf16.gmra.mxu0 %vm1924_vm8, %v3672_v53  ;;  %v3215_v27 = vadd.f32 %v4876_v33, %v3118_v29  ;;  %v3329_v49 = vmax.f32 %v3309_v32, 0.0  ;;  %v3592_v60 = vpop.f32.mrf.mxu1  ;;  %v3870_v29 = vld [vmem:[%s7429_s10] sm:$0x3] }
 0x513   :  { %3797 = vmatprep.mubr.bf16.mxu0 %v5098_v3  ;;  %v3435_v16 = vpop.f32.mrf.mxu0 }
 0x514   :  { %v3312_v55 = vadd.f32 %v4936_v13, %v3215_v27  ;;  %v3594_v15 = vpop.f32.mrf.mxu1  ;;  %v3591_v27 = vadd.f32 %v3590_v47, %v3433_v39  ;;  %v3593_v17 = vadd.f32 %v3592_v60, %v3435_v16  ;;  %v3915_v39 = vld [vmem:[%s7419_s0 + $0x8] sm:$0xff] }
 0x515   :  { %v3437_v20 = vpop.f32.mrf.mxu0 }
 0x516   :  { %v3330_v30 = vmax.f32 %v3312_v55, 0.0  ;;  %v3596_v41 = vpop.f32.mrf.mxu1 }
 0x517   :  { %v7137_v59 = vpop.f32.mrf.mxu0 }
 0x518   :  { %v3676_v2 = vpack.c.bf16 %v3330_v30, %v3329_v49  ;;  %v3600_v48 = vpop.f32.mrf.mxu1  ;;  %v3914_v30 = vld [vmem:[%s7419_s0] sm:$0xff]  ;;  %v3597_v16 = vadd.f32 %v3596_v41, %v7137_v59  ;;  %v3917_v41 = vld [vmem:[%s7419_s0 + $0x18] sm:$0xff] }
 0x519   :  { %v7139_v21 = vpop.f32.mrf.mxu0 }
 0x51a   :  { %4425 = vmatmul.mubr.msk.bf16.gmra.mxu0 %vm1924_vm8, %v3673_v11  ;;  %v3602_v25 = vpop.f32.mrf.mxu1 }
 0x51b   :  { %3807 = vmatprep.mubr.bf16.mxu0 %v5098_v3  ;;  %v7141_v24 = vpop.f32.mrf.mxu0 }
 0x51c   :  { %v3604_v37 = vpop.f32.mrf.mxu1  ;;  %v3603_v59 = vadd.f32 %v3602_v25, %v7141_v24 }
 0x51d   :  { %v7143_v43 = vpop.f32.mrf.mxu0 }
 0x51e   :  { %v7175_v46 = vpop.f32.mrf.mxu1 }
 0x51f   :  { %v7145_v31 = vpop.f32.mrf.mxu0 }
 0x520   :  { %v7179_v44 = vpop.f32.mrf.mxu1 }
 0x521   :  { %v7147_v28 = vpop.f32.mrf.mxu0 }
 0x522   :  { %4426 = vmatmul.mubr.msk.bf16.gmra.mxu0 %vm1924_vm8, %v3674_v34  ;;  %v7183_v54 = vpop.f32.mrf.mxu1  ;;  %v3873_v34 = vshrl.u32 %v3872_v57, 7 }
 0x523   :  { %3817 = vmatprep.mubr.bf16.mxu0 %v5098_v3 }
 0x524   :  { %v7187_v19 = vpop.f32.mrf.mxu1  ;;  %v3874_v52 = vsub.s32 0, %v3873_v34  ;;  %v3878_v0 = vsub.s32 1, %v3873_v34 }
 0x526   :  { %v7191_v5 = vpop.f32.mrf.mxu1  ;;  %v7218_v63 = vrot.slane %v3870_v29, %v3874_v52  ;;  %v7222_v32 = vrot.slane %v3870_v29, %v3878_v0 }
 0x528   :  { %v7195_v23 = vpop.f32.mrf.mxu1 }
 0x52a   :  { %4427 = vmatmul.mubr.msk.bf16.gmra.mxu0 %vm1924_vm8, %v3675_v62  ;;  %v7199_v12 = vpop.f32.mrf.mxu1 }
 0x52b   :  { %3827 = vmatprep.mubr.bf16.mxu0 %v5098_v3  ;;  %v7149_v3 = vpop.f32.mrf.mxu0 }
 0x52c   :  { %v7203_v22 = vpop.f32.mrf.mxu1 }
 0x52d   :  { %v7151_v26 = vpop.f32.mrf.mxu0 }
 0x52e   :  { %v7207_v36 = vpop.f32.mrf.mxu1 }
 0x52f   :  { %v7153_v53 = vpop.f32.mrf.mxu0 }
 0x530   :  { %v7214_v50 = vpop.f32.mrf.mxu1 }
 0x531   :  { %v7155_v14 = vpop.f32.mrf.mxu0 }
 0x532   :  { %4428 = vmatmul.mubr.msk.bf16.gmra.mxu0 %vm1924_vm8, %v3676_v2  ;;  %v7220_v55 = vpop.f32.mrf.mxu1  ;;  %v3595_v2 = vadd.f32 %v3594_v15, %v3437_v20  ;;  %v3916_v20 = vld [vmem:[%s7419_s0 + $0x10] sm:$0xff] }
 0x533   :  { %v7157_v7 = vpop.f32.mrf.mxu0 }
 0x534   :  { %v7232_v60 = vpop.f32.mrf.mxu1 }
 0x535   :  { %v7159_v9 = vpop.f32.mrf.mxu0 }
 0x537   :  { %v7161_v35 = vpop.f32.mrf.mxu0 }
 0x539   :  { %v7163_v4 = vpop.f32.mrf.mxu0 }
 0x53b   :  { %v7165_v40 = vpop.f32.mrf.mxu0 }
 0x53d   :  { %v7167_v45 = vpop.f32.mrf.mxu0 }
 0x53f   :  { %v7169_v8 = vpop.f32.mrf.mxu0 }
 0x541   :  { %v7171_v1 = vpop.f32.mrf.mxu0 }
 0x543   :  { %v7173_v56 = vpop.f32.mrf.mxu0 }
 0x545   :  { %v7177_v11 = vpop.f32.mrf.mxu0 }
 0x547   :  { %v7181_v13 = vpop.f32.mrf.mxu0 }
 0x549   :  { %v7185_v58 = vpop.f32.mrf.mxu0 }
 0x54b   :  { %v7189_v61 = vpop.f32.mrf.mxu0 }
 0x54d   :  { %v7193_v6 = vpop.f32.mrf.mxu0 }
 0x54f   :  { %v7197_v18 = vpop.f32.mrf.mxu0 }
 0x551   :  { %v7201_v38 = vpop.f32.mrf.mxu0 }
 0x553   :  { %v7205_v42 = vpop.f32.mrf.mxu0 }
 0x555   :  { %v7209_v33 = vpop.f32.mrf.mxu0 }
 0x557   :  { %v7216_v10 = vpop.f32.mrf.mxu0 }
 0x5ba   :  { %v3759_v51 = vpop.f32.mrf.mxu0 }
 0x5bb   :  { %v3838_v62 = vadd.f32 %v3759_v51, %v3591_v27  ;;  %v3601_v27 = vadd.f32 %v3600_v48, %v7139_v21 }
 0x5bc   :  { %v3761_v49 = vpop.f32.mrf.mxu0 }
 0x5bd   :  { %v3882_v57 = vadd.f32 %v7218_v63, %v3838_v62  ;;  %v3839_v34 = vadd.f32 %v3761_v49, %v3593_v17 }
 0x5be   :  { %v3763_v47 = vpop.f32.mrf.mxu0 }
 0x5bf   :  { %v3946_v52 = vadd.f32 %v3914_v30, %v3882_v57  ;;  %v3883_v29 = vadd.f32 %v7222_v32, %v3839_v34  ;;  %v3840_v0 = vadd.f32 %v3763_v47, %v3595_v2  ;;  %v7244_v2 = vpop.f32.mrf.mxu1  ;;  %v3918_v47 = vld [vmem:[%s7419_s0 + $0x20] sm:$0xff] }
 0x5c0   :  { %v3765_v15 = vpop.f32.mrf.mxu0 }
 0x5c1   :  { %v3978_v51 = vmax.f32 %v3946_v52, 0.0  ;;  %v3947_v17 = vadd.f32 %v3915_v39, %v3883_v29  ;;  %v3884_v62 = vadd.f32 %v7218_v63, %v3840_v0  ;;  %v3841_v49 = vadd.f32 %v3765_v15, %v3597_v16 }
 0x5c2   :  { %v3769_v30 = vpop.f32.mrf.mxu0  ;;  %v3605_v39 = vadd.f32 %v3604_v37, %v7143_v43  ;;  %v3607_v0 = vadd.f32 %v7175_v46, %v7145_v31  ;;  %v7257_v43 = vpop.f32.mrf.mxu1  ;;  %v3920_v31 = vld [vmem:[%s7419_s0 + $0x30] sm:$0xff] }
 0x5c3   :  { %4010 = vst [vmem:[#allocation3] sm:$0xff] %v3978_v51  ;;  %v3979_v21 = vmax.f32 %v3947_v17, 0.0  ;;  %v3948_v48 = vadd.f32 %v3916_v20, %v3884_v62  ;;  %v3885_v57 = vadd.f32 %v7222_v32, %v3841_v49  ;;  %v3842_v34 = vadd.f32 %v3769_v30, %v3601_v27  ;;  %v3919_v27 = vld [vmem:[%s7419_s0 + $0x28] sm:$0xff] }
 0x5c4   :  { %v3771_v24 = vpop.f32.mrf.mxu0  ;;  %v3611_v62 = vadd.f32 %v7179_v44, %v7147_v28  ;;  %v7271_v28 = vpop.f32.mrf.mxu1 }
 0x5c5   :  { %4011 = vst [vmem:[#allocation3 + $0x8] sm:$0xff] %v3979_v21  ;;  %v3980_v25 = vmax.f32 %v3948_v48, 0.0  ;;  %v3949_v16 = vadd.f32 %v3917_v41, %v3885_v57  ;;  %v3886_v52 = vadd.f32 %v7218_v63, %v3842_v34  ;;  %v3843_v29 = vadd.f32 %v3771_v24, %v3603_v59  ;;  %v3921_v48 = vld [vmem:[%s7419_s0 + $0x38] sm:$0xff] }
 0x5c6   :  { %v3773_v20 = vpop.f32.mrf.mxu0  ;;  %v3613_v21 = vadd.f32 %v7183_v54, %v7149_v3  ;;  %v3615_v24 = vadd.f32 %v7187_v19, %v7151_v26  ;;  %v3922_v3 = vld [vmem:[%s7419_s0 + $0x40] sm:$0xff]  ;;  %v7285_v26 = vpop.f32.mrf.mxu1 }
 0x5c7   :  { %4012 = vst [vmem:[#allocation3 + $0x10] sm:$0xff] %v3980_v25  ;;  %v3981_v37 = vmax.f32 %v3949_v16, 0.0  ;;  %v3950_v15 = vadd.f32 %v3918_v47, %v3886_v52  ;;  %v3887_v51 = vadd.f32 %v7222_v32, %v3843_v29  ;;  %v3844_v17 = vadd.f32 %v3773_v20, %v3605_v39 }
 0x5c8   :  { %v3775_v46 = vpop.f32.mrf.mxu0 }
 0x5c9   :  { %4013 = vst [vmem:[#allocation3 + $0x18] sm:$0xff] %v3981_v37  ;;  %v3982_v49 = vmax.f32 %v3950_v15, 0.0  ;;  %v3951_v59 = vadd.f32 %v3919_v27, %v3887_v51  ;;  %v3888_v41 = vadd.f32 %v7218_v63, %v3844_v17  ;;  %v3845_v30 = vadd.f32 %v3775_v46, %v3607_v0  ;;  %v3923_v27 = vld [vmem:[%s7419_s0 + $0x48] sm:$0xff] }
 0x5ca   :  { %v3779_v57 = vpop.f32.mrf.mxu0  ;;  %v3617_v0 = vadd.f32 %v7191_v5, %v7153_v53  ;;  %v3621_v17 = vadd.f32 %v7195_v23, %v7155_v14  ;;  %v3924_v53 = vld [vmem:[%s7419_s0 + $0x50] sm:$0xff]  ;;  %v7299_v14 = vpop.f32.mrf.mxu1 }
 0x5cb   :  { %4014 = vst [vmem:[#allocation3 + $0x20] sm:$0xff] %v3982_v49  ;;  %v3983_v44 = vmax.f32 %v3951_v59, 0.0  ;;  %v3952_v34 = vadd.f32 %v3920_v31, %v3888_v41  ;;  %v3889_v39 = vadd.f32 %v7222_v32, %v3845_v30  ;;  %v3846_v47 = vadd.f32 %v3779_v57, %v3611_v62  ;;  %v3925_v41 = vld [vmem:[%s7419_s0 + $0x58] sm:$0xff] }
 0x5cc   :  { %v3781_v54 = vpop.f32.mrf.mxu0  ;;  %v3623_v59 = vadd.f32 %v7199_v12, %v7157_v7  ;;  %v3926_v7 = vld [vmem:[%s7419_s0 + $0x60] sm:$0xff] }
 0x5cd   :  { %4015 = vst [vmem:[#allocation3 + $0x28] sm:$0xff] %v3983_v44  ;;  %v3984_v25 = vmax.f32 %v3952_v34, 0.0  ;;  %v3953_v16 = vadd.f32 %v3921_v48, %v3889_v39  ;;  %v3890_v52 = vadd.f32 %v7218_v63, %v3846_v47  ;;  %v3847_v29 = vadd.f32 %v3781_v54, %v3613_v21  ;;  %v3927_v54 = vld [vmem:[%s7419_s0 + $0x68] sm:$0xff] }
 0x5ce   :  { %v3783_v20 = vpop.f32.mrf.mxu0  ;;  %v3625_v44 = vadd.f32 %v7203_v22, %v7159_v9  ;;  %v7313_v9 = vpop.f32.mrf.mxu1 }
 0x5cf   :  { %4016 = vst [vmem:[#allocation3 + $0x30] sm:$0xff] %v3984_v25  ;;  %v3985_v19 = vmax.f32 %v3953_v16, 0.0  ;;  %v3954_v37 = vadd.f32 %v3922_v3, %v3890_v52  ;;  %v3891_v15 = vadd.f32 %v7222_v32, %v3847_v29  ;;  %v3848_v51 = vadd.f32 %v3783_v20, %v3615_v24 }
 0x5d0   :  { %v3785_v5 = vpop.f32.mrf.mxu0  ;;  %v3627_v3 = vadd.f32 %v7207_v36, %v7161_v35  ;;  %v3928_v35 = vld [vmem:[%s7419_s0 + $0x70] sm:$0xff] }
 0x5d1   :  { %4017 = vst [vmem:[#allocation3 + $0x38] sm:$0xff] %v3985_v19  ;;  %v3986_v62 = vmax.f32 %v3954_v37, 0.0  ;;  %v3955_v31 = vadd.f32 %v3923_v27, %v3891_v15  ;;  %v3892_v46 = vadd.f32 %v7218_v63, %v3848_v51  ;;  %v3849_v49 = vadd.f32 %v3785_v5, %v3617_v0  ;;  %v3929_v51 = vld [vmem:[%s7419_s0 + $0x78] sm:$0xff] }
 0x5d2   :  { %v3789_v30 = vpop.f32.mrf.mxu0  ;;  %v3631_v0 = vadd.f32 %v7214_v50, %v7163_v4  ;;  %v3633_v15 = vadd.f32 %v7220_v55, %v7165_v40  ;;  %v7327_v4 = vpop.f32.mrf.mxu1  ;;  %v3930_v40 = vld [vmem:[%s7419_s0 + $0x80] sm:$0xff] }
 0x5d3   :  { %4018 = vst [vmem:[#allocation3 + $0x40] sm:$0xff] %v3986_v62  ;;  %v3987_v23 = vmax.f32 %v3955_v31, 0.0  ;;  %v3956_v21 = vadd.f32 %v3924_v53, %v3892_v46  ;;  %v3893_v48 = vadd.f32 %v7222_v32, %v3849_v49  ;;  %v3850_v57 = vadd.f32 %v3789_v30, %v3621_v17 }
 0x5d4   :  { %v3791_v12 = vpop.f32.mrf.mxu0  ;;  %v3635_v31 = vadd.f32 %v7232_v60, %v7167_v45  ;;  %v3637_v30 = vadd.f32 %v7244_v2, %v7169_v8  ;;  %v3654_v45 = vpop.f32.mrf.mxu1 }
 0x5d5   :  { %4019 = vst [vmem:[#allocation3 + $0x48] sm:$0xff] %v3987_v23  ;;  %v3988_v34 = vmax.f32 %v3956_v21, 0.0  ;;  %v3957_v39 = vadd.f32 %v3925_v41, %v3893_v48  ;;  %v3894_v47 = vadd.f32 %v7218_v63, %v3850_v57  ;;  %v3851_v24 = vadd.f32 %v3791_v12, %v3623_v59  ;;  %v3931_v23 = vld [vmem:[%s7419_s0 + $0x88] sm:$0xff]  ;;  %v3932_v12 = vld [vmem:[%s7419_s0 + $0x90] sm:$0xff] }
 0x5d6   :  { %v3793_v25 = vpop.f32.mrf.mxu0 }
 0x5d7   :  { %4020 = vst [vmem:[#allocation3 + $0x50] sm:$0xff] %v3988_v34  ;;  %v3989_v22 = vmax.f32 %v3957_v39, 0.0  ;;  %v3958_v16 = vadd.f32 %v3926_v7, %v3894_v47  ;;  %v3895_v52 = vadd.f32 %v7222_v32, %v3851_v24  ;;  %v3852_v29 = vadd.f32 %v3793_v25, %v3625_v44 }
 0x5d8   :  { %v3795_v36 = vpop.f32.mrf.mxu0  ;;  %v3641_v7 = vadd.f32 %v7257_v43, %v7171_v1  ;;  %v3643_v24 = vadd.f32 %v7271_v28, %v7173_v56  ;;  %v3656_v1 = vpop.f32.mrf.mxu1 }
 0x5d9   :  { %4021 = vst [vmem:[#allocation3 + $0x58] sm:$0xff] %v3989_v22  ;;  %v3990_v27 = vmax.f32 %v3958_v16, 0.0  ;;  %v3959_v20 = vadd.f32 %v3927_v54, %v3895_v52  ;;  %v3896_v19 = vadd.f32 %v7218_v63, %v3852_v29  ;;  %v3853_v37 = vadd.f32 %v3795_v36, %v3627_v3  ;;  %v3933_v3 = vld [vmem:[%s7419_s0 + $0x98] sm:$0xff]  ;;  %v3934_v29 = vld [vmem:[%s7419_s0 + $0xa0] sm:$0xff] }
 0x5da   :  { %v3799_v17 = vpop.f32.mrf.mxu0  ;;  %v3645_v52 = vadd.f32 %v7285_v26, %v7177_v11  ;;  %v3660_v11 = vpop.f32.mrf.mxu1 }
 0x5db   :  { %4022 = vst [vmem:[#allocation3 + $0x60] sm:$0xff] %v3990_v27  ;;  %v3991_v50 = vmax.f32 %v3959_v20, 0.0  ;;  %v3960_v53 = vadd.f32 %v3928_v35, %v3896_v19  ;;  %v3897_v5 = vadd.f32 %v7222_v32, %v3853_v37  ;;  %v3854_v62 = vadd.f32 %v3799_v17, %v3631_v0  ;;  %v3935_v20 = vld [vmem:[%s7419_s0 + $0xa8] sm:$0xff] }
 0x5dc   :  { %v3801_v55 = vpop.f32.mrf.mxu0  ;;  %v3647_v27 = vadd.f32 %v7299_v14, %v7181_v13  ;;  %v3651_v17 = vadd.f32 %v7313_v9, %v7185_v58  ;;  %v3662_v58 = vpop.f32.mrf.mxu1 }
 0x5dd   :  { %4023 = vst [vmem:[#allocation3 + $0x68] sm:$0xff] %v3991_v50  ;;  %v3992_v46 = vmax.f32 %v3960_v53, 0.0  ;;  %v3961_v49 = vadd.f32 %v3929_v51, %v3897_v5  ;;  %v3898_v59 = vadd.f32 %v7218_v63, %v3854_v62  ;;  %v3855_v41 = vadd.f32 %v3801_v55, %v3633_v15  ;;  %v3936_v50 = vld [vmem:[%s7419_s0 + $0xb0] sm:$0xff] }
 0x5de   :  { %v3803_v21 = vpop.f32.mrf.mxu0 }
 0x5df   :  { %4024 = vst [vmem:[#allocation3 + $0x70] sm:$0xff] %v3992_v46  ;;  %v3993_v60 = vmax.f32 %v3961_v49, 0.0  ;;  %v3962_v48 = vadd.f32 %v3930_v40, %v3898_v59  ;;  %v3899_v57 = vadd.f32 %v7222_v32, %v3855_v41  ;;  %v3856_v44 = vadd.f32 %v3803_v21, %v3635_v31  ;;  %v3937_v40 = vld [vmem:[%s7419_s0 + $0xb8] sm:$0xff] }
 0x5e0   :  { %v3805_v8 = vpop.f32.mrf.mxu0  ;;  %v3653_v31 = vadd.f32 %v7327_v4, %v7189_v61  ;;  %v3655_v41 = vadd.f32 %v3654_v45, %v7193_v6 }
 0x5e1   :  { %4025 = vst [vmem:[#allocation3 + $0x78] sm:$0xff] %v3993_v60  ;;  %v3994_v2 = vmax.f32 %v3962_v48, 0.0  ;;  %v3963_v34 = vadd.f32 %v3931_v23, %v3899_v57  ;;  %v3900_v39 = vadd.f32 %v7218_v63, %v3856_v44  ;;  %v3857_v47 = vadd.f32 %v3805_v8, %v3637_v30  ;;  %v3938_v30 = vld [vmem:[%s7419_s0 + $0xc0] sm:$0xff]  ;;  %v3939_v57 = vld [vmem:[%s7419_s0 + $0xc8] sm:$0xff] }
 0x5e2   :  { %v3809_v54 = vpop.f32.mrf.mxu0  ;;  %v3657_v48 = vadd.f32 %v3656_v1, %v7197_v18  ;;  %v3941_v1 = vld [vmem:[%s7419_s0 + $0xd8] sm:$0xff] }
 0x5e3   :  { %4026 = vst [vmem:[#allocation3 + $0x80] sm:$0xff] %v3994_v2  ;;  %v3995_v43 = vmax.f32 %v3963_v34, 0.0  ;;  %v3964_v25 = vadd.f32 %v3932_v12, %v3900_v39  ;;  %v3901_v22 = vadd.f32 %v7222_v32, %v3857_v47  ;;  %v3858_v16 = vadd.f32 %v3809_v54, %v3641_v7  ;;  %v3664_v7 = vpop.f32.mrf.mxu1  ;;  %v3940_v34 = vld [vmem:[%s7419_s0 + $0xd0] sm:$0xff] }
 0x5e4   :  { %v3811_v56 = vpop.f32.mrf.mxu0  ;;  %v3661_v2 = vadd.f32 %v3660_v11, %v7201_v38  ;;  %v3663_v54 = vadd.f32 %v3662_v58, %v7205_v42 }
 0x5e5   :  { %4027 = vst [vmem:[#allocation3 + $0x88] sm:$0xff] %v3995_v43  ;;  %v3996_v28 = vmax.f32 %v3964_v25, 0.0  ;;  %v3965_v0 = vadd.f32 %v3933_v3, %v3901_v22  ;;  %v3902_v35 = vadd.f32 %v7218_v63, %v3858_v16  ;;  %v3859_v36 = vadd.f32 %v3811_v56, %v3643_v24  ;;  %v3666_v25 = vpop.f32.mrf.mxu1  ;;  %v3942_v56 = vld [vmem:[%s7419_s0 + $0xe0] sm:$0xff] }
 0x5e6   :  { %v3813_v19 = vpop.f32.mrf.mxu0 }
 0x5e7   :  { %4028 = vst [vmem:[#allocation3 + $0x90] sm:$0xff] %v3996_v28  ;;  %v3997_v26 = vmax.f32 %v3965_v0, 0.0  ;;  %v3966_v37 = vadd.f32 %v3934_v29, %v3902_v35  ;;  %v3903_v15 = vadd.f32 %v7222_v32, %v3859_v36  ;;  %v3860_v51 = vadd.f32 %v3813_v19, %v3645_v52 }
 0x5e8   :  { %v3815_v13 = vpop.f32.mrf.mxu0  ;;  %v3665_v29 = vadd.f32 %v3664_v7, %v7209_v33 }
 0x5e9   :  { %4029 = vst [vmem:[#allocation3 + $0x98] sm:$0xff] %v3997_v26  ;;  %v3998_v14 = vmax.f32 %v3966_v37, 0.0  ;;  %v3967_v53 = vadd.f32 %v3935_v20, %v3903_v15  ;;  %v3904_v5 = vadd.f32 %v7218_v63, %v3860_v51  ;;  %v3861_v62 = vadd.f32 %v3815_v13, %v3647_v27  ;;  %v3943_v20 = vld [vmem:[%s7419_s0 + $0xe8] sm:$0xff]  ;;  %v3944_v15 = vld [vmem:[%s7419_s0 + $0xf0] sm:$0xff] }
 0x5ea   :  { %v3819_v55 = vpop.f32.mrf.mxu0  ;;  %v3667_v27 = vadd.f32 %v3666_v25, %v7216_v10 }
 0x5eb   :  { %4030 = vst [vmem:[#allocation3 + $0xa0] sm:$0xff] %v3998_v14  ;;  %v3999_v9 = vmax.f32 %v3967_v53, 0.0  ;;  %v3968_v46 = vadd.f32 %v3936_v50, %v3904_v5  ;;  %v3905_v49 = vadd.f32 %v7222_v32, %v3861_v62  ;;  %v3862_v59 = vadd.f32 %v3819_v55, %v3651_v17  ;;  %v3945_v14 = vld [vmem:[%s7419_s0 + $0xf8] sm:$0xff] }
 0x5ec   :  { %v3821_v23 = vpop.f32.mrf.mxu0 }
 0x5ed   :  { %4031 = vst [vmem:[#allocation3 + $0xa8] sm:$0xff] %v3999_v9  ;;  %v4000_v61 = vmax.f32 %v3968_v46, 0.0  ;;  %v3969_v4 = vadd.f32 %v3937_v40, %v3905_v49  ;;  %v3906_v21 = vadd.f32 %v7218_v63, %v3862_v59  ;;  %v3863_v60 = vadd.f32 %v3821_v23, %v3653_v31 }
 0x5ee   :  { %v3823_v44 = vpop.f32.mrf.mxu0 }
 0x5ef   :  { %4032 = vst [vmem:[#allocation3 + $0xb0] sm:$0xff] %v4000_v61  ;;  %v4001_v6 = vmax.f32 %v3969_v4, 0.0  ;;  %v3970_v45 = vadd.f32 %v3938_v30, %v3906_v21  ;;  %v3907_v12 = vadd.f32 %v7222_v32, %v3863_v60  ;;  %v3864_v8 = vadd.f32 %v3823_v44, %v3655_v41 }
 0x5f0   :  { %v3825_v39 = vpop.f32.mrf.mxu0 }
 0x5f1   :  { %4033 = vst [vmem:[#allocation3 + $0xb8] sm:$0xff] %v4001_v6  ;;  %v4002_v18 = vmax.f32 %v3970_v45, 0.0  ;;  %v3971_v47 = vadd.f32 %v3939_v57, %v3907_v12  ;;  %v3908_v24 = vadd.f32 %v7218_v63, %v3864_v8  ;;  %v3865_v3 = vadd.f32 %v3825_v39, %v3657_v48 }
 0x5f2   :  { %v3829_v43 = vpop.f32.mrf.mxu0 }
 0x5f3   :  { %4034 = vst [vmem:[#allocation3 + $0xc0] sm:$0xff] %v4002_v18  ;;  %v4003_v38 = vmax.f32 %v3971_v47, 0.0  ;;  %v3972_v22 = vadd.f32 %v3940_v34, %v3908_v24  ;;  %v3909_v16 = vadd.f32 %v7222_v32, %v3865_v3  ;;  %v3866_v52 = vadd.f32 %v3829_v43, %v3661_v2 }
 0x5f4   :  { %v3831_v28 = vpop.f32.mrf.mxu0 }
 0x5f5   :  { %4035 = vst [vmem:[#allocation3 + $0xc8] sm:$0xff] %v4003_v38  ;;  %v4004_v42 = vmax.f32 %v3972_v22, 0.0  ;;  %v3973_v0 = vadd.f32 %v3941_v1, %v3909_v16  ;;  %v3910_v35 = vadd.f32 %v7218_v63, %v3866_v52  ;;  %v3867_v36 = vadd.f32 %v3831_v28, %v3663_v54 }
 0x5f6   :  { %v3833_v19 = vpop.f32.mrf.mxu0 }
 0x5f7   :  { %4036 = vst [vmem:[#allocation3 + $0xd0] sm:$0xff] %v4004_v42  ;;  %v4005_v33 = vmax.f32 %v3973_v0, 0.0  ;;  %v3974_v11 = vadd.f32 %v3942_v56, %v3910_v35  ;;  %v3911_v26 = vadd.f32 %v7222_v32, %v3867_v36  ;;  %v3868_v37 = vadd.f32 %v3833_v19, %v3665_v29 }
 0x5f8   :  { %v3835_v51 = vpop.f32.mrf.mxu0 }
 0x5f9   :  { %4037 = vst [vmem:[#allocation3 + $0xd8] sm:$0xff] %v4005_v33  ;;  %v4006_v17 = vmax.f32 %v3974_v11, 0.0  ;;  %v3975_v50 = vadd.f32 %v3943_v20, %v3911_v26  ;;  %v3912_v10 = vadd.f32 %v7218_v63, %v3868_v37  ;;  %v3869_v13 = vadd.f32 %v3835_v51, %v3667_v27 }
 0x5fb   :  { %4038 = vst [vmem:[#allocation3 + $0xe0] sm:$0xff] %v4006_v17  ;;  %v4007_v53 = vmax.f32 %v3975_v50, 0.0  ;;  %v3976_v5 = vadd.f32 %v3944_v15, %v3912_v10  ;;  %v3913_v62 = vadd.f32 %v7222_v32, %v3869_v13 }
 0x5fd   :  { %4039 = vst [vmem:[#allocation3 + $0xe8] sm:$0xff] %v4007_v53  ;;  %v4008_v31 = vmax.f32 %v3976_v5, 0.0  ;;  %v3977_v40 = vadd.f32 %v3945_v14, %v3913_v62 }
 0x5ff   :  { %4040 = vst [vmem:[#allocation3 + $0xf0] sm:$0xff] %v4008_v31  ;;  %v4009_v55 = vmax.f32 %v3977_v40, 0.0 }
 0x601   :  { %4041 = vst [vmem:[#allocation3 + $0xf8] sm:$0xff] %v4009_v55 }
 0x602   :  { %5084 = shalt.err (!%p5081_p4)
}
 0x603   :  { %s5100_s0 = smov 256   ;;  %s5101_s23 = smov 16  }
 0x604   :  { %4053 = dma.vmem_to_hbm [thread:$0]  %s4048_s21, 4096, %s7430_s11, [#allocation4], %s5100_s0, %s5100_s0, %s5101_s23  }
 0x605   :  { %5093 = dma.done.wait [#allocation4], 4096  }
 0x606   :  { %5094 = vsyncadd [#allocation4], 4294963200 }
 0x607   :  { %4057 = vsyncpa [#allocation4], 1 }

</bundles_post_ra>
